<compile_context>
chip_gen: v6e
topology: v6e:2x2x1
jax: 0.10.0
libtpu: 0.0.40
codegen_flags: <defaults>
</compile_context>

<pallas_src>
import functools

import jax
import jax.numpy as jnp
from jax.experimental import pallas as pl
from jax.experimental.pallas import tpu as pltpu

BN_EPS = 1e-5


# ----------------------------------------------------------------------------
# Hardware-aware knobs
# ----------------------------------------------------------------------------
def _round_up(x, m):
    return ((x + m - 1) // m) * m


@functools.lru_cache(maxsize=None)
def _vmem_budget():
    """Generation-aware VMEM limit (v7x only has 64 MiB physical VMEM)."""
    cap = 128 * 1024 * 1024
    try:
        cap = int(getattr(pltpu.get_tpu_info(), "vmem_capacity_bytes", cap))
    except Exception:
        pass
    return max(16 * 1024 * 1024, min(64 * 1024 * 1024, cap // 2))


@functools.lru_cache(maxsize=None)
def _cout_tile_unit():
    """MXU-width-matched Cout tile: 128 on v4/v5, 256 on v6e/v7x."""
    try:
        kind = jax.devices()[0].device_kind.lower()
        if "v4" in kind or "v5" in kind:
            return 128
    except Exception:
        pass
    return 256


def _cout_tile(c):
    t = _cout_tile_unit()
    return t if (c > t and c % t == 0) else c


# ----------------------------------------------------------------------------
# Kernel 1: direct 3x3 conv, BN folded, + bias (+ residual / fused 1x1 proj)
#           + ReLU.  TB samples per grid step, weights resident across batch.
# ----------------------------------------------------------------------------
def _direct_conv_kernel(*refs, stride, Ho, Wo, relu, res_mode, out_padded, TB):
    if res_mode == "add":
        x_ref, w_ref, b_ref, r_ref, o_ref = refs
    elif res_mode == "proj":
        x_ref, w_ref, b_ref, sx_ref, sw_ref, o_ref = refs
    else:
        x_ref, w_ref, b_ref, o_ref = refs

    k = 3
    s = stride
    M = Ho * Wo
    KC = w_ref.shape[1]          # 3 * Cin
    tn = o_ref.shape[-1]

    for b in range(TB):
        # Hoisted W-compacted, channel-concatenated slabs: one per H-phase.
        # Only <=2 of the underlying W slices are sublane-unaligned and each is
        # built exactly once (reused by all 3 kh taps).
        cats = []
        for hph in range(s):
            cols = []
            for kw in range(k):
                p = hph * s + (kw % s)
                woff = kw // s
                cols.append(x_ref[b, p, :, woff:woff + Wo, :])   # (Hq, Wo, Cin)
            cats.append(jnp.concatenate(cols, axis=-1))          # (Hq, Wo, 3*Cin)

        # 3 MXU matmuls with K = 3*Cin (instead of 9 with K = Cin).
        acc = None
        for kh in range(k):
            hph, hoff = kh % s, kh // s
            slab = cats[hph][hoff:hoff + Ho]                      # (Ho, Wo, 3*Cin)
            part = jnp.dot(slab.reshape(M, KC), w_ref[kh],
                           preferred_element_type=jnp.float32)
            acc = part if acc is None else acc + part

        if res_mode == "proj":  # fused 1x1 projection shortcut
            acc = acc + jnp.dot(sx_ref[b], sw_ref[...],
                                preferred_element_type=jnp.float32)

        y = acc + b_ref[...]
        if res_mode == "add":
            y = y + r_ref[b].astype(jnp.float32)
        if relu:
            y = jnp.maximum(y, 0.0)
        y = y.astype(o_ref.dtype)

        if out_padded:
            # Write straight into the zero-padded layout the next 3x3 conv reads.
            Hq2, Wq2 = Ho + 2, Wo + 2
            o_ref[b] = jnp.zeros((Hq2, Wq2, tn), o_ref.dtype)
            o_ref[b, 1:1 + Ho, 1:1 + Wo, :] = y.reshape(Ho, Wo, tn)
        else:
            o_ref[b] = y


# ----------------------------------------------------------------------------
# Kernel 2: fused matmul + bias (+ residual) + ReLU (im2col fallback path)
# ----------------------------------------------------------------------------
def _matmul_kernel(*refs, relu, has_res):
    if has_res:
        x_ref, w_ref, b_ref, r_ref, o_ref = refs
    else:
        x_ref, w_ref, b_ref, o_ref = refs
    y = jnp.dot(x_ref[...], w_ref[...], preferred_element_type=jnp.float32)
    y = y + b_ref[...]
    if has_res:
        y = y + r_ref[...].astype(jnp.float32)
    if relu:
        y = jnp.maximum(y, 0.0)
    o_ref[...] = y.astype(o_ref.dtype)


def fused_matmul(x, w, bias, *, residual=None, relu=False,
                 out_dtype=jnp.float32):
    """y = relu?( x @ w + bias [+ residual] ); bf16 operands, f32 accumulation."""
    M, K = x.shape
    _, C = w.shape
    tn = _cout_tile(C)
    tm = 512 if M >= 512 else _round_up(max(M, 8), 8)
    Mp = _round_up(M, tm)

    xp = x if Mp == M else jnp.pad(x, ((0, Mp - M), (0, 0)))
    x_bf = xp.astype(jnp.bfloat16)
    w_bf = w.astype(jnp.bfloat16)
    bias_f = bias.astype(jnp.float32).reshape(1, C)
    has_res = residual is not None
    if has_res:
        resp = residual if Mp == M else jnp.pad(residual, ((0, Mp - M), (0, 0)))
        resp = resp.astype(jnp.bfloat16)

    # Grid: Cout-tiles major, row-tiles minor -> weight block stays resident.
    in_specs = [
        pl.BlockSpec((tm, K), lambda j, i: (i, 0)),
        pl.BlockSpec((K, tn), lambda j, i: (0, j)),
        pl.BlockSpec((1, tn), lambda j, i: (0, j)),
    ]
    args = [x_bf, w_bf, bias_f]
    if has_res:
        in_specs.append(pl.BlockSpec((tm, tn), lambda j, i: (i, j)))
        args.append(resp)

    bytes_acc = int(x_bf.size * 2 + w_bf.size * 2 + C * 4
                    + (resp.size * 2 if has_res else 0)
                    + Mp * C * jnp.dtype(out_dtype).itemsize)
    out = pl.pallas_call(
        functools.partial(_matmul_kernel, relu=relu, has_res=has_res),
        out_shape=jax.ShapeDtypeStruct((Mp, C), out_dtype),
        grid_spec=pltpu.PrefetchScalarGridSpec(
            num_scalar_prefetch=0,
            grid=(C // tn, Mp // tm),
            in_specs=in_specs,
            out_specs=pl.BlockSpec((tm, tn), lambda j, i: (i, j)),
        ),
        compiler_params=pltpu.CompilerParams(
            dimension_semantics=("parallel", "parallel"),
            vmem_limit_bytes=_vmem_budget()),
        cost_estimate=pl.CostEstimate(flops=2 * Mp * K * C, transcendentals=0,
                                      bytes_accessed=bytes_acc),
    )(*args)
    return out[:M] if Mp != M else out


# ----------------------------------------------------------------------------
# Host-side helpers for the direct conv path
# ----------------------------------------------------------------------------
def _make_phases(x, ksize, stride, pad):
    """Pad spatially and split into stride x stride phases -> (N, s*s, Hq, Wq, C).

    Tap (kh, kw) of the conv reads phase (kh%s)*s + (kw%s) at unit-stride offset
    (kh//s, kw//s), so the kernel never does strided slicing.
    """
    N, H, W, C = x.shape
    Ho = (H + 2 * pad - ksize) // stride + 1
    Wo = (W + 2 * pad - ksize) // stride + 1
    q = (ksize - 1) // stride
    Hq, Wq = Ho + q, Wo + q
    Ht, Wt = stride * Hq, stride * Wq
    xp = jnp.pad(x, ((0, 0),
                     (pad, max(0, Ht - H - pad)),
                     (pad, max(0, Wt - W - pad)),
                     (0, 0)))[:, :Ht, :Wt, :]
    phases = [xp[:, i::stride, j::stride, :]
              for i in range(stride) for j in range(stride)]
    return jnp.stack(phases, axis=1), Ho, Wo, Hq, Wq


def _im2col(x, k, stride, pad):
    """Fallback patch construction (only for shapes the direct path rejects)."""
    N, H, W, C = x.shape
    xp = jnp.pad(x, ((0, 0), (pad, pad), (pad, pad), (0, 0)))
    Ho = (H + 2 * pad - k) // stride + 1
    Wo = (W + 2 * pad - k) // stride + 1
    cols = [xp[:, kh:kh + stride * (Ho - 1) + 1:stride,
               kw:kw + stride * (Wo - 1) + 1:stride, :]
            for kh in range(k) for kw in range(k)]
    patches = jnp.stack(cols, axis=3)             # (N, Ho, Wo, k*k, C)
    return patches.reshape(N * Ho * Wo, k * k * C), Ho, Wo


# ----------------------------------------------------------------------------
# 3x3 conv (pad=1) + folded BN + optional residual / fused 1x1 projection
# ----------------------------------------------------------------------------
def conv3x3_bn(x, w_taps, bias, *, stride, relu=True, out_dtype=jnp.float32,
               residual=None, proj=None, x_prepadded=None, out_padded=False):
    """w_taps: (3, 3*Cin, Cout) with BN scale folded.  bias: (1, Cout) f32.

    x: (N, H, W, Cin) NHWC (ignored when x_prepadded is given).
    x_prepadded: (N, Ho+2, Wo+2, Cin), zero halo already in place (stride==1).
    residual: (N, Ho*Wo, Cout) bf16, added before ReLU.
    proj: (sx (N, Ho*Wo, Cin0) bf16, sw (Cin0, Cout) bf16) fused 1x1 shortcut
          (its BN bias must already be folded into `bias`).
    Returns (out, out_is_padded):
      False -> out shape (N, Ho*Wo, Cout)
      True  -> out shape (N, Ho+2, Wo+2, Cout) with zero halo (direct path only).
    """
    k = 3
    if x_prepadded is not None:
        assert stride == 1
        N, Hq, Wq, Cin = x_prepadded.shape
        Ho, Wo = Hq - 2, Wq - 2
        phases = x_prepadded.reshape(N, 1, Hq, Wq, Cin)
    else:
        N, H, W, Cin = x.shape
        Ho = (H + 2 - k) // stride + 1
        Wo = (W + 2 - k) // stride + 1
        q = (k - 1) // stride
        Hq, Wq = Ho + q, Wo + q
        phases = None

    M = Ho * Wo
    KC = k * Cin
    Cout = w_taps.shape[-1]
    tn = _cout_tile(Cout)
    ss = stride * stride
    Hq2, Wq2 = Ho + 2, Wo + 2
    out_bytes = jnp.dtype(out_dtype).itemsize

    res_mode = "proj" if proj is not None else ("add" if residual is not None else None)
    Cin0 = proj[0].shape[-1] if proj is not None else 0

    budget = _vmem_budget()
    avail = budget - (4 << 20)      # headroom for Mosaic internals

    def est(tb):
        blk_x = tb * ss * Hq * Wq * Cin * 2
        blk_w = k * KC * tn * 2
        blk_b = tn * 4
        blk_e = 0
        if res_mode == "add":
            blk_e = tb * M * tn * 2
        elif res_mode == "proj":
            blk_e = tb * M * Cin0 * 2 + Cin0 * tn * 2
        out_rows = (Hq2 * Wq2) if out_padded else M
        blk_o = tb * out_rows * tn * out_bytes
        # In-kernel temporaries: concatenated slabs, slab copy, f32 acc/epilogue.
        scratch = tb * (ss * Hq * Wo * KC * 2 + M * KC * 2 + 2 * M * tn * 4)
        return 2 * (blk_x + blk_w + blk_b + blk_e + blk_o) + scratch

    TB = 1
    for cand in (8, 4, 2):
        if N % cand == 0 and cand * M <= 8192 and est(cand) <= avail:
            TB = cand
            break
    use_direct = est(TB) <= avail

    if not use_direct:
        # Fallback: im2col in HBM + fused matmul (+ residual / projection).
        if x_prepadded is not None:
            x = x_prepadded[:, 1:1 + Ho, 1:1 + Wo, :]
        patches, _, _ = _im2col(x, k, stride, 1)
        res2d = None
        if res_mode == "add":
            res2d = residual.reshape(N * M, Cout)
        elif res_mode == "proj":
            sx, sw = proj
            res2d = fused_matmul(sx.reshape(N * M, Cin0), sw,
                                 jnp.zeros((1, Cout), jnp.float32), relu=False)
        out2d = fused_matmul(patches, w_taps.reshape(k * KC, Cout), bias,
                             residual=res2d, relu=relu, out_dtype=out_dtype)
        return out2d.reshape(N, M, Cout), False

    if phases is None:
        phases, Ho, Wo, Hq, Wq = _make_phases(x, k, stride, 1)
    phases = phases.astype(jnp.bfloat16)
    w_bf = w_taps.astype(jnp.bfloat16)
    bias_f = bias.astype(jnp.float32).reshape(1, Cout)

    # Grid: Cout-tiles major, batch-groups minor -> weight block loaded once per
    # Cout tile and reused across the whole batch.
    in_specs = [
        pl.BlockSpec((TB, ss, Hq, Wq, Cin), lambda j, n: (n, 0, 0, 0, 0)),
        pl.BlockSpec((k, KC, tn),           lambda j, n: (0, 0, j)),
        pl.BlockSpec((1, tn),               lambda j, n: (0, j)),
    ]
    args = [phases, w_bf, bias_f]
    if res_mode == "add":
        in_specs.append(pl.BlockSpec((TB, M, tn), lambda j, n: (n, 0, j)))
        args.append(residual.astype(jnp.bfloat16))
    elif res_mode == "proj":
        sx, sw = proj
        in_specs.append(pl.BlockSpec((TB, M, Cin0), lambda j, n: (n, 0, 0)))
        in_specs.append(pl.BlockSpec((Cin0, tn),    lambda j, n: (0, j)))
        args.extend([sx.astype(jnp.bfloat16), sw.astype(jnp.bfloat16)])

    if out_padded:
        out_shape = jax.ShapeDtypeStruct((N, Hq2, Wq2, Cout), out_dtype)
        out_spec = pl.BlockSpec((TB, Hq2, Wq2, tn), lambda j, n: (n, 0, 0, j))
    else:
        out_shape = jax.ShapeDtypeStruct((N, M, Cout), out_dtype)
        out_spec = pl.BlockSpec((TB, M, tn), lambda j, n: (n, 0, j))

    kern = functools.partial(_direct_conv_kernel, stride=stride, Ho=Ho, Wo=Wo,
                             relu=relu, res_mode=res_mode,
                             out_padded=out_padded, TB=TB)
    flops = 2 * N * M * Cout * (k * KC + (Cin0 if res_mode == "proj" else 0))
    bytes_acc = int(phases.size * 2 + w_bf.size * 2 + Cout * 4
                    + (residual.size * 2 if res_mode == "add" else 0)
                    + ((proj[0].size + proj[1].size) * 2 if res_mode == "proj" else 0)
                    + N * ((Hq2 * Wq2) if out_padded else M) * Cout * out_bytes)

    out = pl.pallas_call(
        kern,
        out_shape=out_shape,
        grid_spec=pltpu.PrefetchScalarGridSpec(
            num_scalar_prefetch=0,
            grid=(Cout // tn, N // TB),
            in_specs=in_specs,
            out_specs=out_spec,
        ),
        compiler_params=pltpu.CompilerParams(
            dimension_semantics=("parallel", "parallel"),
            vmem_limit_bytes=budget),
        cost_estimate=pl.CostEstimate(flops=flops, transcendentals=0,
                                      bytes_accessed=bytes_acc),
    )(*args)
    return out, out_padded


# ----------------------------------------------------------------------------
# BasicBlock forward (NCHW public interface, like the PyTorch module)
# ----------------------------------------------------------------------------
def _fold_bn(gamma, beta, mean, var):
    s = gamma / jnp.sqrt(var + BN_EPS)
    b = beta - mean * s
    return s.reshape(1, -1), b.reshape(1, -1)


def _fold_conv3(w_oihw, scale):
    """(Cout, Cin, 3, 3) torch weight -> (3, 3*Cin, Cout) with BN scale folded."""
    Cout, Cin = w_oihw.shape[0], w_oihw.shape[1]
    w = jnp.transpose(w_oihw, (2, 3, 1, 0)).reshape(3, 3 * Cin, Cout)
    return w * scale                              # scale: (1, Cout)


def basic_block_forward(x_nchw, params, stride):
    # TODO(synk): keep activations NHWC/bf16 between blocks when chaining; the
    # NCHW<->NHWC transposes here exist only to match the PyTorch interface.
    x = jnp.transpose(x_nchw, (0, 2, 3, 1)).astype(jnp.float32)   # NHWC
    N, H, W, Cin = x.shape
    Cout = params["w1"].shape[0]
    Ho = (H + 2 - 3) // stride + 1
    Wo = (W + 2 - 3) // stride + 1
    M = Ho * Wo

    # conv1 (3x3, stride) + BN1 + ReLU -> bf16, written directly into the
    # zero-padded layout that conv2's direct path reads (no pad copy in HBM).
    s1, b1 = _fold_bn(params["g1"], params["be1"], params["m1"], params["v1"])
    w1 = _fold_conv3(params["w1"], s1)
    y1, y1_padded = conv3x3_bn(x, w1, b1, stride=stride, relu=True,
                               out_dtype=jnp.bfloat16, out_padded=True)

    # conv2 (3x3) + BN2 + shortcut + ReLU, all inside one kernel.
    s2, b2 = _fold_bn(params["g2"], params["be2"], params["m2"], params["v2"])
    w2 = _fold_conv3(params["w2"], s2)

    residual, proj, bias2 = None, None, b2
    if stride != 1 or Cin != Cout:
        # 1x1 projection shortcut fused into conv2 (extra dot + folded BN bias).
        ss_, bs_ = _fold_bn(params["gs"], params["bes"], params["ms"], params["vs"])
        ws = jnp.transpose(params["ws"], (2, 3, 1, 0)).reshape(Cin, Cout) * ss_
        sx = x[:, ::stride, ::stride, :][:, :Ho, :Wo, :].reshape(N, M, Cin)
        proj = (sx.astype(jnp.bfloat16), ws.astype(jnp.bfloat16))
        bias2 = b2 + bs_
    else:
        residual = x.reshape(N, M, Cin).astype(jnp.bfloat16)      # bf16 stream

    if y1_padded:
        out, _ = conv3x3_bn(None, w2, bias2, stride=1, relu=True,
                            out_dtype=jnp.float32, residual=residual,
                            proj=proj, x_prepadded=y1)
    else:
        out, _ = conv3x3_bn(y1.reshape(N, Ho, Wo, Cout), w2, bias2, stride=1,
                            relu=True, out_dtype=jnp.float32,
                            residual=residual, proj=proj)

    out = out.reshape(N, Ho, Wo, Cout)
    return jnp.transpose(out, (0, 3, 1, 2))                       # NCHW


# ----------------------------------------------------------------------------
# References (lax conv, NCHW) for correctness checks
# ----------------------------------------------------------------------------
def reference_forward(x, params, stride):
    """Pure f32 reference matching the PyTorch module (eval mode)."""
    def bn(y, g, b, m, v):
        g, b, m, v = (t[None, :, None, None] for t in (g, b, m, v))
        return (y - m) / jnp.sqrt(v + BN_EPS) * g + b

    def conv(h, w, s, p):
        return jax.lax.conv_general_dilated(
            h, w, (s, s), ((p, p), (p, p)),
            dimension_numbers=("NCHW", "OIHW", "NCHW"))

    r = conv(x, params["w1"], stride, 1)
    r = jnp.maximum(bn(r, params["g1"], params["be1"], params["m1"], params["v1"]), 0.0)
    r = conv(r, params["w2"], 1, 1)
    r = bn(r, params["g2"], params["be2"], params["m2"], params["v2"])
    if "ws" in params:
        s = conv(x, params["ws"], stride, 0)
        s = bn(s, params["gs"], params["bes"], params["ms"], params["vs"])
    else:
        s = x
    return jnp.maximum(r + s, 0.0)


def reference_forward_bf16(x, params, stride):
    """Reference mirroring the kernel numerics (folded bf16 weights/activations,
    f32 accumulation, bf16 intermediate + bf16 residual stream)."""
    def fold(w, g, be, m, v):
        s = g / jnp.sqrt(v + BN_EPS)
        return (w * s[:, None, None, None]).astype(jnp.bfloat16), (be - m * s)

    def conv(h, w, s, p):
        return jax.lax.conv_general_dilated(
            h.astype(jnp.bfloat16), w, (s, s), ((p, p), (p, p)),
            dimension_numbers=("NCHW", "OIHW", "NCHW"),
            preferred_element_type=jnp.float32)

    w1, b1 = fold(params["w1"], params["g1"], params["be1"], params["m1"], params["v1"])
    w2, b2 = fold(params["w2"], params["g2"], params["be2"], params["m2"], params["v2"])
    r = jnp.maximum(conv(x, w1, stride, 1) + b1[None, :, None, None], 0.0)
    r = r.astype(jnp.bfloat16)                    # mirror bf16 intermediate
    r = conv(r, w2, 1, 1) + b2[None, :, None, None]
    if "ws" in params:
        ws, bs = fold(params["ws"], params["gs"], params["bes"], params["ms"], params["vs"])
        sc = conv(x, ws, stride, 0) + bs[None, :, None, None]
    else:
        sc = x.astype(jnp.bfloat16).astype(jnp.float32)   # mirror bf16 residual
    return jnp.maximum(r + sc, 0.0)


# ----------------------------------------------------------------------------
# Deterministic parameter init (shapes from BasicBlock.__init__)
# ----------------------------------------------------------------------------
def make_params(key, in_channels, out_channels, stride):
    ks = jax.random.split(key, 16)
    f32 = jnp.float32

    def bn_params(k, c):
        k1, k2, k3, k4 = jax.random.split(k, 4)
        gamma = 1.0 + 0.1 * jax.random.normal(k1, (c,), f32)
        beta = 0.1 * jax.random.normal(k2, (c,), f32)
        mean = 0.1 * jax.random.normal(k3, (c,), f32)
        var = jax.random.uniform(k4, (c,), f32, 0.5, 1.5)
        return gamma, beta, mean, var

    p = {}
    p["w1"] = 0.1 * jax.random.normal(ks[0], (out_channels, in_channels, 3, 3), f32)
    p["g1"], p["be1"], p["m1"], p["v1"] = bn_params(ks[1], out_channels)
    p["w2"] = 0.1 * jax.random.normal(ks[2], (out_channels, out_channels, 3, 3), f32)
    p["g2"], p["be2"], p["m2"], p["v2"] = bn_params(ks[3], out_channels)
    if stride != 1 or in_channels != out_channels:
        p["ws"] = 0.1 * jax.random.normal(ks[4], (out_channels, in_channels, 1, 1), f32)
        p["gs"], p["bes"], p["ms"], p["vs"] = bn_params(ks[5], out_channels)
    return p


if __name__ == "__main__":
    key = jax.random.PRNGKey(0)
    kx, kp, kx2, kp2 = jax.random.split(key, 4)
    fwd = jax.jit(basic_block_forward, static_argnames="stride")

    # Config 1: projection shortcut (stride 2, channel expansion).
    N, Cin, H, W = 2, 4, 16, 16
    Cout, stride = 8, 2
    x = jax.random.normal(kx, (N, Cin, H, W), jnp.float32)
    params = make_params(kp, Cin, Cout, stride)

    out = jax.block_until_ready(fwd(x, params, stride=stride))
    ref_bf = jax.block_until_ready(reference_forward_bf16(x, params, stride))
    ref_f32 = jax.block_until_ready(reference_forward(x, params, stride))
    assert out.shape == ref_f32.shape, (out.shape, ref_f32.shape)
    err_bf = float(jnp.max(jnp.abs(out - ref_bf)))
    assert err_bf < 1e-2, err_bf
    err_f32 = float(jnp.max(jnp.abs(out - ref_f32)))
    assert err_f32 < 0.5, err_f32     # bf16-operand vs pure-f32 gross sanity bound
    print(f"max |kernel - f32_reference| = {err_f32:.4e}")

    # Config 2: identity shortcut (stride 1, same channels).
    N2, C2, H2, W2 = 2, 8, 8, 8
    x2 = jax.random.normal(kx2, (N2, C2, H2, W2), jnp.float32)
    params2 = make_params(kp2, C2, C2, 1)
    out2 = jax.block_until_ready(fwd(x2, params2, stride=1))
    ref2 = jax.block_until_ready(reference_forward_bf16(x2, params2, 1))
    err2 = float(jnp.max(jnp.abs(out2 - ref2)))
    assert err2 < 1e-2, err2

    print("KERNEL_OK")
</pallas_src>

<mosaic_0001>
module attributes {stable_mosaic.version = 11 : i64} {
  func.func @_direct_conv_kernel(%arg0: i32, %arg1: i32, %arg2: memref<2x1x10x10x8xbf16, #tpu.memory_space<vmem>>, %arg3: memref<3x24x8xbf16, #tpu.memory_space<vmem>>, %arg4: memref<1x8xf32, #tpu.memory_space<vmem>>, %arg5: memref<2x64x4xbf16, #tpu.memory_space<vmem>>, %arg6: memref<4x8xbf16, #tpu.memory_space<vmem>>, %arg7: memref<2x64x8xf32, #tpu.memory_space<vmem>>) attributes {dimension_semantics = [#tpu.dimension_semantics<parallel>, #tpu.dimension_semantics<parallel>], iteration_bounds = array<i64: 1, 1>, scalar_prefetch = 0 : i64, scratch_operands = 0 : i64, tpu.core_type = #tpu.core_type<tc>, window_params = [{transform_indices = @transform_0, window_bounds = array<i64: 2, 1, 10, 10, 8>}, {transform_indices = @transform_1, window_bounds = array<i64: 3, 24, 8>}, {transform_indices = @transform_2, window_bounds = array<i64: 1, 8>}, {transform_indices = @transform_3, window_bounds = array<i64: 2, 64, 4>}, {transform_indices = @transform_4, window_bounds = array<i64: 4, 8>}, {transform_indices = @transform_5, window_bounds = array<i64: 2, 64, 8>}]} {
    %c0 = arith.constant 0 : index
    %c0_0 = arith.constant 0 : index
    %c0_1 = arith.constant 0 : index
    %c0_2 = arith.constant 0 : index
    %c0_3 = arith.constant 0 : index
    %0 = vector.load %arg2[%c0, %c0_0, %c0_1, %c0_2, %c0_3] : memref<2x1x10x10x8xbf16, #tpu.memory_space<vmem>>, vector<1x1x10x8x8xbf16>
    %1 = vector.shape_cast %0 : vector<1x1x10x8x8xbf16> to vector<10x8x8xbf16>
    %c0_4 = arith.constant 0 : index
    %c0_5 = arith.constant 0 : index
    %c0_6 = arith.constant 0 : index
    %c1 = arith.constant 1 : index
    %c0_7 = arith.constant 0 : index
    %2 = vector.load %arg2[%c0_4, %c0_5, %c0_6, %c1, %c0_7] : memref<2x1x10x10x8xbf16, #tpu.memory_space<vmem>>, vector<1x1x10x8x8xbf16>
    %3 = vector.shape_cast %2 : vector<1x1x10x8x8xbf16> to vector<10x8x8xbf16>
    %c0_8 = arith.constant 0 : index
    %c0_9 = arith.constant 0 : index
    %c0_10 = arith.constant 0 : index
    %c2 = arith.constant 2 : index
    %c0_11 = arith.constant 0 : index
    %4 = vector.load %arg2[%c0_8, %c0_9, %c0_10, %c2, %c0_11] : memref<2x1x10x10x8xbf16, #tpu.memory_space<vmem>>, vector<1x1x10x8x8xbf16>
    %5 = vector.shape_cast %4 : vector<1x1x10x8x8xbf16> to vector<10x8x8xbf16>
    %6 = tpu.concatenate %1, %3, %5 in 2 : vector<10x8x8xbf16>, vector<10x8x8xbf16>, vector<10x8x8xbf16> -> vector<10x8x24xbf16>
    %7 = vector.extract_strided_slice %6 {offsets = [0, 0, 0], sizes = [8, 8, 24], strides = [1, 1, 1]} : vector<10x8x24xbf16> to vector<8x8x24xbf16>
    %8 = vector.shape_cast %7 : vector<8x8x24xbf16> to vector<64x24xbf16>
    %c0_12 = arith.constant 0 : index
    %c0_13 = arith.constant 0 : index
    %c0_14 = arith.constant 0 : index
    %9 = vector.load %arg3[%c0_12, %c0_13, %c0_14] : memref<3x24x8xbf16, #tpu.memory_space<vmem>>, vector<1x24x8xbf16>
    %10 = vector.shape_cast %9 : vector<1x24x8xbf16> to vector<24x8xbf16>
    %cst = arith.constant dense<0.000000e+00> : vector<64x8xf32>
    %11 = tpu.matmul %8, %10, %cst {dimension_numbers = #tpu.dot_dimension_numbers<[1], [0], [0], [1], [0, 0, 1, 1], [], []>} : vector<64x24xbf16>, vector<24x8xbf16>, vector<64x8xf32> -> vector<64x8xf32>
    %12 = vector.extract_strided_slice %6 {offsets = [1, 0, 0], sizes = [8, 8, 24], strides = [1, 1, 1]} : vector<10x8x24xbf16> to vector<8x8x24xbf16>
    %13 = vector.shape_cast %12 : vector<8x8x24xbf16> to vector<64x24xbf16>
    %c1_15 = arith.constant 1 : index
    %c0_16 = arith.constant 0 : index
    %c0_17 = arith.constant 0 : index
    %14 = vector.load %arg3[%c1_15, %c0_16, %c0_17] : memref<3x24x8xbf16, #tpu.memory_space<vmem>>, vector<1x24x8xbf16>
    %15 = vector.shape_cast %14 : vector<1x24x8xbf16> to vector<24x8xbf16>
    %cst_18 = arith.constant dense<0.000000e+00> : vector<64x8xf32>
    %16 = tpu.matmul %13, %15, %cst_18 {dimension_numbers = #tpu.dot_dimension_numbers<[1], [0], [0], [1], [0, 0, 1, 1], [], []>} : vector<64x24xbf16>, vector<24x8xbf16>, vector<64x8xf32> -> vector<64x8xf32>
    %17 = arith.addf %11, %16 : vector<64x8xf32>
    %18 = vector.extract_strided_slice %6 {offsets = [2, 0, 0], sizes = [8, 8, 24], strides = [1, 1, 1]} : vector<10x8x24xbf16> to vector<8x8x24xbf16>
    %19 = vector.shape_cast %18 : vector<8x8x24xbf16> to vector<64x24xbf16>
    %c2_19 = arith.constant 2 : index
    %c0_20 = arith.constant 0 : index
    %c0_21 = arith.constant 0 : index
    %20 = vector.load %arg3[%c2_19, %c0_20, %c0_21] : memref<3x24x8xbf16, #tpu.memory_space<vmem>>, vector<1x24x8xbf16>
    %21 = vector.shape_cast %20 : vector<1x24x8xbf16> to vector<24x8xbf16>
    %cst_22 = arith.constant dense<0.000000e+00> : vector<64x8xf32>
    %22 = tpu.matmul %19, %21, %cst_22 {dimension_numbers = #tpu.dot_dimension_numbers<[1], [0], [0], [1], [0, 0, 1, 1], [], []>} : vector<64x24xbf16>, vector<24x8xbf16>, vector<64x8xf32> -> vector<64x8xf32>
    %23 = arith.addf %17, %22 : vector<64x8xf32>
    %c0_23 = arith.constant 0 : index
    %c0_24 = arith.constant 0 : index
    %c0_25 = arith.constant 0 : index
    %24 = vector.load %arg5[%c0_23, %c0_24, %c0_25] : memref<2x64x4xbf16, #tpu.memory_space<vmem>>, vector<1x64x4xbf16>
    %25 = vector.shape_cast %24 : vector<1x64x4xbf16> to vector<64x4xbf16>
    %c0_26 = arith.constant 0 : index
    %c0_27 = arith.constant 0 : index
    %26 = vector.load %arg6[%c0_26, %c0_27] : memref<4x8xbf16, #tpu.memory_space<vmem>>, vector<4x8xbf16>
    %cst_28 = arith.constant dense<0.000000e+00> : vector<64x8xf32>
    %27 = tpu.matmul %25, %26, %cst_28 {dimension_numbers = #tpu.dot_dimension_numbers<[1], [0], [0], [1], [0, 0, 1, 1], [], []>} : vector<64x4xbf16>, vector<4x8xbf16>, vector<64x8xf32> -> vector<64x8xf32>
    %28 = arith.addf %23, %27 : vector<64x8xf32>
    %c0_29 = arith.constant 0 : index
    %c0_30 = arith.constant 0 : index
    %29 = vector.load %arg4[%c0_29, %c0_30] : memref<1x8xf32, #tpu.memory_space<vmem>>, vector<1x8xf32>
    %30 = vector.broadcast %29 : vector<1x8xf32> to vector<64x8xf32>
    %31 = arith.addf %28, %30 : vector<64x8xf32>
    %cst_31 = arith.constant 0.000000e+00 : f32
    %32 = vector.broadcast %cst_31 : f32 to vector<64x8xf32>
    %33 = arith.maximumf %31, %32 : vector<64x8xf32>
    %c0_32 = arith.constant 0 : index
    %c0_33 = arith.constant 0 : index
    %c0_34 = arith.constant 0 : index
    %34 = vector.load %arg7[%c0_32, %c0_33, %c0_34] : memref<2x64x8xf32, #tpu.memory_space<vmem>>, vector<1x64x8xf32>
    %35 = vector.shape_cast %34 : vector<1x64x8xf32> to vector<64x8xf32>
    %36 = vector.shape_cast %33 : vector<64x8xf32> to vector<1x64x8xf32>
    tpu.vector_store %arg7[%c0_32, %c0_33, %c0_34], %36 {strides = array<i32>} : memref<2x64x8xf32, #tpu.memory_space<vmem>>, vector<1x64x8xf32>,
    %c1_35 = arith.constant 1 : index
    %c0_36 = arith.constant 0 : index
    %c0_37 = arith.constant 0 : index
    %c0_38 = arith.constant 0 : index
    %c0_39 = arith.constant 0 : index
    %37 = vector.load %arg2[%c1_35, %c0_36, %c0_37, %c0_38, %c0_39] : memref<2x1x10x10x8xbf16, #tpu.memory_space<vmem>>, vector<1x1x10x8x8xbf16>
    %38 = vector.shape_cast %37 : vector<1x1x10x8x8xbf16> to vector<10x8x8xbf16>
    %c1_40 = arith.constant 1 : index
    %c0_41 = arith.constant 0 : index
    %c0_42 = arith.constant 0 : index
    %c1_43 = arith.constant 1 : index
    %c0_44 = arith.constant 0 : index
    %39 = vector.load %arg2[%c1_40, %c0_41, %c0_42, %c1_43, %c0_44] : memref<2x1x10x10x8xbf16, #tpu.memory_space<vmem>>, vector<1x1x10x8x8xbf16>
    %40 = vector.shape_cast %39 : vector<1x1x10x8x8xbf16> to vector<10x8x8xbf16>
    %c1_45 = arith.constant 1 : index
    %c0_46 = arith.constant 0 : index
    %c0_47 = arith.constant 0 : index
    %c2_48 = arith.constant 2 : index
    %c0_49 = arith.constant 0 : index
    %41 = vector.load %arg2[%c1_45, %c0_46, %c0_47, %c2_48, %c0_49] : memref<2x1x10x10x8xbf16, #tpu.memory_space<vmem>>, vector<1x1x10x8x8xbf16>
    %42 = vector.shape_cast %41 : vector<1x1x10x8x8xbf16> to vector<10x8x8xbf16>
    %43 = tpu.concatenate %38, %40, %42 in 2 : vector<10x8x8xbf16>, vector<10x8x8xbf16>, vector<10x8x8xbf16> -> vector<10x8x24xbf16>
    %44 = vector.extract_strided_slice %43 {offsets = [0, 0, 0], sizes = [8, 8, 24], strides = [1, 1, 1]} : vector<10x8x24xbf16> to vector<8x8x24xbf16>
    %45 = vector.shape_cast %44 : vector<8x8x24xbf16> to vector<64x24xbf16>
    %c0_50 = arith.constant 0 : index
    %c0_51 = arith.constant 0 : index
    %c0_52 = arith.constant 0 : index
    %46 = vector.load %arg3[%c0_50, %c0_51, %c0_52] : memref<3x24x8xbf16, #tpu.memory_space<vmem>>, vector<1x24x8xbf16>
    %47 = vector.shape_cast %46 : vector<1x24x8xbf16> to vector<24x8xbf16>
    %cst_53 = arith.constant dense<0.000000e+00> : vector<64x8xf32>
    %48 = tpu.matmul %45, %47, %cst_53 {dimension_numbers = #tpu.dot_dimension_numbers<[1], [0], [0], [1], [0, 0, 1, 1], [], []>} : vector<64x24xbf16>, vector<24x8xbf16>, vector<64x8xf32> -> vector<64x8xf32>
    %49 = vector.extract_strided_slice %43 {offsets = [1, 0, 0], sizes = [8, 8, 24], strides = [1, 1, 1]} : vector<10x8x24xbf16> to vector<8x8x24xbf16>
    %50 = vector.shape_cast %49 : vector<8x8x24xbf16> to vector<64x24xbf16>
    %c1_54 = arith.constant 1 : index
    %c0_55 = arith.constant 0 : index
    %c0_56 = arith.constant 0 : index
    %51 = vector.load %arg3[%c1_54, %c0_55, %c0_56] : memref<3x24x8xbf16, #tpu.memory_space<vmem>>, vector<1x24x8xbf16>
    %52 = vector.shape_cast %51 : vector<1x24x8xbf16> to vector<24x8xbf16>
    %cst_57 = arith.constant dense<0.000000e+00> : vector<64x8xf32>
    %53 = tpu.matmul %50, %52, %cst_57 {dimension_numbers = #tpu.dot_dimension_numbers<[1], [0], [0], [1], [0, 0, 1, 1], [], []>} : vector<64x24xbf16>, vector<24x8xbf16>, vector<64x8xf32> -> vector<64x8xf32>
    %54 = arith.addf %48, %53 : vector<64x8xf32>
    %55 = vector.extract_strided_slice %43 {offsets = [2, 0, 0], sizes = [8, 8, 24], strides = [1, 1, 1]} : vector<10x8x24xbf16> to vector<8x8x24xbf16>
    %56 = vector.shape_cast %55 : vector<8x8x24xbf16> to vector<64x24xbf16>
    %c2_58 = arith.constant 2 : index
    %c0_59 = arith.constant 0 : index
    %c0_60 = arith.constant 0 : index
    %57 = vector.load %arg3[%c2_58, %c0_59, %c0_60] : memref<3x24x8xbf16, #tpu.memory_space<vmem>>, vector<1x24x8xbf16>
    %58 = vector.shape_cast %57 : vector<1x24x8xbf16> to vector<24x8xbf16>
    %cst_61 = arith.constant dense<0.000000e+00> : vector<64x8xf32>
    %59 = tpu.matmul %56, %58, %cst_61 {dimension_numbers = #tpu.dot_dimension_numbers<[1], [0], [0], [1], [0, 0, 1, 1], [], []>} : vector<64x24xbf16>, vector<24x8xbf16>, vector<64x8xf32> -> vector<64x8xf32>
    %60 = arith.addf %54, %59 : vector<64x8xf32>
    %c1_62 = arith.constant 1 : index
    %c0_63 = arith.constant 0 : index
    %c0_64 = arith.constant 0 : index
    %61 = vector.load %arg5[%c1_62, %c0_63, %c0_64] : memref<2x64x4xbf16, #tpu.memory_space<vmem>>, vector<1x64x4xbf16>
    %62 = vector.shape_cast %61 : vector<1x64x4xbf16> to vector<64x4xbf16>
    %c0_65 = arith.constant 0 : index
    %c0_66 = arith.constant 0 : index
    %63 = vector.load %arg6[%c0_65, %c0_66] : memref<4x8xbf16, #tpu.memory_space<vmem>>, vector<4x8xbf16>
    %cst_67 = arith.constant dense<0.000000e+00> : vector<64x8xf32>
    %64 = tpu.matmul %62, %63, %cst_67 {dimension_numbers = #tpu.dot_dimension_numbers<[1], [0], [0], [1], [0, 0, 1, 1], [], []>} : vector<64x4xbf16>, vector<4x8xbf16>, vector<64x8xf32> -> vector<64x8xf32>
    %65 = arith.addf %60, %64 : vector<64x8xf32>
    %c0_68 = arith.constant 0 : index
    %c0_69 = arith.constant 0 : index
    %66 = vector.load %arg4[%c0_68, %c0_69] : memref<1x8xf32, #tpu.memory_space<vmem>>, vector<1x8xf32>
    %67 = vector.broadcast %66 : vector<1x8xf32> to vector<64x8xf32>
    %68 = arith.addf %65, %67 : vector<64x8xf32>
    %cst_70 = arith.constant 0.000000e+00 : f32
    %69 = vector.broadcast %cst_70 : f32 to vector<64x8xf32>
    %70 = arith.maximumf %68, %69 : vector<64x8xf32>
    %c1_71 = arith.constant 1 : index
    %c0_72 = arith.constant 0 : index
    %c0_73 = arith.constant 0 : index
    %71 = vector.load %arg7[%c1_71, %c0_72, %c0_73] : memref<2x64x8xf32, #tpu.memory_space<vmem>>, vector<1x64x8xf32>
    %72 = vector.shape_cast %71 : vector<1x64x8xf32> to vector<64x8xf32>
    %73 = vector.shape_cast %70 : vector<64x8xf32> to vector<1x64x8xf32>
    tpu.vector_store %arg7[%c1_71, %c0_72, %c0_73], %73 {strides = array<i32>} : memref<2x64x8xf32, #tpu.memory_space<vmem>>, vector<1x64x8xf32>,
    return
  }
  func.func @transform_0(%arg0: i32, %arg1: i32) -> (i32, i32, i32, i32, i32) {
    %c0_i32 = arith.constant 0 : i32
    %c0_i32_0 = arith.constant 0 : i32
    %c0_i32_1 = arith.constant 0 : i32
    %c0_i32_2 = arith.constant 0 : i32
    %c0_i32_3 = arith.constant 0 : i32
    return %arg1, %c0_i32, %c0_i32_0, %c0_i32_1, %c0_i32_2 : i32, i32, i32, i32, i32
  }
  func.func @transform_1(%arg0: i32, %arg1: i32) -> (i32, i32, i32) {
    %c0_i32 = arith.constant 0 : i32
    %c0_i32_0 = arith.constant 0 : i32
    %c0_i32_1 = arith.constant 0 : i32
    return %c0_i32, %c0_i32_0, %arg0 : i32, i32, i32
  }
  func.func @transform_2(%arg0: i32, %arg1: i32) -> (i32, i32) {
    %c0_i32 = arith.constant 0 : i32
    %c0_i32_0 = arith.constant 0 : i32
    return %c0_i32, %arg0 : i32, i32
  }
  func.func @transform_3(%arg0: i32, %arg1: i32) -> (i32, i32, i32) {
    %c0_i32 = arith.constant 0 : i32
    %c0_i32_0 = arith.constant 0 : i32
    %c0_i32_1 = arith.constant 0 : i32
    return %arg1, %c0_i32, %c0_i32_0 : i32, i32, i32
  }
  func.func @transform_4(%arg0: i32, %arg1: i32) -> (i32, i32) {
    %c0_i32 = arith.constant 0 : i32
    %c0_i32_0 = arith.constant 0 : i32
    return %c0_i32, %arg0 : i32, i32
  }
  func.func @transform_5(%arg0: i32, %arg1: i32) -> (i32, i32, i32) {
    %c0_i32 = arith.constant 0 : i32
    %c0_i32_0 = arith.constant 0 : i32
    return %arg1, %c0_i32, %arg0 : i32, i32, i32
  }
}

module attributes {stable_mosaic.version = 11 : i64} {
  func.func @_direct_conv_kernel(%arg0: i32, %arg1: i32, %arg2: memref<2x4x9x9x4xbf16, #tpu.memory_space<vmem>>, %arg3: memref<3x12x8xbf16, #tpu.memory_space<vmem>>, %arg4: memref<1x8xf32, #tpu.memory_space<vmem>>, %arg5: memref<2x10x10x8xbf16, #tpu.memory_space<vmem>>) attributes {dimension_semantics = [#tpu.dimension_semantics<parallel>, #tpu.dimension_semantics<parallel>], iteration_bounds = array<i64: 1, 1>, scalar_prefetch = 0 : i64, scratch_operands = 0 : i64, tpu.core_type = #tpu.core_type<tc>, window_params = [{transform_indices = @transform_0, window_bounds = array<i64: 2, 4, 9, 9, 4>}, {transform_indices = @transform_1, window_bounds = array<i64: 3, 12, 8>}, {transform_indices = @transform_2, window_bounds = array<i64: 1, 8>}, {transform_indices = @transform_3, window_bounds = array<i64: 2, 10, 10, 8>}]} {
    %c0 = arith.constant 0 : index
    %c0_0 = arith.constant 0 : index
    %c0_1 = arith.constant 0 : index
    %c0_2 = arith.constant 0 : index
    %c0_3 = arith.constant 0 : index
    %0 = vector.load %arg2[%c0, %c0_0, %c0_1, %c0_2, %c0_3] : memref<2x4x9x9x4xbf16, #tpu.memory_space<vmem>>, vector<1x1x9x8x4xbf16>
    %1 = vector.shape_cast %0 : vector<1x1x9x8x4xbf16> to vector<9x8x4xbf16>
    %c0_4 = arith.constant 0 : index
    %c1 = arith.constant 1 : index
    %c0_5 = arith.constant 0 : index
    %c0_6 = arith.constant 0 : index
    %c0_7 = arith.constant 0 : index
    %2 = vector.load %arg2[%c0_4, %c1, %c0_5, %c0_6, %c0_7] : memref<2x4x9x9x4xbf16, #tpu.memory_space<vmem>>, vector<1x1x9x8x4xbf16>
    %3 = vector.shape_cast %2 : vector<1x1x9x8x4xbf16> to vector<9x8x4xbf16>
    %c0_8 = arith.constant 0 : index
    %c0_9 = arith.constant 0 : index
    %c0_10 = arith.constant 0 : index
    %c1_11 = arith.constant 1 : index
    %c0_12 = arith.constant 0 : index
    %4 = vector.load %arg2[%c0_8, %c0_9, %c0_10, %c1_11, %c0_12] : memref<2x4x9x9x4xbf16, #tpu.memory_space<vmem>>, vector<1x1x9x8x4xbf16>
    %5 = vector.shape_cast %4 : vector<1x1x9x8x4xbf16> to vector<9x8x4xbf16>
    %6 = tpu.concatenate %1, %3, %5 in 2 : vector<9x8x4xbf16>, vector<9x8x4xbf16>, vector<9x8x4xbf16> -> vector<9x8x12xbf16>
    %c0_13 = arith.constant 0 : index
    %c2 = arith.constant 2 : index
    %c0_14 = arith.constant 0 : index
    %c0_15 = arith.constant 0 : index
    %c0_16 = arith.constant 0 : index
    %7 = vector.load %arg2[%c0_13, %c2, %c0_14, %c0_15, %c0_16] : memref<2x4x9x9x4xbf16, #tpu.memory_space<vmem>>, vector<1x1x9x8x4xbf16>
    %8 = vector.shape_cast %7 : vector<1x1x9x8x4xbf16> to vector<9x8x4xbf16>
    %c0_17 = arith.constant 0 : index
    %c3 = arith.constant 3 : index
    %c0_18 = arith.constant 0 : index
    %c0_19 = arith.constant 0 : index
    %c0_20 = arith.constant 0 : index
    %9 = vector.load %arg2[%c0_17, %c3, %c0_18, %c0_19, %c0_20] : memref<2x4x9x9x4xbf16, #tpu.memory_space<vmem>>, vector<1x1x9x8x4xbf16>
    %10 = vector.shape_cast %9 : vector<1x1x9x8x4xbf16> to vector<9x8x4xbf16>
    %c0_21 = arith.constant 0 : index
    %c2_22 = arith.constant 2 : index
    %c0_23 = arith.constant 0 : index
    %c1_24 = arith.constant 1 : index
    %c0_25 = arith.constant 0 : index
    %11 = vector.load %arg2[%c0_21, %c2_22, %c0_23, %c1_24, %c0_25] : memref<2x4x9x9x4xbf16, #tpu.memory_space<vmem>>, vector<1x1x9x8x4xbf16>
    %12 = vector.shape_cast %11 : vector<1x1x9x8x4xbf16> to vector<9x8x4xbf16>
    %13 = tpu.concatenate %8, %10, %12 in 2 : vector<9x8x4xbf16>, vector<9x8x4xbf16>, vector<9x8x4xbf16> -> vector<9x8x12xbf16>
    %14 = vector.extract_strided_slice %6 {offsets = [0, 0, 0], sizes = [8, 8, 12], strides = [1, 1, 1]} : vector<9x8x12xbf16> to vector<8x8x12xbf16>
    %15 = vector.shape_cast %14 : vector<8x8x12xbf16> to vector<64x12xbf16>
    %c0_26 = arith.constant 0 : index
    %c0_27 = arith.constant 0 : index
    %c0_28 = arith.constant 0 : index
    %16 = vector.load %arg3[%c0_26, %c0_27, %c0_28] : memref<3x12x8xbf16, #tpu.memory_space<vmem>>, vector<1x12x8xbf16>
    %17 = vector.shape_cast %16 : vector<1x12x8xbf16> to vector<12x8xbf16>
    %cst = arith.constant dense<0.000000e+00> : vector<64x8xf32>
    %18 = tpu.matmul %15, %17, %cst {dimension_numbers = #tpu.dot_dimension_numbers<[1], [0], [0], [1], [0, 0, 1, 1], [], []>} : vector<64x12xbf16>, vector<12x8xbf16>, vector<64x8xf32> -> vector<64x8xf32>
    %19 = vector.extract_strided_slice %13 {offsets = [0, 0, 0], sizes = [8, 8, 12], strides = [1, 1, 1]} : vector<9x8x12xbf16> to vector<8x8x12xbf16>
    %20 = vector.shape_cast %19 : vector<8x8x12xbf16> to vector<64x12xbf16>
    %c1_29 = arith.constant 1 : index
    %c0_30 = arith.constant 0 : index
    %c0_31 = arith.constant 0 : index
    %21 = vector.load %arg3[%c1_29, %c0_30, %c0_31] : memref<3x12x8xbf16, #tpu.memory_space<vmem>>, vector<1x12x8xbf16>
    %22 = vector.shape_cast %21 : vector<1x12x8xbf16> to vector<12x8xbf16>
    %cst_32 = arith.constant dense<0.000000e+00> : vector<64x8xf32>
    %23 = tpu.matmul %20, %22, %cst_32 {dimension_numbers = #tpu.dot_dimension_numbers<[1], [0], [0], [1], [0, 0, 1, 1], [], []>} : vector<64x12xbf16>, vector<12x8xbf16>, vector<64x8xf32> -> vector<64x8xf32>
    %24 = arith.addf %18, %23 : vector<64x8xf32>
    %25 = vector.extract_strided_slice %6 {offsets = [1, 0, 0], sizes = [8, 8, 12], strides = [1, 1, 1]} : vector<9x8x12xbf16> to vector<8x8x12xbf16>
    %26 = vector.shape_cast %25 : vector<8x8x12xbf16> to vector<64x12xbf16>
    %c2_33 = arith.constant 2 : index
    %c0_34 = arith.constant 0 : index
    %c0_35 = arith.constant 0 : index
    %27 = vector.load %arg3[%c2_33, %c0_34, %c0_35] : memref<3x12x8xbf16, #tpu.memory_space<vmem>>, vector<1x12x8xbf16>
    %28 = vector.shape_cast %27 : vector<1x12x8xbf16> to vector<12x8xbf16>
    %cst_36 = arith.constant dense<0.000000e+00> : vector<64x8xf32>
    %29 = tpu.matmul %26, %28, %cst_36 {dimension_numbers = #tpu.dot_dimension_numbers<[1], [0], [0], [1], [0, 0, 1, 1], [], []>} : vector<64x12xbf16>, vector<12x8xbf16>, vector<64x8xf32> -> vector<64x8xf32>
    %30 = arith.addf %24, %29 : vector<64x8xf32>
    %c0_37 = arith.constant 0 : index
    %c0_38 = arith.constant 0 : index
    %31 = vector.load %arg4[%c0_37, %c0_38] : memref<1x8xf32, #tpu.memory_space<vmem>>, vector<1x8xf32>
    %32 = vector.broadcast %31 : vector<1x8xf32> to vector<64x8xf32>
    %33 = arith.addf %30, %32 : vector<64x8xf32>
    %cst_39 = arith.constant 0.000000e+00 : f32
    %34 = vector.broadcast %cst_39 : f32 to vector<64x8xf32>
    %35 = arith.maximumf %33, %34 : vector<64x8xf32>
    %36 = arith.truncf %35 : vector<64x8xf32> to vector<64x8xbf16>
    %cst_40 = arith.constant 0.000000e+00 : bf16
    %37 = vector.broadcast %cst_40 : bf16 to vector<10x10x8xbf16>
    %c0_41 = arith.constant 0 : index
    %c0_42 = arith.constant 0 : index
    %c0_43 = arith.constant 0 : index
    %c0_44 = arith.constant 0 : index
    %38 = vector.load %arg5[%c0_41, %c0_42, %c0_43, %c0_44] : memref<2x10x10x8xbf16, #tpu.memory_space<vmem>>, vector<1x10x10x8xbf16>
    %39 = vector.shape_cast %38 : vector<1x10x10x8xbf16> to vector<10x10x8xbf16>
    %40 = vector.shape_cast %37 : vector<10x10x8xbf16> to vector<1x10x10x8xbf16>
    tpu.vector_store %arg5[%c0_41, %c0_42, %c0_43, %c0_44], %40 {strides = array<i32>} : memref<2x10x10x8xbf16, #tpu.memory_space<vmem>>, vector<1x10x10x8xbf16>,
    %41 = vector.shape_cast %36 : vector<64x8xbf16> to vector<8x8x8xbf16>
    %c0_45 = arith.constant 0 : index
    %c1_46 = arith.constant 1 : index
    %c1_47 = arith.constant 1 : index
    %c0_48 = arith.constant 0 : index
    %42 = vector.load %arg5[%c0_45, %c1_46, %c1_47, %c0_48] : memref<2x10x10x8xbf16, #tpu.memory_space<vmem>>, vector<1x8x8x8xbf16>
    %43 = vector.shape_cast %42 : vector<1x8x8x8xbf16> to vector<8x8x8xbf16>
    %44 = vector.shape_cast %41 : vector<8x8x8xbf16> to vector<1x8x8x8xbf16>
    tpu.vector_store %arg5[%c0_45, %c1_46, %c1_47, %c0_48], %44 {strides = array<i32>} : memref<2x10x10x8xbf16, #tpu.memory_space<vmem>>, vector<1x8x8x8xbf16>,
    %c1_49 = arith.constant 1 : index
    %c0_50 = arith.constant 0 : index
    %c0_51 = arith.constant 0 : index
    %c0_52 = arith.constant 0 : index
    %c0_53 = arith.constant 0 : index
    %45 = vector.load %arg2[%c1_49, %c0_50, %c0_51, %c0_52, %c0_53] : memref<2x4x9x9x4xbf16, #tpu.memory_space<vmem>>, vector<1x1x9x8x4xbf16>
    %46 = vector.shape_cast %45 : vector<1x1x9x8x4xbf16> to vector<9x8x4xbf16>
    %c1_54 = arith.constant 1 : index
    %c1_55 = arith.constant 1 : index
    %c0_56 = arith.constant 0 : index
    %c0_57 = arith.constant 0 : index
    %c0_58 = arith.constant 0 : index
    %47 = vector.load %arg2[%c1_54, %c1_55, %c0_56, %c0_57, %c0_58] : memref<2x4x9x9x4xbf16, #tpu.memory_space<vmem>>, vector<1x1x9x8x4xbf16>
    %48 = vector.shape_cast %47 : vector<1x1x9x8x4xbf16> to vector<9x8x4xbf16>
    %c1_59 = arith.constant 1 : index
    %c0_60 = arith.constant 0 : index
    %c0_61 = arith.constant 0 : index
    %c1_62 = arith.constant 1 : index
    %c0_63 = arith.constant 0 : index
    %49 = vector.load %arg2[%c1_59, %c0_60, %c0_61, %c1_62, %c0_63] : memref<2x4x9x9x4xbf16, #tpu.memory_space<vmem>>, vector<1x1x9x8x4xbf16>
    %50 = vector.shape_cast %49 : vector<1x1x9x8x4xbf16> to vector<9x8x4xbf16>
    %51 = tpu.concatenate %46, %48, %50 in 2 : vector<9x8x4xbf16>, vector<9x8x4xbf16>, vector<9x8x4xbf16> -> vector<9x8x12xbf16>
    %c1_64 = arith.constant 1 : index
    %c2_65 = arith.constant 2 : index
    %c0_66 = arith.constant 0 : index
    %c0_67 = arith.constant 0 : index
    %c0_68 = arith.constant 0 : index
    %52 = vector.load %arg2[%c1_64, %c2_65, %c0_66, %c0_67, %c0_68] : memref<2x4x9x9x4xbf16, #tpu.memory_space<vmem>>, vector<1x1x9x8x4xbf16>
    %53 = vector.shape_cast %52 : vector<1x1x9x8x4xbf16> to vector<9x8x4xbf16>
    %c1_69 = arith.constant 1 : index
    %c3_70 = arith.constant 3 : index
    %c0_71 = arith.constant 0 : index
    %c0_72 = arith.constant 0 : index
    %c0_73 = arith.constant 0 : index
    %54 = vector.load %arg2[%c1_69, %c3_70, %c0_71, %c0_72, %c0_73] : memref<2x4x9x9x4xbf16, #tpu.memory_space<vmem>>, vector<1x1x9x8x4xbf16>
    %55 = vector.shape_cast %54 : vector<1x1x9x8x4xbf16> to vector<9x8x4xbf16>
    %c1_74 = arith.constant 1 : index
    %c2_75 = arith.constant 2 : index
    %c0_76 = arith.constant 0 : index
    %c1_77 = arith.constant 1 : index
    %c0_78 = arith.constant 0 : index
    %56 = vector.load %arg2[%c1_74, %c2_75, %c0_76, %c1_77, %c0_78] : memref<2x4x9x9x4xbf16, #tpu.memory_space<vmem>>, vector<1x1x9x8x4xbf16>
    %57 = vector.shape_cast %56 : vector<1x1x9x8x4xbf16> to vector<9x8x4xbf16>
    %58 = tpu.concatenate %53, %55, %57 in 2 : vector<9x8x4xbf16>, vector<9x8x4xbf16>, vector<9x8x4xbf16> -> vector<9x8x12xbf16>
    %59 = vector.extract_strided_slice %51 {offsets = [0, 0, 0], sizes = [8, 8, 12], strides = [1, 1, 1]} : vector<9x8x12xbf16> to vector<8x8x12xbf16>
    %60 = vector.shape_cast %59 : vector<8x8x12xbf16> to vector<64x12xbf16>
    %c0_79 = arith.constant 0 : index
    %c0_80 = arith.constant 0 : index
    %c0_81 = arith.constant 0 : index
    %61 = vector.load %arg3[%c0_79, %c0_80, %c0_81] : memref<3x12x8xbf16, #tpu.memory_space<vmem>>, vector<1x12x8xbf16>
    %62 = vector.shape_cast %61 : vector<1x12x8xbf16> to vector<12x8xbf16>
    %cst_82 = arith.constant dense<0.000000e+00> : vector<64x8xf32>
    %63 = tpu.matmul %60, %62, %cst_82 {dimension_numbers = #tpu.dot_dimension_numbers<[1], [0], [0], [1], [0, 0, 1, 1], [], []>} : vector<64x12xbf16>, vector<12x8xbf16>, vector<64x8xf32> -> vector<64x8xf32>
    %64 = vector.extract_strided_slice %58 {offsets = [0, 0, 0], sizes = [8, 8, 12], strides = [1, 1, 1]} : vector<9x8x12xbf16> to vector<8x8x12xbf16>
    %65 = vector.shape_cast %64 : vector<8x8x12xbf16> to vector<64x12xbf16>
    %c1_83 = arith.constant 1 : index
    %c0_84 = arith.constant 0 : index
    %c0_85 = arith.constant 0 : index
    %66 = vector.load %arg3[%c1_83, %c0_84, %c0_85] : memref<3x12x8xbf16, #tpu.memory_space<vmem>>, vector<1x12x8xbf16>
    %67 = vector.shape_cast %66 : vector<1x12x8xbf16> to vector<12x8xbf16>
    %cst_86 = arith.constant dense<0.000000e+00> : vector<64x8xf32>
    %68 = tpu.matmul %65, %67, %cst_86 {dimension_numbers = #tpu.dot_dimension_numbers<[1], [0], [0], [1], [0, 0, 1, 1], [], []>} : vector<64x12xbf16>, vector<12x8xbf16>, vector<64x8xf32> -> vector<64x8xf32>
    %69 = arith.addf %63, %68 : vector<64x8xf32>
    %70 = vector.extract_strided_slice %51 {offsets = [1, 0, 0], sizes = [8, 8, 12], strides = [1, 1, 1]} : vector<9x8x12xbf16> to vector<8x8x12xbf16>
    %71 = vector.shape_cast %70 : vector<8x8x12xbf16> to vector<64x12xbf16>
    %c2_87 = arith.constant 2 : index
    %c0_88 = arith.constant 0 : index
    %c0_89 = arith.constant 0 : index
    %72 = vector.load %arg3[%c2_87, %c0_88, %c0_89] : memref<3x12x8xbf16, #tpu.memory_space<vmem>>, vector<1x12x8xbf16>
    %73 = vector.shape_cast %72 : vector<1x12x8xbf16> to vector<12x8xbf16>
    %cst_90 = arith.constant dense<0.000000e+00> : vector<64x8xf32>
    %74 = tpu.matmul %71, %73, %cst_90 {dimension_numbers = #tpu.dot_dimension_numbers<[1], [0], [0], [1], [0, 0, 1, 1], [], []>} : vector<64x12xbf16>, vector<12x8xbf16>, vector<64x8xf32> -> vector<64x8xf32>
    %75 = arith.addf %69, %74 : vector<64x8xf32>
    %c0_91 = arith.constant 0 : index
    %c0_92 = arith.constant 0 : index
    %76 = vector.load %arg4[%c0_91, %c0_92] : memref<1x8xf32, #tpu.memory_space<vmem>>, vector<1x8xf32>
    %77 = vector.broadcast %76 : vector<1x8xf32> to vector<64x8xf32>
    %78 = arith.addf %75, %77 : vector<64x8xf32>
    %cst_93 = arith.constant 0.000000e+00 : f32
    %79 = vector.broadcast %cst_93 : f32 to vector<64x8xf32>
    %80 = arith.maximumf %78, %79 : vector<64x8xf32>
    %81 = arith.truncf %80 : vector<64x8xf32> to vector<64x8xbf16>
    %cst_94 = arith.constant 0.000000e+00 : bf16
    %82 = vector.broadcast %cst_94 : bf16 to vector<10x10x8xbf16>
    %c1_95 = arith.constant 1 : index
    %c0_96 = arith.constant 0 : index
    %c0_97 = arith.constant 0 : index
    %c0_98 = arith.constant 0 : index
    %83 = vector.load %arg5[%c1_95, %c0_96, %c0_97, %c0_98] : memref<2x10x10x8xbf16, #tpu.memory_space<vmem>>, vector<1x10x10x8xbf16>
    %84 = vector.shape_cast %83 : vector<1x10x10x8xbf16> to vector<10x10x8xbf16>
    %85 = vector.shape_cast %82 : vector<10x10x8xbf16> to vector<1x10x10x8xbf16>
    tpu.vector_store %arg5[%c1_95, %c0_96, %c0_97, %c0_98], %85 {strides = array<i32>} : memref<2x10x10x8xbf16, #tpu.memory_space<vmem>>, vector<1x10x10x8xbf16>,
    %86 = vector.shape_cast %81 : vector<64x8xbf16> to vector<8x8x8xbf16>
    %c1_99 = arith.constant 1 : index
    %c1_100 = arith.constant 1 : index
    %c1_101 = arith.constant 1 : index
    %c0_102 = arith.constant 0 : index
    %87 = vector.load %arg5[%c1_99, %c1_100, %c1_101, %c0_102] : memref<2x10x10x8xbf16, #tpu.memory_space<vmem>>, vector<1x8x8x8xbf16>
    %88 = vector.shape_cast %87 : vector<1x8x8x8xbf16> to vector<8x8x8xbf16>
    %89 = vector.shape_cast %86 : vector<8x8x8xbf16> to vector<1x8x8x8xbf16>
    tpu.vector_store %arg5[%c1_99, %c1_100, %c1_101, %c0_102], %89 {strides = array<i32>} : memref<2x10x10x8xbf16, #tpu.memory_space<vmem>>, vector<1x8x8x8xbf16>,
    return
  }
  func.func @transform_0(%arg0: i32, %arg1: i32) -> (i32, i32, i32, i32, i32) {
    %c0_i32 = arith.constant 0 : i32
    %c0_i32_0 = arith.constant 0 : i32
    %c0_i32_1 = arith.constant 0 : i32
    %c0_i32_2 = arith.constant 0 : i32
    %c0_i32_3 = arith.constant 0 : i32
    return %arg1, %c0_i32, %c0_i32_0, %c0_i32_1, %c0_i32_2 : i32, i32, i32, i32, i32
  }
  func.func @transform_1(%arg0: i32, %arg1: i32) -> (i32, i32, i32) {
    %c0_i32 = arith.constant 0 : i32
    %c0_i32_0 = arith.constant 0 : i32
    %c0_i32_1 = arith.constant 0 : i32
    return %c0_i32, %c0_i32_0, %arg0 : i32, i32, i32
  }
  func.func @transform_2(%arg0: i32, %arg1: i32) -> (i32, i32) {
    %c0_i32 = arith.constant 0 : i32
    %c0_i32_0 = arith.constant 0 : i32
    return %c0_i32, %arg0 : i32, i32
  }
  func.func @transform_3(%arg0: i32, %arg1: i32) -> (i32, i32, i32, i32) {
    %c0_i32 = arith.constant 0 : i32
    %c0_i32_0 = arith.constant 0 : i32
    %c0_i32_1 = arith.constant 0 : i32
    return %arg1, %c0_i32, %c0_i32_0, %arg0 : i32, i32, i32, i32
  }
}

</mosaic_0001>

<bundles_post_ra>
// kernel: basic_block_forward.3
= control target key start
LH: loop header
LB: loop body
LE: loop exit
PB: predicated region body
PF: predicated region fallthrough
CT: control target
= control target key end

     0   :  { %s1878_s13 = smov 16   ;;  %s1879_s28 = smov 8   ;;  %vm352_vm0 = vcmask 1043456   ;;  %vm653_vm1 = vcmask 1041408   ;;  %vm251_vm2 = vcmask 64512   ;;  %vm282_vm3 = vcmask 130048   ;;  %s2489_s0 = inlined_call_operand.vmem [shape: bf16[2,1,10,10,8], index: 0, kind: input, shape index: {}]   ;;  %s2490_s1 = inlined_call_operand.vmem [shape: bf16[3,24,8], index: 1, kind: input, shape index: {}]   ;;  %s2491_s4 = inlined_call_operand.vmem [shape: bf16[4,8], index: 4, kind: input, shape index: {}]   ;;  %s2492_s3 = inlined_call_operand.vmem [shape: bf16[2,64,4], index: 3, kind: input, shape index: {}]   ;;  %s2493_s2 = inlined_call_operand.vmem [shape: f32[1,8], index: 2, kind: input, shape index: {}]   ;;  %s2494_s5 = inlined_call_operand.vmem [shape: f32[2,64,8], index: 5, kind: output, shape index: {}]  }
   0x1   :  { %v33_v0 = vld [vmem:[%s2489_s0 + $0x14] sm:$0x1]  ;;  %v43_v1 = vld [vmem:[%s2489_s0 + $0x10] sm:$0xe]  ;;  %v32_v5 = vld [vmem:[%s2489_s0 + $0xc] sm:$0x1] }
   0x2   :  { %v1919_v2 = vld [vmem:[%s2489_s0 + $0x10] sm:$0xf]  ;;  %v1512_v3 = vcombine.low %v43_v1, %v33_v0  ;;  %v42_v6 = vld [vmem:[%s2489_s0 + $0x8] sm:$0xe]  ;;  %v1937_v10 = vld [vmem:[%s2489_s0 + $0x18] sm:$0xf] }
   0x3   :  { %v1502_v4 = vcombine.low %v1919_v2, %v33_v0  ;;  %v1931_v7 = vld [vmem:[%s2489_s0 + $0x8] sm:$0xf]  ;;  %v1511_v8 = vcombine.low %v42_v6, %v32_v5  ;;  %v34_v11 = vld [vmem:[%s2489_s0 + $0x1c] sm:$0x1]  ;;  %v1945_v12 = vld [vmem:[%s2489_s0 + $0x20] sm:$0xf] }
   0x4   :  { %v1501_v9 = vcombine.low %v1931_v7, %v32_v5  ;;  %v223_v13 = vrot.slane %v1512_v3, 1  ;;  %v1503_v15 = vcombine.low %v1937_v10, %v34_v11  ;;  %v35_v16 = vld [vmem:[%s2489_s0 + $0x24] sm:$0x1]  ;;  %v1956_v23 = vld [vmem:[%s2489_s0] sm:$0xf]  ;;  %vm339_vm4 = vcmask 195584  }
   0x5   :  { %v118_v14 = vshll.u32 %v1502_v4, 16  ;;  %v222_v17 = vrot.slane %v1511_v8, 1  ;;  %v1504_v20 = vcombine.low %v1945_v12, %v35_v16  ;;  %v116_v26 = vshrl.u32 %v1502_v4, 16  ;;  %v31_v28 = vld [vmem:[%s2489_s0 + $0x4] sm:$0x1] }
   0x6   :  { %v111_v18 = vshll.u32 %v1501_v9, 16  ;;  %v109_v19 = vshrl.u32 %v1501_v9, 16  ;;  %235 = vrot.lane.b32.xlu1 %v223_v13, %s1878_s13  ;;  %v123_v21 = vshrl.u32 %v1503_v15, 16  ;;  %v125_v22 = vshll.u32 %v1503_v15, 16  ;;  %v44_v31 = vld [vmem:[%s2489_s0 + $0x18] sm:$0xe] }
   0x7   :  { %233 = vrot.lane.b32.xlu0 %v222_v17, %s1878_s13  ;;  %v132_v25 = vshll.u32 %v1504_v20, 16  ;;  %v120_v27 = vrot.slane %v118_v14, 1  ;;  %v130_v30 = vshrl.u32 %v1504_v20, 16  ;;  %v1500_v32 = vcombine.low %v1956_v23, %v31_v28  ;;  %v1969_v35 = vld [vmem:[%s2489_s0 + $0x30] sm:$0xf] }
   0x8   :  { %v113_v24 = vrot.slane %v111_v18, 1  ;;  %v127_v29 = vrot.slane %v125_v22, 1  ;;  %v1974_v36 = vld [vmem:[%s2489_s0 + $0x34] sm:$0x1]  ;;  %v1979_v39 = vld [vmem:[%s2489_s0 + $0x28] sm:$0xf]  ;;  %v1513_v46 = vcombine.low %v44_v31, %v34_v11 }
   0x9   :  { %v134_v34 = vrot.slane %v132_v25, 1  ;;  %v104_v38 = vshll.u32 %v1500_v32, 16  ;;  %v1984_v40 = vld [vmem:[%s2489_s0 + $0x2c] sm:$0x1]  ;;  %v121_v41 = vor.u32 %v120_v27, %v116_v26  ;;  %v102_v42 = vshrl.u32 %v1500_v32, 16 }
   0xa   :  { %v114_v33 = vor.u32 %v113_v24, %v109_v19  ;;  %v128_v37 = vor.u32 %v127_v29, %v123_v21  ;;  %v41_v43 = vld [vmem:[%s2489_s0] sm:$0xe]  ;;  %v1505_v44 = vcombine.low %v1979_v39, %v1984_v40  ;;  %v1506_v49 = vcombine.low %v1969_v35, %v1974_v36  ;;  %v2001_v50 = vld [vmem:[%s2489_s0 + $0x38] sm:$0xf]  ;;  %v39_v52 = vld [vmem:[%s2489_s0 + $0x44] sm:$0x1] }
   0xb   :  { %v135_v45 = vor.u32 %v134_v34, %v130_v30  ;;  %v106_v47 = vrot.slane %v104_v38, 1  ;;  %v45_v48 = vld [vmem:[%s2489_s0 + $0x20] sm:$0xe]  ;;  %v38_v53 = vld [vmem:[%s2489_s0 + $0x3c] sm:$0x1]  ;;  %v224_v58 = vrot.slane %v1513_v46, 1  ;;  %v1510_v59 = vcombine.low %v41_v43, %v31_v28 }
   0xc   :  { %173 = vrot.lane.b32.xlu0 %v114_v33, %s1879_s28  ;;  %177 = vrot.lane.b32.xlu1 %v128_v37, %s1879_s28  ;;  %v2006_v51 = vld [vmem:[%s2489_s0 + $0x40] sm:$0xf]  ;;  %v1514_v55 = vcombine.low %v45_v48, %v35_v16  ;;  %v139_v56 = vshll.u32 %v1505_v44, 16  ;;  %v1507_v57 = vcombine.low %v2001_v50, %v38_v53  ;;  %v146_v60 = vshll.u32 %v1506_v49, 16  ;;  %v46_v13 = vld [vmem:[%s2489_s0 + $0x28] sm:$0xe] }
   0xd   :  { %v107_v54 = vor.u32 %v106_v47, %v102_v42  ;;  %v1508_v61 = vcombine.low %v2006_v51, %v39_v52  ;;  %v137_v63 = vshrl.u32 %v1505_v44, 16  ;;  %v221_v3 = vrot.slane %v1510_v59, 1  ;;  %v2028_v17 = vld [vmem:[%s2489_s0 + $0x48] sm:$0xf]  ;;  %v40_v18 = vld [vmem:[%s2489_s0 + $0x4c] sm:$0x1] }
   0xe   :  { %v225_v62 = vrot.slane %v1514_v55, 1  ;;  %v141_v0 = vrot.slane %v139_v56, 1  ;;  %v153_v1 = vshll.u32 %v1507_v57, 16  ;;  %v144_v4 = vshrl.u32 %v1506_v49, 16  ;;  %v47_v19 = vld [vmem:[%s2489_s0 + $0x30] sm:$0xe] }
   0xf   :  { %v148_v5 = vrot.slane %v146_v60, 1  ;;  %v160_v6 = vshll.u32 %v1508_v61, 16  ;;  %v151_v9 = vshrl.u32 %v1507_v57, 16  ;;  %v158_v15 = vshrl.u32 %v1508_v61, 16  ;;  %v49_v20 = vld [vmem:[%s2489_s0 + $0x40] sm:$0xe] }
  0x10   :  { %175 = vrot.lane.b32.xlu0 %v121_v41, %s1879_s28  ;;  %179 = vrot.lane.b32.xlu1 %v135_v45, %s1879_s28  ;;  %v142_v8 = vor.u32 %v141_v0, %v137_v63  ;;  %v155_v11 = vrot.slane %v153_v1, 1  ;;  %v48_v21 = vld [vmem:[%s2489_s0 + $0x38] sm:$0xe]  ;;  %v1515_v24 = vcombine.low %v46_v13, %v1984_v40  ;;  %v50_v25 = vld [vmem:[%s2489_s0 + $0x48] sm:$0xe]  ;;  %v1509_v26 = vcombine.low %v2028_v17, %v40_v18 }
  0x11   :  { %v149_v14 = vor.u32 %v148_v5, %v144_v4  ;;  %v162_v16 = vrot.slane %v160_v6, 1  ;;  %v2051_v27 = vld [vmem:[%s2489_s0 + $0x58] sm:$0xf]  ;;  %v2056_v28 = vld [vmem:[%s2489_s0 + $0x5c] sm:$0x1]  ;;  %v1516_v30 = vcombine.low %v47_v19, %v1974_v36  ;;  %v1518_v33 = vcombine.low %v49_v20, %v39_v52  ;;  %v1860_v59 = vld [vmem:[%s2490_s1 + $0xc] sm:$0xff]  }
  0x12   :  { %v156_v22 = vor.u32 %v155_v11, %v151_v9  ;;  %v2063_v31 = vld [vmem:[%s2489_s0 + $0x60] sm:$0xf]  ;;  %v2068_v32 = vld [vmem:[%s2489_s0 + $0x64] sm:$0x1]  ;;  %v1517_v34 = vcombine.low %v48_v21, %v38_v53  ;;  %v1519_v37 = vcombine.low %v50_v25, %v40_v18  ;;  %v1593_v38 = vcombine.low %v2051_v27, %v2056_v28  ;;  %v2078_v42 = vld [vmem:[%s2489_s0 + $0x68] sm:$0xf] }
  0x13   :  { %v163_v29 = vor.u32 %v162_v16, %v158_v15  ;;  %v226_v40 = vrot.slane %v1515_v24, 1  ;;  %v167_v36 = vshll.u32 %v1509_v26, 16  ;;  %v1594_v41 = vcombine.low %v2063_v31, %v2068_v32  ;;  %v2083_v43 = vld [vmem:[%s2489_s0 + $0x6c] sm:$0x1]  ;;  %v2089_v47 = vld [vmem:[%s2489_s0 + $0x70] sm:$0xf] }
  0x14   :  { %171 = vrot.lane.b32.xlu0 %v107_v54, %s1879_s28  ;;  %237 = vrot.lane.b32.xlu1 %v224_v58, %s1878_s13  ;;  %v227_v44 = vrot.slane %v1516_v30, 1  ;;  %v229_v45 = vrot.slane %v1518_v33, 1  ;;  %v228_v46 = vrot.slane %v1517_v34, 1  ;;  %v2094_v48 = vld [vmem:[%s2489_s0 + $0x74] sm:$0x1]  ;;  %v230_v49 = vrot.slane %v1519_v37, 1 }
  0x15   :  { %v165_v52 = vshrl.u32 %v1509_v26, 16  ;;  %v852_v53 = vshll.u32 %v1593_v38, 16  ;;  %v1595_v54 = vcombine.low %v2078_v42, %v2083_v43  ;;  %v169_v55 = vrot.slane %v167_v36, 1  ;;  %v2108_v61 = vld [vmem:[%s2489_s0 + $0x50] sm:$0xf]  ;;  %v1861_v63 = vld [vmem:[%s2490_s1] sm:$0xff]  }
  0x16   :  { %v857_v56 = vshrl.u32 %v1594_v41, 16  ;;  %v859_v57 = vshll.u32 %v1594_v41, 16  ;;  %v850_v58 = vshrl.u32 %v1593_v38, 16  ;;  %v1596_v60 = vcombine.low %v2089_v47, %v2094_v48  ;;  %v2119_v0 = vld [vmem:[%s2489_s0 + $0x54] sm:$0x1] }
  0x17   :  { %v1859_v1 = vld [vmem:[%s2490_s1 + $0x8] ss:$0 sps:$4 sm:$0xff]   ;;  %v866_v4 = vshll.u32 %v1595_v54, 16  ;;  %v1584_v5 = vld [vmem:[%s2489_s0 + $0x60] sm:$0xe]  ;;  %v170_v6 = vor.u32 %v169_v55, %v165_v52  ;;  %v864_v15 = vshrl.u32 %v1595_v54, 16  ;;  %v1592_v16 = vcombine.low %v2108_v61, %v2119_v0 }
  0x18   :  { %239 = vrot.lane.b32.xlu0 %v225_v62, %s1878_s13  ;;  %231 = vrot.lane.b32.xlu1 %v221_v3, %s1878_s13  ;;  %v1858_v62 = vld [vmem:[%s2490_s1 + $0x14] ss:$0 sps:$4 sm:$0xff]   ;;  %v854_v3 = vrot.slane %v852_v53, 1  ;;  %v449_v9 = vsel %vm352_vm0, %v1859_v1, 0  ;;  %v861_v11 = vrot.slane %v859_v57, 1  ;;  %v873_v13 = vshll.u32 %v1596_v60, 16 }
  0x19   :  { %1808 = vmatprep.subr.msk.bf16.mxu0 %vm352_vm0, %v1858_v62  ;;  %1809 = vmatprep.subr.msk.bf16.mxu1 %vm352_vm0, %v1859_v1  ;;  %v2141_v18 = vld [vmem:[%s2490_s1 + $0x20] ss:$0 sps:$4 sm:$0xff]   ;;  %v868_v19 = vrot.slane %v866_v4, 1  ;;  %v871_v26 = vshrl.u32 %v1596_v60, 16  ;;  %v845_v30 = vshll.u32 %v1592_v16, 16  ;;  %vm640_vm5 = vcmask 31744  }
  0x1a   :  { %1729 = vmatpush3.bf16.msra.mxu1 %v449_v9  ;;  %v2146_v20 = vld [vmem:[%s2491_s4] sm:$0x3]  ;;  %v855_v21 = vor.u32 %v854_v3, %v850_v58  ;;  %v862_v25 = vor.u32 %v861_v11, %v857_v56  ;;  %v2168_v38 = vld [vmem:[%s2489_s0 + $0x84] sm:$0x1]  ;;  %v1577_v41 = vld [vmem:[%s2489_s0 + $0x7c] sm:$0x1] }
  0x1b   :  { %1730 = vmatprep.subr.bf16.mxu1 %v1861_v63  ;;  %v869_v33 = vor.u32 %v868_v19, %v864_v15  ;;  %v2163_v37 = vld [vmem:[%s2489_s0 + $0x80] sm:$0xf]  ;;  %v1579_v52 = vld [vmem:[%s2489_s0 + $0x8c] sm:$0x1]  ;;  %v1582_v53 = vld [vmem:[%s2489_s0 + $0x50] sm:$0xe] }
  0x1c   :  { %181 = vrot.lane.b32.xlu0 %v142_v8, %s1879_s28  ;;  %183 = vrot.lane.b32.xlu1 %v149_v14, %s1879_s28  ;;  %v354_v8 = vsel %vm352_vm0, %v1858_v62, 0  ;;  %v1583_v14 = vld [vmem:[%s2489_s0 + $0x58] sm:$0xe]  ;;  %v2198_v55 = vld [vmem:[%s2489_s0 + $0x90] sm:$0xf]  ;;  %v1598_v57 = vcombine.low %v2163_v37, %v2168_v38 }
  0x1d   :  { %1717 = vmatpush3.bf16.msra.mxu0 %v354_v8  ;;  %v1603_v24 = vcombine.low %v1583_v14, %v2056_v28  ;;  %v1585_v28 = vld [vmem:[%s2489_s0 + $0x68] sm:$0xe]  ;;  %v1580_v58 = vld [vmem:[%s2489_s0 + $0x94] sm:$0x1]  ;;  %v1587_v19 = vld [vmem:[%s2489_s0 + $0x78] sm:$0xe] }
  0x1e   :  { %1718 = vmatprep.subr.bf16.mxu0 %v1860_v59  ;;  %1731 = vmatpush3.bf16.msra.mxu1 %v1861_v63  ;;  %v1605_v56 = vcombine.low %v1585_v28, %v2083_v43  ;;  %v1602_v43 = vcombine.low %v1582_v53, %v2119_v0  ;;  %v887_v3 = vshll.u32 %v1598_v57, 16  ;;  %v1600_v4 = vcombine.low %v2198_v55, %v1580_v58 }
  0x1f   :  { %1811 = vmatprep.subr.msk.bf16.mxu1 %vm653_vm1, %v2146_v20  ;;  %v963_v34 = vrot.slane %v1603_v24, 1  ;;  %v885_v11 = vshrl.u32 %v1598_v57, 16 }
  0x20   :  { %185 = vrot.lane.b32.xlu0 %v156_v22, %s1879_s28  ;;  %187 = vrot.lane.b32.xlu1 %v163_v29, %s1879_s28  ;;  %v1604_v22 = vcombine.low %v1584_v5, %v2068_v32  ;;  %v875_v29 = vrot.slane %v873_v13, 1  ;;  %v965_v1 = vrot.slane %v1605_v56, 1  ;;  %v889_v13 = vrot.slane %v887_v3, 1 }
  0x21   :  { %1719 = vmatpush3.bf16.msra.mxu0 %v1860_v59  ;;  %v901_v14 = vshll.u32 %v1600_v4, 16 }
  0x22   :  { %1810 = vmatprep.subr.msk.bf16.mxu0 %vm352_vm0, %v2141_v18  ;;  %v964_v32 = vrot.slane %v1604_v22, 1  ;;  %v876_v36 = vor.u32 %v875_v29, %v871_v26  ;;  %v899_v22 = vshrl.u32 %v1600_v4, 16  ;;  %v1581_v26 = vld [vmem:[%s2489_s0 + $0x9c] sm:$0x1]  ;;  %v1588_v29 = vld [vmem:[%s2489_s0 + $0x80] sm:$0xe] }
  0x23   :  { %v903_v24 = vrot.slane %v901_v14, 1  ;;  %v1608_v28 = vcombine.low %v1588_v29, %v2168_v38  ;;  %v1591_v38 = vld [vmem:[%s2489_s0 + $0x98] sm:$0xe] }
  0x24   :  { %241 = vrot.lane.b32.xlu0 %v226_v40, %s1878_s13  ;;  %243 = vrot.lane.b32.xlu1 %v227_v44, %s1878_s13  ;;  %v2173_v40 = vld [vmem:[%s2489_s0 + $0x78] sm:$0xf]  ;;  %v843_v44 = vshrl.u32 %v1592_v16, 16 }
  0x25   :  { %v1597_v54 = vcombine.low %v2173_v40, %v1577_v41  ;;  %v968_v53 = vrot.slane %v1608_v28, 1 }
  0x27   :  { %v880_v62 = vshll.u32 %v1597_v54, 16 }
  0x28   :  { %245 = vrot.lane.b32.xlu0 %v228_v46, %s1878_s13  ;;  %247 = vrot.lane.b32.xlu1 %v229_v45, %s1878_s13  ;;  %v847_v45 = vrot.slane %v845_v30, 1  ;;  %v1586_v46 = vld [vmem:[%s2489_s0 + $0x70] sm:$0xe] }
  0x29   :  { %v1606_v60 = vcombine.low %v1586_v46, %v2094_v48  ;;  %v882_v8 = vrot.slane %v880_v62, 1  ;;  %v962_v48 = vrot.slane %v1602_v43, 1  ;;  %v1611_v62 = vcombine.low %v1591_v38, %v1581_v26 }
  0x2a   :  { %v848_v59 = vor.u32 %v847_v45, %v843_v44  ;;  %v1590_v44 = vld [vmem:[%s2489_s0 + $0x90] sm:$0xe] }
  0x2b   :  { %v966_v5 = vrot.slane %v1606_v60, 1 }
  0x2c   :  { %189 = vrot.lane.b32.xlu0 %v170_v6, %s1879_s28  ;;  %249 = vrot.lane.b32.xlu1 %v230_v49, %s1878_s13  ;;  %v2185_v49 = vld [vmem:[%s2489_s0 + $0x88] sm:$0xf]  ;;  %v878_v6 = vshrl.u32 %v1597_v54, 16  ;;  %v1610_v54 = vcombine.low %v1590_v44, %v1580_v58 }
  0x2d   :  { %v1599_v63 = vcombine.low %v2185_v49, %v1579_v52 }
  0x2e   :  { %v883_v15 = vor.u32 %v882_v8, %v878_v6  ;;  %v970_v60 = vrot.slane %v1610_v54, 1 }
  0x2f   :  { %v894_v9 = vshll.u32 %v1599_v63, 16  ;;  %v892_v16 = vshrl.u32 %v1599_v63, 16  ;;  %v971_v63 = vrot.slane %v1611_v62, 1 }
  0x30   :  { %914 = vrot.lane.b32.xlu0 %v855_v21, %s1879_s28  ;;  %916 = vrot.lane.b32.xlu1 %v862_v25, %s1879_s28  ;;  %v890_v21 = vor.u32 %v889_v13, %v885_v11  ;;  %v2223_v25 = vld [vmem:[%s2489_s0 + $0x98] sm:$0xf] }
  0x31   :  { %v896_v0 = vrot.slane %v894_v9, 1 }
  0x33   :  { %v897_v30 = vor.u32 %v896_v0, %v892_v16 }
  0x34   :  { %918 = vrot.lane.b32.xlu0 %v869_v33, %s1879_s28  ;;  %920 = vrot.lane.b32.xlu1 %v876_v36, %s1879_s28  ;;  %v1607_v33 = vcombine.low %v1587_v19, %v1577_v41  ;;  %v1589_v36 = vld [vmem:[%s2489_s0 + $0x88] sm:$0xe] }
  0x35   :  { %v1609_v46 = vcombine.low %v1589_v36, %v1579_v52 }
  0x36   :  { %v967_v45 = vrot.slane %v1607_v33, 1  ;;  %v1869_v33 = vld [vmem:[%s2490_s1 + $0x8] ss:$0 sps:$4 sm:$0xff]  }
  0x37   :  { %v969_v56 = vrot.slane %v1609_v46, 1 }
  0x38   :  { %974 = vrot.lane.b32.xlu0 %v963_v34, %s1878_s13  ;;  %976 = vrot.lane.b32.xlu1 %v964_v32, %s1878_s13  ;;  %v1601_v32 = vcombine.low %v2223_v25, %v1581_v26  ;;  %v904_v34 = vor.u32 %v903_v24, %v899_v22  ;;  %v536_v26 = vsel %vm352_vm0, %v2141_v18, 0  ;;  %v1866_v18 = vld [vmem:[%s2490_s1 + $0x14] ss:$0 sps:$4 sm:$0xff]  }
  0x3a   :  { %v908_v41 = vshll.u32 %v1601_v32, 16  ;;  %v906_v57 = vshrl.u32 %v1601_v32, 16 }
  0x3c   :  { %912 = vrot.lane.b32.xlu0 %v848_v59, %s1879_s28  ;;  %978 = vrot.lane.b32.xlu1 %v965_v1, %s1878_s13  ;;  %v910_v59 = vrot.slane %v908_v41, 1 }
  0x3e   :  { %v911_v52 = vor.u32 %v910_v59, %v906_v57  ;;  %v1864_v59 = vld [vmem:[%s2492_s3] sm:$0xff]  }
  0x40   :  { %980 = vrot.lane.b32.xlu0 %v966_v5, %s1878_s13  ;;  %972 = vrot.lane.b32.xlu1 %v962_v48, %s1878_s13 }
  0x44   :  { %922 = vrot.lane.b32.xlu0 %v883_v15, %s1879_s28  ;;  %924 = vrot.lane.b32.xlu1 %v890_v21, %s1879_s28 }
  0x48   :  { %926 = vrot.lane.b32.xlu0 %v897_v30, %s1879_s28  ;;  %928 = vrot.lane.b32.xlu1 %v904_v34, %s1879_s28 }
  0x4c   :  { %982 = vrot.lane.b32.xlu0 %v967_v45, %s1878_s13  ;;  %984 = vrot.lane.b32.xlu1 %v968_v53, %s1878_s13 }
  0x50   :  { %986 = vrot.lane.b32.xlu0 %v969_v56, %s1878_s13  ;;  %988 = vrot.lane.b32.xlu1 %v970_v60, %s1878_s13 }
  0x54   :  { %930 = vrot.lane.b32.xlu0 %v911_v52, %s1879_s28  ;;  %990 = vrot.lane.b32.xlu1 %v971_v63, %s1878_s13 }
  0x78   :  { %v236_v58 = vpop.permute.xlu1 %235 }
  0x79   :  { %v234_v1 = vpop.permute.xlu0 %233 }
  0x7e   :  { %v174_v43 = vpop.permute.xlu0 %173  ;;  %v178_v3 = vpop.permute.xlu1 %177 }
  0x7f   :  { %v257_v4 = vsel %vm251_vm2, %v1931_v7, %v174_v43  ;;  %v263_v15 = vsel %vm251_vm2, %v1937_v10, %v178_v3  ;;  %v1863_v10 = vld [vmem:[%s2490_s1 + $0x18] sm:$0xff]   ;;  %v1867_v43 = vld [vmem:[%s2492_s3 + $0x10] sm:$0xff]   ;;  %v1090_v3 = vsel %vm352_vm0, %v1866_v18, 0 }
  0x80   :  { %v286_v9 = vsel %vm282_vm3, %v257_v4, %v234_v1  ;;  %v1870_v4 = vld [vmem:[%s2490_s1 + $0xc] sm:$0xff]  }
  0x82   :  { %v176_v5 = vpop.permute.xlu0 %175  ;;  %v180_v6 = vpop.permute.xlu1 %179 }
  0x83   :  { %v260_v8 = vsel %vm251_vm2, %v1919_v2, %v176_v5  ;;  %v266_v7 = vsel %vm251_vm2, %v1945_v12, %v180_v6  ;;  %v1185_v6 = vsel %vm352_vm0, %v1869_v33, 0 }
  0x84   :  { %v288_v48 = vsel %vm282_vm3, %v260_v8, %v236_v58  ;;  %v1865_v58 = vld [vmem:[%s2492_s3 + $0x8] sm:$0xff]   ;;  %v1871_v8 = vld [vmem:[%s2490_s1] sm:$0xff]  }
  0x85   :  { %v1523_v11 = vcombine.low %v286_v9, %v288_v48 }
  0x86   :  { %v172_v13 = vpop.permute.xlu0 %171  ;;  %v238_v14 = vpop.permute.xlu1 %237 }
  0x87   :  { %1720 = vmatprep.mubr.msk.bf16.mxu0 %vm339_vm4, %v1523_v11  ;;  %v290_v0 = vsel %vm282_vm3, %v263_v15, %v238_v14  ;;  %v254_v2 = vsel %vm251_vm2, %v1956_v23, %v172_v13  ;;  %v655_v23 = vsel %vm653_vm1, %v2146_v20, 0  ;;  %v1872_v11 = vld [vmem:[%s2490_s1 + $0x20] ss:$0 sps:$4 sm:$0xff]   ;;  %v1868_v15 = vld [vmem:[%s2492_s3 + $0x18] sm:$0xff]  }
  0x88   :  { %v1534_v29 = vcombine.low %v288_v48, %v290_v0 }
  0x8a   :  { %v240_v16 = vpop.permute.xlu0 %239  ;;  %v232_v19 = vpop.permute.xlu1 %231 }
  0x8b   :  { %v292_v21 = vsel %vm282_vm3, %v266_v7, %v240_v16  ;;  %v284_v22 = vsel %vm282_vm3, %v254_v2, %v232_v19  ;;  %v1355_v2 = vld [vmem:[%s2491_s4] sm:$0x3] }
  0x8c   :  { %v1524_v24 = vcombine.low %v290_v0, %v292_v21  ;;  %v1533_v12 = vcombine.low %v284_v22, %v286_v9 }
  0x8e   :  { %1721 = vmatmul.mubr.msk.bf16.vlgmr.msra.gmra.mxu0 %vm339_vm4, %v1524_v24  ;;  %v182_v30 = vpop.permute.xlu0 %181  ;;  %v184_v32 = vpop.permute.xlu1 %183  ;;  %1732 = vmatprep.mubr.msk.bf16.mxu1 %vm339_vm4, %v1533_v12 }
  0x8f   :  { %1741 = vmatpush3.bf16.msra.mxu0 %v536_v26  ;;  %1733 = vmatmul.mubr.msk.bf16.vlgmr.msra.gmra.mxu1 %vm339_vm4, %v1534_v29  ;;  %v269_v28 = vsel %vm251_vm2, %v1979_v39, %v182_v30  ;;  %v272_v44 = vsel %vm251_vm2, %v1969_v35, %v184_v32 }
  0x90   :  { %1742 = vmatprep.subr.bf16.mxu0 %v1863_v10  ;;  %1753 = vmatpush3.bf16.msra.mxu1 %v655_v23 }
  0x91   :  { %1813 = vmatprep.subr.msk.bf16.mxu1 %vm352_vm0, %v1869_v33 }
  0x92   :  { %v186_v34 = vpop.permute.xlu0 %185  ;;  %v188_v20 = vpop.permute.xlu1 %187 }
  0x93   :  { %1743 = vmatpush3.bf16.msra.mxu0 %v1863_v10  ;;  %v275_v38 = vsel %vm251_vm2, %v2001_v50, %v186_v34  ;;  %v278_v39 = vsel %vm251_vm2, %v2006_v51, %v188_v20  ;;  %v1271_v34 = vsel %vm352_vm0, %v1872_v11, 0 }
  0x94   :  { %1812 = vmatprep.subr.msk.bf16.mxu0 %vm352_vm0, %v1866_v18 }
  0x96   :  { %v242_v36 = vpop.permute.xlu0 %241  ;;  %v244_v45 = vpop.permute.xlu1 %243 }
  0x97   :  { %v294_v46 = vsel %vm282_vm3, %v269_v28, %v242_v36  ;;  %v296_v41 = vsel %vm282_vm3, %v272_v44, %v244_v45  ;;  %v1389_v28 = vsel %vm653_vm1, %v1355_v2, 0 }
  0x98   :  { %v1535_v53 = vcombine.low %v292_v21, %v294_v46  ;;  %v1525_v54 = vcombine.low %v294_v46, %v296_v41 }
  0x9a   :  { %1736 = vmatprep.mubr.msk.bf16.mxu1 %vm339_vm4, %v1535_v53  ;;  %v246_v56 = vpop.permute.xlu0 %245  ;;  %v248_v57 = vpop.permute.xlu1 %247  ;;  %1724 = vmatprep.mubr.msk.bf16.mxu0 %vm339_vm4, %v1525_v54 }
  0x9b   :  { %v298_v35 = vsel %vm282_vm3, %v275_v38, %v246_v56  ;;  %v300_v60 = vsel %vm282_vm3, %v278_v39, %v248_v57 }
  0x9c   :  { %v1536_v62 = vcombine.low %v296_v41, %v298_v35  ;;  %v1526_v50 = vcombine.low %v298_v35, %v300_v60 }
  0x9e   :  { %1737 = vmatmul.mubr.msk.bf16.gmra.mxu1 %vm339_vm4, %v1536_v62  ;;  %v190_v52 = vpop.permute.xlu0 %189  ;;  %v250_v63 = vpop.permute.xlu1 %249  ;;  %1725 = vmatmul.mubr.msk.bf16.gmra.mxu0 %vm339_vm4, %v1526_v50 }
  0x9f   :  { %1754 = vmatprep.mubr.msk.bf16.mxu1 %vm640_vm5, %v1864_v59  ;;  %1744 = vmatprep.mubr.msk.bf16.mxu0 %vm339_vm4, %v1534_v29  ;;  %v281_v9 = vsel %vm251_vm2, %v2028_v17, %v190_v52 }
  0xa0   :  { %v302_v13 = vsel %vm282_vm3, %v281_v9, %v250_v63 }
  0xa2   :  { %v915_v51 = vpop.permute.xlu0 %914  ;;  %v917_v1 = vpop.permute.xlu1 %916 }
  0xa3   :  { %v997_v14 = vsel %vm251_vm2, %v2051_v27, %v915_v51  ;;  %v1000_v7 = vsel %vm251_vm2, %v2063_v31, %v917_v1  ;;  %v1546_v27 = vcombine.low %v300_v60, %v302_v13  ;;  %v1874_v60 = vld [vmem:[%s2492_s3 + $0x20] sm:$0xff]  }
  0xa6   :  { %v919_v5 = vpop.permute.xlu0 %918  ;;  %1755 = vmatmul.mubr.msk.bf16.vlgmr.msra.gmra.mxu1 %vm640_vm5, %v1865_v58  ;;  %v921_v48 = vpop.permute.xlu1 %920  ;;  %1745 = vmatmul.mubr.msk.bf16.vlgmr.msra.gmra.mxu0 %vm339_vm4, %v1535_v53 }
  0xa7   :  { %1758 = vmatprep.mubr.msk.bf16.mxu1 %vm640_vm5, %v1867_v43  ;;  %1748 = vmatprep.mubr.msk.bf16.mxu0 %vm339_vm4, %v1536_v62  ;;  %v1006_v24 = vsel %vm251_vm2, %v2089_v47, %v921_v48  ;;  %v1003_v26 = vsel %vm251_vm2, %v2078_v42, %v919_v5  ;;  %v1873_v47 = vld [vmem:[%s2490_s1 + $0x18] sm:$0xff]  }
  0xa8   :  { %1763 = vmatpush3.bf16.msra.mxu0 %v1090_v3  ;;  %1775 = vmatpush3.bf16.msra.mxu1 %v1185_v6  ;;  %v1877_v43 = vld [vmem:[%s2492_s3 + $0x38] sm:$0xff]  }
  0xa9   :  { %1764 = vmatprep.subr.bf16.mxu0 %v1870_v4  ;;  %1776 = vmatprep.subr.bf16.mxu1 %v1871_v8 }
  0xaa   :  { %v975_v17 = vpop.permute.xlu0 %974  ;;  %v977_v16 = vpop.permute.xlu1 %976 }
  0xab   :  { %v1025_v0 = vsel %vm282_vm3, %v997_v14, %v975_v17  ;;  %v1027_v19 = vsel %vm282_vm3, %v1000_v7, %v977_v16 }
  0xac   :  { %1765 = vmatpush3.bf16.msra.mxu0 %v1870_v4  ;;  %v1615_v21 = vcombine.low %v1025_v0, %v1027_v19  ;;  %1777 = vmatpush3.bf16.msra.mxu1 %v1871_v8 }
  0xad   :  { %1814 = vmatprep.subr.msk.bf16.mxu0 %vm352_vm0, %v1872_v11  ;;  %1815 = vmatprep.subr.msk.bf16.mxu1 %vm653_vm1, %v1355_v2 }
  0xae   :  { %v913_v22 = vpop.permute.xlu0 %912  ;;  %1759 = vmatmul.mubr.msk.bf16.gmra.mxu1 %vm640_vm5, %v1868_v15  ;;  %v979_v31 = vpop.permute.xlu1 %978  ;;  %1749 = vmatmul.mubr.msk.bf16.gmra.mxu0 %vm339_vm4, %v1546_v27 }
  0xaf   :  { %1766 = vmatprep.mubr.msk.bf16.mxu0 %vm339_vm4, %v1615_v21  ;;  %v1029_v12 = vsel %vm282_vm3, %v1003_v26, %v979_v31  ;;  %v994_v29 = vsel %vm251_vm2, %v2108_v61, %v913_v22  ;;  %v2407_v26 = vld [vmem:[%s2493_s2] ss:$0 sm:$0xff] }
  0xb0   :  { %v1626_v42 = vcombine.low %v1027_v19, %v1029_v12 }
  0xb2   :  { %v981_v10 = vpop.permute.xlu0 %980  ;;  %v973_v30 = vpop.permute.xlu1 %972 }
  0xb3   :  { %v1031_v23 = vsel %vm282_vm3, %v1006_v24, %v981_v10  ;;  %v1023_v33 = vsel %vm282_vm3, %v994_v29, %v973_v30 }
  0xb4   :  { %v1616_v32 = vcombine.low %v1029_v12, %v1031_v23  ;;  %v1625_v18 = vcombine.low %v1023_v33, %v1025_v0 }
  0xb6   :  { %v923_v20 = vpop.permute.xlu0 %922  ;;  %v925_v36 = vpop.permute.xlu1 %924  ;;  %1767 = vmatmul.mubr.msk.bf16.vlgmr.msra.gmra.mxu0 %vm339_vm4, %v1616_v32  ;;  %1778 = vmatprep.mubr.msk.bf16.mxu1 %vm339_vm4, %v1625_v18 }
  0xb7   :  { %1779 = vmatmul.mubr.msk.bf16.vlgmr.msra.gmra.mxu1 %vm339_vm4, %v1626_v42  ;;  %1787 = vmatpush3.bf16.msra.mxu0 %v1271_v34  ;;  %v1009_v45 = vsel %vm251_vm2, %v2173_v40, %v923_v20  ;;  %v1012_v41 = vsel %vm251_vm2, %v2163_v37, %v925_v36 }
  0xb8   :  { %1799 = vmatpush3.bf16.msra.mxu1 %v1389_v28  ;;  %1788 = vmatprep.subr.bf16.mxu0 %v1873_v47 }
  0xba   :  { %v927_v61 = vpop.permute.xlu0 %926  ;;  %v929_v44 = vpop.permute.xlu1 %928 }
  0xbb   :  { %1789 = vmatpush3.bf16.msra.mxu0 %v1873_v47  ;;  %v1015_v57 = vsel %vm251_vm2, %v2185_v49, %v927_v61  ;;  %v1018_v40 = vsel %vm251_vm2, %v2198_v55, %v929_v44  ;;  %v1875_v49 = vld [vmem:[%s2492_s3 + $0x28] sm:$0xff]   ;;  %v1876_v55 = vld [vmem:[%s2492_s3 + $0x30] sm:$0xff]  }
  0xbe   :  { %v983_v46 = vpop.permute.xlu0 %982  ;;  %v985_v53 = vpop.permute.xlu1 %984 }
  0xbf   :  { %v1033_v54 = vsel %vm282_vm3, %v1009_v45, %v983_v46  ;;  %v1035_v38 = vsel %vm282_vm3, %v1012_v41, %v985_v53 }
  0xc0   :  { %v1627_v56 = vcombine.low %v1031_v23, %v1033_v54  ;;  %v1617_v39 = vcombine.low %v1033_v54, %v1035_v38 }
  0xc2   :  { %1782 = vmatprep.mubr.msk.bf16.mxu1 %vm339_vm4, %v1627_v56  ;;  %v987_v35 = vpop.permute.xlu0 %986  ;;  %v989_v59 = vpop.permute.xlu1 %988  ;;  %1770 = vmatprep.mubr.msk.bf16.mxu0 %vm339_vm4, %v1617_v39 }
  0xc3   :  { %v1037_v37 = vsel %vm282_vm3, %v1015_v57, %v987_v35  ;;  %v1039_v62 = vsel %vm282_vm3, %v1018_v40, %v989_v59 }
  0xc4   :  { %v1628_v50 = vcombine.low %v1035_v38, %v1037_v37  ;;  %v1618_v52 = vcombine.low %v1037_v37, %v1039_v62 }
  0xc6   :  { %1783 = vmatmul.mubr.msk.bf16.gmra.mxu1 %vm339_vm4, %v1628_v50  ;;  %1771 = vmatmul.mubr.msk.bf16.gmra.mxu0 %vm339_vm4, %v1618_v52  ;;  %v931_v63 = vpop.permute.xlu0 %930  ;;  %v991_v58 = vpop.permute.xlu1 %990 }
  0xc7   :  { %1800 = vmatprep.mubr.msk.bf16.mxu1 %vm640_vm5, %v1874_v60  ;;  %1790 = vmatprep.mubr.msk.bf16.mxu0 %vm339_vm4, %v1626_v42  ;;  %v1021_v51 = vsel %vm251_vm2, %v2223_v25, %v931_v63 }
  0xc8   :  { %v1041_v1 = vsel %vm282_vm3, %v1021_v51, %v991_v58 }
  0xc9   :  { %v1638_v3 = vcombine.low %v1039_v62, %v1041_v1 }
  0xce   :  { %1801 = vmatmul.mubr.msk.bf16.vlgmr.msra.gmra.mxu1 %vm640_vm5, %v1875_v49  ;;  %1791 = vmatmul.mubr.msk.bf16.vlgmr.msra.gmra.mxu0 %vm339_vm4, %v1627_v56 }
  0xcf   :  { %1804 = vmatprep.mubr.msk.bf16.mxu1 %vm640_vm5, %v1876_v55  ;;  %1794 = vmatprep.mubr.msk.bf16.mxu0 %vm339_vm4, %v1628_v50 }
  0xd6   :  { %1805 = vmatmul.mubr.msk.bf16.gmra.mxu1 %vm640_vm5, %v1877_v43  ;;  %1795 = vmatmul.mubr.msk.bf16.gmra.mxu0 %vm339_vm4, %v1638_v3 }
 0x14e   :  { %v1722_v25 = vpop.f32.mrf.mxu0 }
 0x14f   :  { %v1734_v4 = vpop.f32.mrf.mxu1 }
 0x150   :  { %v390_v6 = vpop.f32.mrf.mxu0  ;;  %v494_v19 = vadd.f32 %v1734_v4, %v1722_v25 }
 0x151   :  { %v485_v5 = vpop.f32.mrf.mxu1 }
 0x152   :  { %v1723_v9 = vpop.f32.mrf.mxu0  ;;  %v486_v22 = vadd.f32 %v485_v5, %v390_v6 }
 0x153   :  { %v1735_v8 = vpop.f32.mrf.mxu1 }
 0x154   :  { %v393_v11 = vpop.f32.mrf.mxu0  ;;  %v497_v12 = vadd.f32 %v1735_v8, %v1723_v9 }
 0x155   :  { %v488_v48 = vpop.f32.mrf.mxu1 }
 0x156   :  { %v489_v32 = vadd.f32 %v488_v48, %v393_v11 }
 0x15e   :  { %v1738_v13 = vpop.f32.mrf.mxu1  ;;  %v1726_v14 = vpop.f32.mrf.mxu0 }
 0x15f   :  { %v510_v20 = vadd.f32 %v1738_v13, %v1726_v14 }
 0x160   :  { %v501_v17 = vpop.f32.mrf.mxu1  ;;  %v406_v15 = vpop.f32.mrf.mxu0 }
 0x161   :  { %v502_v41 = vadd.f32 %v501_v17, %v406_v15 }
 0x162   :  { %v1739_v7 = vpop.f32.mrf.mxu1  ;;  %v1727_v16 = vpop.f32.mrf.mxu0 }
 0x163   :  { %v513_v35 = vadd.f32 %v1739_v7, %v1727_v16 }
 0x164   :  { %v504_v0 = vpop.f32.mrf.mxu1  ;;  %v409_v2 = vpop.f32.mrf.mxu0 }
 0x165   :  { %v505_v52 = vadd.f32 %v504_v0, %v409_v2 }
 0x166   :  { %v1756_v27 = vpop.f32.mrf.mxu1  ;;  %v1746_v21 = vpop.f32.mrf.mxu0 }
 0x167   :  { %v605_v31 = vadd.f32 %v1746_v21, %v494_v19 }
 0x168   :  { %v691_v24 = vpop.f32.mrf.mxu1  ;;  %v572_v10 = vpop.f32.mrf.mxu0 }
 0x169   :  { %v724_v29 = vadd.f32 %v1756_v27, %v605_v31  ;;  %v603_v30 = vadd.f32 %v572_v10, %v486_v22 }
 0x16a   :  { %v1757_v23 = vpop.f32.mrf.mxu1  ;;  %v1747_v33 = vpop.f32.mrf.mxu0 }
 0x16b   :  { %v739_v18 = vadd.f32 %v2407_v26, %v724_v29  ;;  %v722_v34 = vadd.f32 %v691_v24, %v603_v30  ;;  %v606_v47 = vadd.f32 %v1747_v33, %v497_v12 }
 0x16c   :  { %v694_v42 = vpop.f32.mrf.mxu1  ;;  %v575_v28 = vpop.f32.mrf.mxu0 }
 0x16d   :  { %v747_v36 = vmax.f32 %v739_v18, 0.0  ;;  %v737_v61 = vadd.f32 %v2407_v26, %v722_v34  ;;  %v725_v44 = vadd.f32 %v1757_v23, %v606_v47  ;;  %v604_v45 = vadd.f32 %v575_v28, %v489_v32 }
 0x16e   :  { %v1760_v46 = vpop.f32.mrf.mxu1  ;;  %v1750_v53 = vpop.f32.mrf.mxu0 }
 0x16f   :  { %755 = vst.msk [vmem:[%s2494_s5 + $0x10] sm:$0xff] %vm251_vm2, %v747_v36  ;;  %v745_v54 = vmax.f32 %v737_v61, 0.0  ;;  %v740_v38 = vadd.f32 %v2407_v26, %v725_v44  ;;  %v723_v56 = vadd.f32 %v694_v42, %v604_v45  ;;  %v609_v39 = vadd.f32 %v1750_v53, %v510_v20 }
 0x170   :  { %v707_v57 = vpop.f32.mrf.mxu1  ;;  %v588_v40 = vpop.f32.mrf.mxu0 }
 0x171   :  { %753 = vst.msk [vmem:[%s2494_s5] sm:$0xff] %vm251_vm2, %v745_v54  ;;  %v748_v59 = vmax.f32 %v740_v38, 0.0  ;;  %v738_v37 = vadd.f32 %v2407_v26, %v723_v56  ;;  %v728_v60 = vadd.f32 %v1760_v46, %v609_v39  ;;  %v607_v62 = vadd.f32 %v588_v40, %v502_v41 }
 0x172   :  { %v1761_v50 = vpop.f32.mrf.mxu1  ;;  %v1751_v49 = vpop.f32.mrf.mxu0 }
 0x173   :  { %756 = vst.msk [vmem:[%s2494_s5 + $0x18] sm:$0xff] %vm251_vm2, %v748_v59  ;;  %v746_v55 = vmax.f32 %v738_v37, 0.0  ;;  %v743_v63 = vadd.f32 %v2407_v26, %v728_v60  ;;  %v726_v51 = vadd.f32 %v707_v57, %v607_v62  ;;  %v610_v58 = vadd.f32 %v1751_v49, %v513_v35 }
 0x174   :  { %v710_v1 = vpop.f32.mrf.mxu1  ;;  %v591_v43 = vpop.f32.mrf.mxu0 }
 0x175   :  { %754 = vst.msk [vmem:[%s2494_s5 + $0x8] sm:$0xff] %vm251_vm2, %v746_v55  ;;  %v751_v3 = vmax.f32 %v743_v63, 0.0  ;;  %v741_v4 = vadd.f32 %v2407_v26, %v726_v51  ;;  %v729_v25 = vadd.f32 %v1761_v50, %v610_v58  ;;  %v608_v5 = vadd.f32 %v591_v43, %v505_v52 }
 0x176   :  { %v1768_v11 = vpop.f32.mrf.mxu0 }
 0x177   :  { %759 = vst.msk [vmem:[%s2494_s5 + $0x30] sm:$0xff] %vm251_vm2, %v751_v3  ;;  %v749_v6 = vmax.f32 %v741_v4, 0.0  ;;  %v744_v8 = vadd.f32 %v2407_v26, %v729_v25  ;;  %v727_v9 = vadd.f32 %v710_v1, %v608_v5  ;;  %v1780_v48 = vpop.f32.mrf.mxu1 }
 0x178   :  { %v1126_v7 = vpop.f32.mrf.mxu0  ;;  %v1230_v30 = vadd.f32 %v1780_v48, %v1768_v11 }
 0x179   :  { %757 = vst.msk [vmem:[%s2494_s5 + $0x20] sm:$0xff] %vm251_vm2, %v749_v6  ;;  %v752_v13 = vmax.f32 %v744_v8, 0.0  ;;  %v742_v14 = vadd.f32 %v2407_v26, %v727_v9  ;;  %v1221_v15 = vpop.f32.mrf.mxu1 }
 0x17a   :  { %v1769_v0 = vpop.f32.mrf.mxu0  ;;  %v1222_v32 = vadd.f32 %v1221_v15, %v1126_v7 }
 0x17b   :  { %760 = vst.msk [vmem:[%s2494_s5 + $0x38] sm:$0xff] %vm251_vm2, %v752_v13  ;;  %v750_v17 = vmax.f32 %v742_v14, 0.0  ;;  %v1781_v16 = vpop.f32.mrf.mxu1 }
 0x17c   :  { %v1129_v19 = vpop.f32.mrf.mxu0  ;;  %v1233_v42 = vadd.f32 %v1781_v16, %v1769_v0 }
 0x17d   :  { %758 = vst.msk [vmem:[%s2494_s5 + $0x28] sm:$0xff] %vm251_vm2, %v750_v17  ;;  %v1224_v2 = vpop.f32.mrf.mxu1 }
 0x17e   :  { %v1225_v44 = vadd.f32 %v1224_v2, %v1129_v19 }
 0x186   :  { %v1784_v27 = vpop.f32.mrf.mxu1  ;;  %v1772_v21 = vpop.f32.mrf.mxu0 }
 0x187   :  { %v1246_v54 = vadd.f32 %v1784_v27, %v1772_v21 }
 0x188   :  { %v1237_v22 = vpop.f32.mrf.mxu1  ;;  %v1142_v31 = vpop.f32.mrf.mxu0 }
 0x189   :  { %v1238_v59 = vadd.f32 %v1237_v22, %v1142_v31 }
 0x18a   :  { %v1785_v24 = vpop.f32.mrf.mxu1  ;;  %v1773_v10 = vpop.f32.mrf.mxu0 }
 0x18b   :  { %v1249_v55 = vadd.f32 %v1785_v24, %v1773_v10 }
 0x18c   :  { %v1240_v12 = vpop.f32.mrf.mxu1  ;;  %v1145_v29 = vpop.f32.mrf.mxu0 }
 0x18d   :  { %v1241_v3 = vadd.f32 %v1240_v12, %v1145_v29 }
 0x18e   :  { %v1802_v23 = vpop.f32.mrf.mxu1  ;;  %v1792_v33 = vpop.f32.mrf.mxu0 }
 0x18f   :  { %v1340_v18 = vadd.f32 %v1792_v33, %v1230_v30 }
 0x190   :  { %v1425_v34 = vpop.f32.mrf.mxu1  ;;  %v1307_v47 = vpop.f32.mrf.mxu0 }
 0x191   :  { %v1458_v20 = vadd.f32 %v1802_v23, %v1340_v18  ;;  %v1338_v28 = vadd.f32 %v1307_v47, %v1222_v32 }
 0x192   :  { %v1803_v36 = vpop.f32.mrf.mxu1  ;;  %v1793_v61 = vpop.f32.mrf.mxu0 }
 0x193   :  { %v1473_v45 = vadd.f32 %v2407_v26, %v1458_v20  ;;  %v1456_v46 = vadd.f32 %v1425_v34, %v1338_v28  ;;  %v1341_v41 = vadd.f32 %v1793_v61, %v1233_v42 }
 0x194   :  { %v1428_v53 = vpop.f32.mrf.mxu1  ;;  %v1310_v38 = vpop.f32.mrf.mxu0 }
 0x195   :  { %v1481_v56 = vmax.f32 %v1473_v45, 0.0  ;;  %v1471_v39 = vadd.f32 %v2407_v26, %v1456_v46  ;;  %v1459_v57 = vadd.f32 %v1803_v36, %v1341_v41  ;;  %v1339_v35 = vadd.f32 %v1310_v38, %v1225_v44 }
 0x196   :  { %v1806_v40 = vpop.f32.mrf.mxu1  ;;  %v1796_v37 = vpop.f32.mrf.mxu0 }
 0x197   :  { %1664 = vst.msk [vmem:[%s2494_s5 + $0x50] sm:$0xff] %vm251_vm2, %v1481_v56  ;;  %v1479_v60 = vmax.f32 %v1471_v39, 0.0  ;;  %v1474_v62 = vadd.f32 %v2407_v26, %v1459_v57  ;;  %v1457_v50 = vadd.f32 %v1428_v53, %v1339_v35  ;;  %v1344_v52 = vadd.f32 %v1796_v37, %v1246_v54 }
 0x198   :  { %v1441_v49 = vpop.f32.mrf.mxu1  ;;  %v1323_v63 = vpop.f32.mrf.mxu0 }
 0x199   :  { %1662 = vst.msk [vmem:[%s2494_s5 + $0x40] sm:$0xff] %vm251_vm2, %v1479_v60  ;;  %v1482_v51 = vmax.f32 %v1474_v62, 0.0  ;;  %v1472_v58 = vadd.f32 %v2407_v26, %v1457_v50  ;;  %v1462_v1 = vadd.f32 %v1806_v40, %v1344_v52  ;;  %v1342_v43 = vadd.f32 %v1323_v63, %v1238_v59 }
 0x19a   :  { %v1797_v4 = vpop.f32.mrf.mxu0  ;;  %v1807_v25 = vpop.f32.mrf.mxu1 }
 0x19b   :  { %1665 = vst.msk [vmem:[%s2494_s5 + $0x58] sm:$0xff] %vm251_vm2, %v1482_v51  ;;  %v1480_v5 = vmax.f32 %v1472_v58, 0.0  ;;  %v1477_v6 = vadd.f32 %v2407_v26, %v1462_v1  ;;  %v1460_v8 = vadd.f32 %v1441_v49, %v1342_v43  ;;  %v1345_v9 = vadd.f32 %v1797_v4, %v1249_v55 }
 0x19c   :  { %v1326_v48 = vpop.f32.mrf.mxu0  ;;  %v1444_v15 = vpop.f32.mrf.mxu1 }
 0x19d   :  { %1663 = vst.msk [vmem:[%s2494_s5 + $0x48] sm:$0xff] %vm251_vm2, %v1480_v5  ;;  %v1485_v11 = vmax.f32 %v1477_v6, 0.0  ;;  %v1475_v13 = vadd.f32 %v2407_v26, %v1460_v8  ;;  %v1463_v14 = vadd.f32 %v1807_v25, %v1345_v9  ;;  %v1343_v17 = vadd.f32 %v1326_v48, %v1241_v3 }
 0x19f   :  { %1668 = vst.msk [vmem:[%s2494_s5 + $0x70] sm:$0xff] %vm251_vm2, %v1485_v11  ;;  %v1483_v7 = vmax.f32 %v1475_v13, 0.0  ;;  %v1478_v16 = vadd.f32 %v2407_v26, %v1463_v14  ;;  %v1461_v0 = vadd.f32 %v1444_v15, %v1343_v17 }
 0x1a1   :  { %1666 = vst.msk [vmem:[%s2494_s5 + $0x60] sm:$0xff] %vm251_vm2, %v1483_v7  ;;  %v1486_v2 = vmax.f32 %v1478_v16, 0.0  ;;  %v1476_v19 = vadd.f32 %v2407_v26, %v1461_v0 }
 0x1a3   :  { %1669 = vst.msk [vmem:[%s2494_s5 + $0x78] sm:$0xff] %vm251_vm2, %v1486_v2  ;;  %v1484_v27 = vmax.f32 %v1476_v19, 0.0 }
 0x1a5   :  { %1667 = vst.msk [vmem:[%s2494_s5 + $0x68] sm:$0xff] %vm251_vm2, %v1484_v27 }

// kernel: basic_block_forward.2
= control target key start
LH: loop header
LB: loop body
LE: loop exit
PB: predicated region body
PF: predicated region fallthrough
CT: control target
= control target key end

     0   :  { %s2486_s18 = smov 4   ;;  %s2487_s23 = smov 8   ;;  %vm522_vm0 = vcmask 1045504   ;;  %vm214_vm1 = vcmask 31744   ;;  %vm242_vm2 = vcmask 64512   ;;  %vm509_vm3 = vcmask 97280   ;;  %s3618_s0 = inlined_call_operand.vmem [shape: bf16[2,4,9,9,4], index: 0, kind: input, shape index: {}]   ;;  %s3619_s1 = inlined_call_operand.vmem [shape: bf16[3,12,8], index: 1, kind: input, shape index: {}]   ;;  %s3620_s3 = inlined_call_operand.vmem [shape: bf16[2,10,10,8], index: 3, kind: output, shape index: {}]   ;;  %s3621_s2 = inlined_call_operand.vmem [shape: f32[1,8], index: 2, kind: input, shape index: {}]  }
   0x1   :  { %v2412_v0 = vld [vmem:[%s3618_s0 + $0xe8] ss:$0 sps:$4 sm:$0xff]   ;;  %v2413_v1 = vld [vmem:[%s3618_s0 + $0xd8] ss:$0 sps:$4 sm:$0xff]   ;;  %v2414_v2 = vld [vmem:[%s3618_s0 + $0xf0] ss:$0 sps:$4 sm:$0xff]  }
   0x2   :  { %315 = vrot.lane.b32.xlu1 %v2412_v0, %s2486_s18  ;;  %v2415_v3 = vld [vmem:[%s3618_s0 + $0xe0] ss:$0 sps:$4 sm:$0xff]   ;;  %v2525_v4 = vld [vmem:[%s3618_s0 + $0x98] sm:$0xf]  ;;  %311 = vrot.lane.b32.xlu0 %v2413_v1, %s2486_s18  ;;  %vm825_vm4 = vcmask 60416   ;;  %vm827_vm5 = vcmask 57344  }
   0x3   :  { %v2025_v5 = vld [vmem:[%s3618_s0 + $0x9c] sm:$0x1]  ;;  %v2534_v6 = vld [vmem:[%s3618_s0 + $0x90] sm:$0xf]  ;;  %v2024_v7 = vld [vmem:[%s3618_s0 + $0x94] sm:$0x1] }
   0x4   :  { %v2041_v8 = vcombine.low %v2525_v4, %v2025_v5  ;;  %v2040_v9 = vcombine.low %v2534_v6, %v2024_v7  ;;  %v2544_v10 = vld [vmem:[%s3618_s0 + $0xa8] sm:$0xf]  ;;  %v2027_v11 = vld [vmem:[%s3618_s0 + $0xac] sm:$0x1]  ;;  %v2553_v16 = vld [vmem:[%s3618_s0 + $0xa0] sm:$0xf] }
   0x5   :  { %v2043_v17 = vcombine.low %v2544_v10, %v2027_v11  ;;  %v2026_v18 = vld [vmem:[%s3618_s0 + $0xa4] sm:$0x1]  ;;  %v2564_v23 = vld [vmem:[%s3618_s0 + $0x8] sm:$0xf]  ;;  %v35_v24 = vld [vmem:[%s3618_s0 + $0xc] sm:$0x1] }
   0x6   :  { %317 = vrot.lane.b32.xlu1 %v2414_v2, %s2486_s18  ;;  %v375_v12 = vshrl.u32 %v2041_v8, 16  ;;  %v377_v13 = vshll.u32 %v2041_v8, 16  ;;  %v368_v14 = vshrl.u32 %v2040_v9, 16  ;;  %v370_v15 = vshll.u32 %v2040_v9, 16  ;;  %313 = vrot.lane.b32.xlu0 %v2415_v3, %s2486_s18  ;;  %v2572_v28 = vld [vmem:[%s3618_s0] sm:$0xf] }
   0x7   :  { %v2042_v21 = vcombine.low %v2553_v16, %v2026_v18  ;;  %v391_v22 = vshll.u32 %v2043_v17, 16  ;;  %v34_v29 = vld [vmem:[%s3618_s0 + $0x4] sm:$0x1]  ;;  %v2418_v30 = vld [vmem:[%s3618_s0 + $0x50] ss:$0 sps:$4 sm:$0xff]   ;;  %v389_v32 = vshrl.u32 %v2043_v17, 16  ;;  %v2000_v36 = vcombine.low %v2564_v23, %v35_v24 }
   0x8   :  { %v379_v19 = vrot.slane %v377_v13, 1  ;;  %v372_v20 = vrot.slane %v370_v15, 1  ;;  %v2419_v31 = vld [vmem:[%s3618_s0 + $0x48] ss:$0 sps:$4 sm:$0xff]   ;;  %v1999_v37 = vcombine.low %v2572_v28, %v34_v29  ;;  %v2590_v38 = vld [vmem:[%s3618_s0 + $0x18] sm:$0xf] }
   0x9   :  { %v384_v27 = vshll.u32 %v2042_v21, 16  ;;  %v393_v33 = vrot.slane %v391_v22, 1  ;;  %v382_v34 = vshrl.u32 %v2042_v21, 16  ;;  %v37_v39 = vld [vmem:[%s3618_s0 + $0x1c] sm:$0x1]  ;;  %v143_v45 = vshll.u32 %v2000_v36, 16 }
   0xa   :  { %v380_v25 = vor.u32 %v379_v19, %v375_v12  ;;  %v373_v26 = vor.u32 %v372_v20, %v368_v14  ;;  %v2598_v40 = vld [vmem:[%s3618_s0 + $0x10] sm:$0xf]  ;;  %v36_v41 = vld [vmem:[%s3618_s0 + $0x14] sm:$0x1]  ;;  %v2002_v43 = vcombine.low %v2590_v38, %v37_v39  ;;  %v136_v46 = vshll.u32 %v1999_v37, 16 }
   0xb   :  { %v386_v35 = vrot.slane %v384_v27, 1  ;;  %v394_v42 = vor.u32 %v393_v33, %v389_v32  ;;  %v2001_v47 = vcombine.low %v2598_v40, %v36_v41  ;;  %v2422_v48 = vld [vmem:[%s3618_s0 + $0x60] ss:$0 sps:$4 sm:$0xff]   ;;  %v2423_v49 = vld [vmem:[%s3618_s0 + $0x58] ss:$0 sps:$4 sm:$0xff]   ;;  %v141_v50 = vshrl.u32 %v2000_v36, 16 }
   0xc   :  { %425 = vrot.lane.b32.xlu1 %v380_v25, %s2487_s23  ;;  %423 = vrot.lane.b32.xlu0 %v373_v26, %s2487_s23  ;;  %v157_v51 = vshll.u32 %v2002_v43, 16  ;;  %v145_v52 = vrot.slane %v143_v45, 1  ;;  %v134_v53 = vshrl.u32 %v1999_v37, 16  ;;  %v138_v54 = vrot.slane %v136_v46, 1  ;;  %v2620_v62 = vld [vmem:[%s3618_s0 + $0xb8] sm:$0xf] }
   0xd   :  { %v387_v44 = vor.u32 %v386_v35, %v382_v34  ;;  %v150_v55 = vshll.u32 %v2001_v47, 16  ;;  %v155_v56 = vshrl.u32 %v2002_v43, 16  ;;  %v148_v60 = vshrl.u32 %v2001_v47, 16  ;;  %v2029_v63 = vld [vmem:[%s3618_s0 + $0xbc] sm:$0x1] }
   0xe   :  { %v159_v57 = vrot.slane %v157_v51, 1  ;;  %v146_v58 = vor.u32 %v145_v52, %v141_v50  ;;  %v139_v59 = vor.u32 %v138_v54, %v134_v53  ;;  %v2628_v0 = vld [vmem:[%s3618_s0 + $0xb0] sm:$0xf]  ;;  %v2028_v1 = vld [vmem:[%s3618_s0 + $0xb4] sm:$0x1]  ;;  %v2045_v5 = vcombine.low %v2620_v62, %v2029_v63 }
   0xf   :  { %v152_v61 = vrot.slane %v150_v55, 1  ;;  %v2044_v7 = vcombine.low %v2628_v0, %v2028_v1  ;;  %v2428_v8 = vld [vmem:[%s3618_s0 + $0x100] ss:$0 sps:$4 sm:$0xff]   ;;  %v2429_v9 = vld [vmem:[%s3618_s0 + $0xf8] ss:$0 sps:$4 sm:$0xff]  }
  0x10   :  { %72 = vrot.lane.b32.xlu1 %v2418_v30, %s2486_s18  ;;  %70 = vrot.lane.b32.xlu0 %v2419_v31, %s2486_s18  ;;  %v160_v2 = vor.u32 %v159_v57, %v155_v56  ;;  %v2646_v11 = vld [vmem:[%s3618_s0 + $0xc8] sm:$0xf]  ;;  %v405_v12 = vshll.u32 %v2045_v5, 16  ;;  %v2031_v14 = vld [vmem:[%s3618_s0 + $0xcc] sm:$0x1]  ;;  %v403_v19 = vshrl.u32 %v2045_v5, 16 }
  0x11   :  { %v153_v3 = vor.u32 %v152_v61, %v148_v60  ;;  %v398_v13 = vshll.u32 %v2044_v7, 16  ;;  %v2656_v15 = vld [vmem:[%s3618_s0 + $0xc0] sm:$0xf]  ;;  %v2030_v17 = vld [vmem:[%s3618_s0 + $0xc4] sm:$0x1]  ;;  %v2047_v20 = vcombine.low %v2646_v11, %v2031_v14  ;;  %v396_v24 = vshrl.u32 %v2044_v7, 16 }
  0x12   :  { %v2430_v18 = vld [vmem:[%s3618_s0 + $0x110] ss:$0 sps:$4 sm:$0xff]   ;;  %v2431_v21 = vld [vmem:[%s3618_s0 + $0x108] ss:$0 sps:$4 sm:$0xff]   ;;  %v407_v22 = vrot.slane %v405_v12, 1  ;;  %v2046_v26 = vcombine.low %v2656_v15, %v2030_v17 }
  0x13   :  { %v400_v25 = vrot.slane %v398_v13, 1  ;;  %v419_v27 = vshll.u32 %v2047_v20, 16  ;;  %v2674_v29 = vld [vmem:[%s3618_s0 + $0x28] sm:$0xf]  ;;  %v39_v33 = vld [vmem:[%s3618_s0 + $0x2c] sm:$0x1] }
  0x14   :  { %429 = vrot.lane.b32.xlu1 %v394_v42, %s2487_s23  ;;  %427 = vrot.lane.b32.xlu0 %v387_v44, %s2487_s23  ;;  %v408_v30 = vor.u32 %v407_v22, %v403_v19  ;;  %v412_v32 = vshll.u32 %v2046_v26, 16  ;;  %v2684_v34 = vld [vmem:[%s3618_s0 + $0x20] sm:$0xf]  ;;  %v38_v35 = vld [vmem:[%s3618_s0 + $0x24] sm:$0x1]  ;;  %v417_v37 = vshrl.u32 %v2047_v20, 16  ;;  %v2004_v41 = vcombine.low %v2674_v29, %v39_v33 }
  0x15   :  { %v401_v31 = vor.u32 %v400_v25, %v396_v24  ;;  %v2434_v36 = vld [vmem:[%s3618_s0 + $0x70] ss:$0 sps:$4 sm:$0xff]   ;;  %v421_v39 = vrot.slane %v419_v27, 1  ;;  %v2435_v42 = vld [vmem:[%s3618_s0 + $0x68] ss:$0 sps:$4 sm:$0xff]   ;;  %v410_v43 = vshrl.u32 %v2046_v26, 16  ;;  %v2003_v45 = vcombine.low %v2684_v34, %v38_v35 }
  0x16   :  { %v414_v44 = vrot.slane %v412_v32, 1  ;;  %v2702_v46 = vld [vmem:[%s3618_s0 + $0x38] sm:$0xf]  ;;  %v41_v47 = vld [vmem:[%s3618_s0 + $0x3c] sm:$0x1]  ;;  %v171_v51 = vshll.u32 %v2004_v41, 16 }
  0x17   :  { %v422_v50 = vor.u32 %v421_v39, %v417_v37  ;;  %v164_v53 = vshll.u32 %v2003_v45, 16  ;;  %v2006_v54 = vcombine.low %v2702_v46, %v41_v47  ;;  %v2438_v56 = vld [vmem:[%s3618_s0 + $0x80] ss:$0 sps:$4 sm:$0xff]   ;;  %v169_v57 = vshrl.u32 %v2004_v41, 16  ;;  %v2730_v5 = vld [vmem:[%s3618_s0 + $0x1b8] sm:$0xf] }
  0x18   :  { %76 = vrot.lane.b32.xlu1 %v2422_v48, %s2486_s18  ;;  %74 = vrot.lane.b32.xlu0 %v2423_v49, %s2486_s18  ;;  %v2710_v48 = vld [vmem:[%s3618_s0 + $0x30] sm:$0xf]  ;;  %v40_v49 = vld [vmem:[%s3618_s0 + $0x34] sm:$0x1]  ;;  %v415_v52 = vor.u32 %v414_v44, %v410_v43  ;;  %v173_v60 = vrot.slane %v171_v51, 1 }
  0x19   :  { %v2005_v55 = vcombine.low %v2710_v48, %v40_v49  ;;  %v166_v61 = vrot.slane %v164_v53, 1  ;;  %v185_v63 = vshll.u32 %v2006_v54, 16  ;;  %v2182_v13 = vld [vmem:[%s3618_s0 + $0x1bc] sm:$0x1]  ;;  %v2740_v14 = vld [vmem:[%s3618_s0 + $0x1b0] sm:$0xf] }
  0x1a   :  { %v174_v7 = vor.u32 %v173_v60, %v169_v57  ;;  %v2181_v17 = vld [vmem:[%s3618_s0 + $0x1b4] sm:$0x1]  ;;  %v2749_v19 = vld [vmem:[%s3618_s0 + $0x1c8] sm:$0xf]  ;;  %v2184_v20 = vld [vmem:[%s3618_s0 + $0x1cc] sm:$0x1] }
  0x1b   :  { %v178_v1 = vshll.u32 %v2005_v55, 16  ;;  %v2197_v24 = vcombine.low %v2740_v14, %v2181_v17  ;;  %v2760_v25 = vld [vmem:[%s3618_s0 + $0x1c0] sm:$0xf]  ;;  %v2183_v26 = vld [vmem:[%s3618_s0 + $0x1c4] sm:$0x1] }
  0x1c   :  { %198 = vrot.lane.b32.xlu1 %v146_v58, %s2487_s23  ;;  %196 = vrot.lane.b32.xlu0 %v139_v59, %s2487_s23  ;;  %v162_v58 = vshrl.u32 %v2003_v45, 16  ;;  %v2439_v59 = vld [vmem:[%s3618_s0 + $0x78] ss:$0 sps:$4 sm:$0xff]   ;;  %v2444_v27 = vld [vmem:[%s3618_s0 + $0x200] ss:$0 sps:$4 sm:$0xff]  }
  0x1d   :  { %v180_v12 = vrot.slane %v178_v1, 1  ;;  %v2775_v33 = vld [vmem:[%s3618_s0 + $0x40] sm:$0xf]  ;;  %v1356_v35 = vshll.u32 %v2197_v24, 16  ;;  %v42_v37 = vld [vmem:[%s3618_s0 + $0x44] sm:$0x1] }
  0x1e   :  { %v2478_v39 = vld [vmem:[%s3619_s1 + $0x8] sm:$0x3f]   ;;  %v2446_v41 = vld [vmem:[%s3618_s0 + $0x210] ss:$0 sps:$4 sm:$0xff]   ;;  %v1354_v47 = vshrl.u32 %v2197_v24, 16 }
  0x1f   :  { %2403 = vmatprep.subr.msk.bf16.mxu0 %vm522_vm0, %v2478_v39  ;;  %v524_v49 = vsel %vm522_vm0, %v2478_v39, 0  ;;  %v2481_v53 = vld [vmem:[%s3619_s1] sm:$0x3f]   ;;  %v2185_v17 = vld [vmem:[%s3618_s0 + $0x1d4] sm:$0x1] }
  0x20   :  { %202 = vrot.lane.b32.xlu1 %v160_v2, %s2487_s23  ;;  %200 = vrot.lane.b32.xlu0 %v153_v3, %s2487_s23  ;;  %v183_v2 = vshrl.u32 %v2006_v54, 16  ;;  %v176_v3 = vshrl.u32 %v2005_v55, 16  ;;  %v629_v57 = vsel %vm522_vm0, %v2481_v53, 0  ;;  %v2846_v24 = vld [vmem:[%s3618_s0 + $0x1e8] sm:$0xf] }
  0x21   :  { %2344 = vmatpush3.bf16.msra.mxu0 %v524_v49  ;;  %2404 = vmatprep.subr.msk.bf16.mxu1 %vm522_vm0, %v2481_v53  ;;  %vm949_vm6 = vsmask.f32 7938  ;;  %vm955_vm7 = vsmask.f32 256 }
  0x22   :  { %v181_v22 = vor.u32 %v180_v12, %v176_v3  ;;  %2354 = vmatpush3.bf16.msra.mxu1 %v629_v57  ;;  %v2186_v12 = vld [vmem:[%s3618_s0 + $0x1dc] sm:$0x1]  ;;  %v2882_v57 = vld [vmem:[%s3618_s0 + $0x128] sm:$0xf]  ;;  %vm3331_vm8 = vmand %vm825_vm4, %vm949_vm6 }
  0x23   :  { %vm3336_vm9 = vmand %vm827_vm5, %vm955_vm7 }
  0x24   :  { %321 = vrot.lane.b32.xlu1 %v2428_v8, %s2486_s18  ;;  %319 = vrot.lane.b32.xlu0 %v2429_v9, %s2486_s18  ;;  %v167_v8 = vor.u32 %v166_v61, %v162_v58  ;;  %v187_v9 = vrot.slane %v185_v63, 1  ;;  %v2805_v58 = vld [vmem:[%s3619_s1 + $0x10] sm:$0x3f]  }
  0x25   :  { %2405 = vmatprep.subr.msk.bf16.mxu0 %vm522_vm0, %v2805_v58 }
  0x28   :  { %325 = vrot.lane.b32.xlu1 %v2430_v18, %s2486_s18  ;;  %323 = vrot.lane.b32.xlu0 %v2431_v21, %s2486_s18  ;;  %v2198_v18 = vcombine.low %v2730_v5, %v2182_v13  ;;  %v188_v21 = vor.u32 %v187_v9, %v183_v2  ;;  %v2823_v9 = vld [vmem:[%s3618_s0 + $0x1d8] sm:$0xf]  ;;  %v2831_v13 = vld [vmem:[%s3618_s0 + $0x1d0] sm:$0xf] }
  0x2a   :  { %v1363_v32 = vshll.u32 %v2198_v18, 16  ;;  %v1361_v44 = vshrl.u32 %v2198_v18, 16  ;;  %v2453_v18 = vld [vmem:[%s3618_s0 + $0x88] ss:$0 sps:$4 sm:$0xff]  }
  0x2c   :  { %433 = vrot.lane.b32.xlu1 %v408_v30, %s2487_s23  ;;  %431 = vrot.lane.b32.xlu0 %v401_v31, %s2487_s23  ;;  %v2200_v30 = vcombine.low %v2749_v19, %v2184_v20  ;;  %v2445_v31 = vld [vmem:[%s3618_s0 + $0x1f8] ss:$0 sps:$4 sm:$0xff]   ;;  %v1365_v45 = vrot.slane %v1363_v32, 1  ;;  %v2454_v32 = vld [vmem:[%s3618_s0 + $0x220] ss:$0 sps:$4 sm:$0xff]  }
  0x2e   :  { %v1377_v43 = vshll.u32 %v2200_v30, 16  ;;  %v1375_v54 = vshrl.u32 %v2200_v30, 16  ;;  %v1366_v60 = vor.u32 %v1365_v45, %v1361_v44  ;;  %v2187_v30 = vld [vmem:[%s3618_s0 + $0x1e4] sm:$0x1]  ;;  %v2457_v44 = vld [vmem:[%s3618_s0 + $0x228] ss:$0 sps:$4 sm:$0xff]  }
  0x30   :  { %80 = vrot.lane.b32.xlu1 %v2434_v36, %s2486_s18  ;;  %78 = vrot.lane.b32.xlu0 %v2435_v42, %s2486_s18  ;;  %v2199_v36 = vcombine.low %v2760_v25, %v2183_v26  ;;  %v2447_v42 = vld [vmem:[%s3618_s0 + $0x208] ss:$0 sps:$4 sm:$0xff]   ;;  %v1379_v55 = vrot.slane %v1377_v43, 1  ;;  %v2188_v26 = vld [vmem:[%s3618_s0 + $0x1ec] sm:$0x1] }
  0x32   :  { %v1370_v51 = vshll.u32 %v2199_v36, 16  ;;  %v1380_v2 = vor.u32 %v1379_v55, %v1375_v54 }
  0x34   :  { %437 = vrot.lane.b32.xlu1 %v422_v50, %s2487_s23  ;;  %435 = vrot.lane.b32.xlu0 %v415_v52, %s2487_s23  ;;  %v1358_v50 = vrot.slane %v1356_v35, 1  ;;  %v2007_v52 = vcombine.low %v2775_v33, %v42_v37  ;;  %v1372_v63 = vrot.slane %v1370_v51, 1  ;;  %v2455_v35 = vld [vmem:[%s3618_s0 + $0x218] ss:$0 sps:$4 sm:$0xff]  }
  0x36   :  { %v1359_v61 = vor.u32 %v1358_v50, %v1354_v47  ;;  %v192_v1 = vshll.u32 %v2007_v52, 16 }
  0x38   :  { %84 = vrot.lane.b32.xlu1 %v2438_v56, %s2486_s18  ;;  %82 = vrot.lane.b32.xlu0 %v2439_v59, %s2486_s18  ;;  %v1368_v56 = vshrl.u32 %v2199_v36, 16  ;;  %v2810_v59 = vld [vmem:[%s3619_s1 + $0x8] sm:$0x3f]  }
  0x39   :  { %2406 = vmatprep.subr.msk.bf16.mxu1 %vm522_vm0, %v2810_v59 }
  0x3a   :  { %v1373_v3 = vor.u32 %v1372_v63, %v1368_v56  ;;  %v2138_v63 = vld [vmem:[%s3618_s0 + $0x124] sm:$0x1] }
  0x3c   :  { %206 = vrot.lane.b32.xlu1 %v174_v7, %s2487_s23  ;;  %204 = vrot.lane.b32.xlu0 %v167_v8, %s2487_s23  ;;  %v190_v7 = vshrl.u32 %v2007_v52, 16  ;;  %v194_v8 = vrot.slane %v192_v1, 1 }
  0x3e   :  { %v195_v20 = vor.u32 %v194_v8, %v190_v7  ;;  %v2902_v8 = vld [vmem:[%s3618_s0 + $0x138] sm:$0xf] }
  0x40   :  { %210 = vrot.lane.b32.xlu1 %v188_v21, %s2487_s23  ;;  %208 = vrot.lane.b32.xlu0 %v181_v22, %s2487_s23  ;;  %v2202_v21 = vcombine.low %v2823_v9, %v2186_v12  ;;  %v2201_v22 = vcombine.low %v2831_v13, %v2185_v17  ;;  %v2141_v12 = vld [vmem:[%s3618_s0 + $0x13c] sm:$0x1]  ;;  %v2910_v17 = vld [vmem:[%s3618_s0 + $0x130] sm:$0xf] }
  0x42   :  { %v1391_v36 = vshll.u32 %v2202_v21, 16  ;;  %v1384_v37 = vshll.u32 %v2201_v22, 16  ;;  %v1382_v47 = vshrl.u32 %v2201_v22, 16  ;;  %v2463_v22 = vld [vmem:[%s3618_s0 + $0x168] ss:$0 sps:$4 sm:$0xff]  }
  0x44   :  { %1299 = vrot.lane.b32.xlu1 %v2444_v27, %s2486_s18  ;;  %1297 = vrot.lane.b32.xlu0 %v2445_v31, %s2486_s18  ;;  %v2854_v27 = vld [vmem:[%s3618_s0 + $0x1e0] sm:$0xf]  ;;  %v2204_v31 = vcombine.low %v2846_v24, %v2188_v26  ;;  %v1393_v45 = vrot.slane %v1391_v36, 1  ;;  %v1386_v49 = vrot.slane %v1384_v37, 1 }
  0x45   :  { %v2203_v39 = vcombine.low %v2854_v27, %v2187_v30  ;;  %v2159_v30 = vcombine.low %v2902_v8, %v2141_v12  ;;  %v2464_v36 = vld [vmem:[%s3618_s0 + $0x180] ss:$0 sps:$4 sm:$0xff]   ;;  %v2958_v12 = vld [vmem:[%s3618_s0 + $0x158] sm:$0xf] }
  0x46   :  { %v1405_v43 = vshll.u32 %v2204_v31, 16  ;;  %v1403_v51 = vshrl.u32 %v2204_v31, 16  ;;  %v1387_v54 = vor.u32 %v1386_v49, %v1382_v47 }
  0x47   :  { %v1398_v50 = vshll.u32 %v2203_v39, 16  ;;  %v1396_v55 = vshrl.u32 %v2203_v39, 16 }
  0x48   :  { %1303 = vrot.lane.b32.xlu1 %v2446_v41, %s2486_s18  ;;  %1301 = vrot.lane.b32.xlu0 %v2447_v42, %s2486_s18  ;;  %v2456_v41 = vld [vmem:[%s3618_s0 + $0x230] ss:$0 sps:$4 sm:$0xff]   ;;  %v1389_v42 = vshrl.u32 %v2202_v21, 16  ;;  %v1407_v52 = vrot.slane %v1405_v43, 1 }
  0x49   :  { %v1400_v56 = vrot.slane %v1398_v50, 1  ;;  %v2462_v21 = vld [vmem:[%s3618_s0 + $0x170] ss:$0 sps:$4 sm:$0xff]   ;;  %v1143_v50 = vshrl.u32 %v2159_v30, 16 }
  0x4a   :  { %v1394_v53 = vor.u32 %v1393_v45, %v1389_v42  ;;  %v2465_v42 = vld [vmem:[%s3618_s0 + $0x178] ss:$0 sps:$4 sm:$0xff]  }
  0x4c   :  { %1411 = vrot.lane.b32.xlu1 %v1366_v60, %s2487_s23  ;;  %1409 = vrot.lane.b32.xlu0 %v1359_v61, %s2487_s23  ;;  %v2139_v60 = vld [vmem:[%s3618_s0 + $0x12c] sm:$0x1]  ;;  %v2890_v61 = vld [vmem:[%s3618_s0 + $0x120] sm:$0xf] }
  0x4d   :  { %v2157_v1 = vcombine.low %v2882_v57, %v2139_v60  ;;  %v2156_v7 = vcombine.low %v2890_v61, %v2138_v63  ;;  %v2143_v60 = vld [vmem:[%s3618_s0 + $0x14c] sm:$0x1] }
  0x4f   :  { %v1124_v26 = vshll.u32 %v2156_v7, 16  ;;  %v1129_v37 = vshrl.u32 %v2157_v1, 16 }
  0x50   :  { %1415 = vrot.lane.b32.xlu1 %v1380_v2, %s2487_s23  ;;  %1413 = vrot.lane.b32.xlu0 %v1373_v3, %s2487_s23  ;;  %v1408_v2 = vor.u32 %v1407_v52, %v1403_v51  ;;  %v1401_v3 = vor.u32 %v1400_v56, %v1396_v55  ;;  %v2947_v56 = vld [vmem:[%s3618_s0 + $0x148] sm:$0xf] }
  0x51   :  { %v1126_v43 = vrot.slane %v1124_v26, 1 }
  0x54   :  { %212 = vrot.lane.b32.xlu1 %v195_v20, %s2487_s23  ;;  %86 = vrot.lane.b32.xlu0 %v2453_v18, %s2486_s18  ;;  %v2140_v18 = vld [vmem:[%s3618_s0 + $0x134] sm:$0x1]  ;;  %v1131_v20 = vshll.u32 %v2157_v1, 16 }
  0x55   :  { %v2158_v31 = vcombine.low %v2910_v17, %v2140_v18  ;;  %v2145_v18 = vld [vmem:[%s3618_s0 + $0x15c] sm:$0x1] }
  0x56   :  { %v1133_v39 = vrot.slane %v1131_v20, 1  ;;  %v2966_v20 = vld [vmem:[%s3618_s0 + $0x150] sm:$0xf] }
  0x57   :  { %v1138_v45 = vshll.u32 %v2158_v31, 16  ;;  %v1136_v51 = vshrl.u32 %v2158_v31, 16  ;;  %v2471_v31 = vld [vmem:[%s3618_s0 + $0x188] ss:$0 sps:$4 sm:$0xff]  }
  0x58   :  { %1307 = vrot.lane.b32.xlu1 %v2454_v32, %s2486_s18  ;;  %1305 = vrot.lane.b32.xlu0 %v2455_v35, %s2486_s18  ;;  %v2928_v32 = vld [vmem:[%s3618_s0 + $0x140] sm:$0xf]  ;;  %v2142_v35 = vld [vmem:[%s3618_s0 + $0x144] sm:$0x1]  ;;  %v1134_v49 = vor.u32 %v1133_v39, %v1129_v37 }
  0x59   :  { %v2160_v47 = vcombine.low %v2928_v32, %v2142_v35  ;;  %v2981_v39 = vld [vmem:[%s3618_s0 + $0x160] sm:$0xf] }
  0x5b   :  { %v1152_v55 = vshll.u32 %v2160_v47, 16  ;;  %v1150_v63 = vshrl.u32 %v2160_v47, 16 }
  0x5c   :  { %1311 = vrot.lane.b32.xlu1 %v2456_v41, %s2486_s18  ;;  %1309 = vrot.lane.b32.xlu0 %v2457_v44, %s2486_s18  ;;  %v1122_v41 = vshrl.u32 %v2156_v7, 16  ;;  %v1145_v44 = vshll.u32 %v2159_v30, 16  ;;  %v2161_v7 = vcombine.low %v2947_v56, %v2143_v60  ;;  %v2475_v60 = vld [vmem:[%s3618_s0 + $0x1a0] ss:$0 sps:$4 sm:$0xff]  }
  0x5e   :  { %v1127_v52 = vor.u32 %v1126_v43, %v1122_v41  ;;  %v1159_v35 = vshll.u32 %v2161_v7, 16  ;;  %v2146_v41 = vld [vmem:[%s3618_s0 + $0x164] sm:$0x1]  ;;  %v1157_v47 = vshrl.u32 %v2161_v7, 16 }
  0x60   :  { %1419 = vrot.lane.b32.xlu1 %v1394_v53, %s2487_s23  ;;  %1417 = vrot.lane.b32.xlu0 %v1387_v54, %s2487_s23  ;;  %v1147_v53 = vrot.slane %v1145_v44, 1  ;;  %v1140_v54 = vrot.slane %v1138_v45, 1  ;;  %v2473_v45 = vld [vmem:[%s3618_s0 + $0x190] ss:$0 sps:$4 sm:$0xff]  }
  0x62   :  { %v1148_v1 = vor.u32 %v1147_v53, %v1143_v50 }
  0x64   :  { %1423 = vrot.lane.b32.xlu1 %v1408_v2, %s2487_s23  ;;  %1421 = vrot.lane.b32.xlu0 %v1401_v3, %s2487_s23  ;;  %v1141_v2 = vor.u32 %v1140_v54, %v1136_v51  ;;  %v1154_v3 = vrot.slane %v1152_v55, 1  ;;  %v2164_v51 = vcombine.low %v2981_v39, %v2146_v41 }
  0x66   :  { %v1155_v30 = vor.u32 %v1154_v3, %v1150_v63  ;;  %v1178_v41 = vshrl.u32 %v2164_v51, 16 }
  0x68   :  { %1060 = vrot.lane.b32.xlu1 %v2462_v21, %s2486_s18  ;;  %1058 = vrot.lane.b32.xlu0 %v2463_v22, %s2486_s18  ;;  %v2144_v21 = vld [vmem:[%s3618_s0 + $0x154] sm:$0x1]  ;;  %v2163_v22 = vcombine.low %v2958_v12, %v2145_v18 }
  0x6a   :  { %v1173_v43 = vshll.u32 %v2163_v22, 16  ;;  %v1171_v53 = vshrl.u32 %v2163_v22, 16 }
  0x6c   :  { %1064 = vrot.lane.b32.xlu1 %v2464_v36, %s2486_s18  ;;  %1062 = vrot.lane.b32.xlu0 %v2465_v42, %s2486_s18  ;;  %v2162_v36 = vcombine.low %v2966_v20, %v2144_v21  ;;  %v2472_v42 = vld [vmem:[%s3618_s0 + $0x198] ss:$0 sps:$4 sm:$0xff]   ;;  %v1175_v54 = vrot.slane %v1173_v43, 1 }
  0x6e   :  { %v1166_v50 = vshll.u32 %v2162_v36, 16  ;;  %v1164_v63 = vshrl.u32 %v2162_v36, 16 }
  0x70   :  { %1186 = vrot.lane.b32.xlu1 %v1134_v49, %s2487_s23  ;;  %1184 = vrot.lane.b32.xlu0 %v1127_v52, %s2487_s23  ;;  %v1161_v49 = vrot.slane %v1159_v35, 1 }
  0x72   :  { %v1162_v55 = vor.u32 %v1161_v49, %v1157_v47 }
  0x74   :  { %1190 = vrot.lane.b32.xlu1 %v1148_v1, %s2487_s23  ;;  %1188 = vrot.lane.b32.xlu0 %v1141_v2, %s2487_s23  ;;  %v316_v26 = vpop.permute.xlu1 %315  ;;  %v312_v37 = vpop.permute.xlu0 %311  ;;  %v1168_v1 = vrot.slane %v1166_v50, 1  ;;  %v1180_v2 = vshll.u32 %v2164_v51, 16 }
  0x75   :  { %v441_v3 = vsel %vm214_vm1, %v2534_v6, %v312_v37  ;;  %v2479_v37 = vld [vmem:[%s3618_s0 + $0x1a8] ss:$0 sps:$4 sm:$0xff]  }
  0x76   :  { %v1169_v36 = vor.u32 %v1168_v1, %v1164_v63 }
  0x78   :  { %1192 = vrot.lane.b32.xlu1 %v1155_v30, %s2487_s23  ;;  %1066 = vrot.lane.b32.xlu0 %v2471_v31, %s2486_s18  ;;  %v318_v44 = vpop.permute.xlu1 %317  ;;  %v314_v52 = vpop.permute.xlu0 %313  ;;  %v1176_v31 = vor.u32 %v1175_v54, %v1171_v53  ;;  %v723_v54 = vsel %vm522_vm0, %v2805_v58, 0 }
  0x79   :  { %v444_v7 = vsel %vm214_vm1, %v2525_v4, %v314_v52  ;;  %v450_v47 = vsel %vm214_vm1, %v2544_v10, %v318_v44 }
  0x7c   :  { %1070 = vrot.lane.b32.xlu1 %v2472_v42, %s2486_s18  ;;  %1068 = vrot.lane.b32.xlu0 %v2473_v45, %s2486_s18  ;;  %v1182_v42 = vrot.slane %v1180_v2, 1  ;;  %v447_v45 = vsel %vm214_vm1, %v2553_v16, %v316_v26  ;;  %v2484_v16 = vld [vmem:[%s3619_s1] sm:$0x3f]  }
  0x7e   :  { %v426_v18 = vpop.permute.xlu1 %425  ;;  %v424_v21 = vpop.permute.xlu0 %423  ;;  %v1183_v43 = vor.u32 %v1182_v42, %v1178_v41 }
  0x7f   :  { %v466_v22 = vsel %vm242_vm2, %v444_v7, %v426_v18  ;;  %v464_v30 = vsel %vm242_vm2, %v441_v3, %v424_v21 }
  0x80   :  { %1194 = vrot.lane.b32.xlu1 %v1162_v55, %s2487_s23  ;;  %1072 = vrot.lane.b32.xlu0 %v2475_v60, %s2486_s18  ;;  %v2050_v35 = vcombine.low %v464_v30, %v466_v22  ;;  %v1507_v30 = vsel %vm522_vm0, %v2810_v59, 0 }
  0x82   :  { %2345 = vmatprep.mubr.msk.bf16.mxu0 %vm509_vm3, %v2050_v35  ;;  %v73_v6 = vpop.permute.xlu1 %72  ;;  %v71_v4 = vpop.permute.xlu0 %70 }
  0x83   :  { %v220_v44 = vsel %vm214_vm1, %v2564_v23, %v73_v6  ;;  %v217_v55 = vsel %vm214_vm1, %v2572_v28, %v71_v4 }
  0x84   :  { %1198 = vrot.lane.b32.xlu1 %v1176_v31, %s2487_s23  ;;  %1196 = vrot.lane.b32.xlu0 %v1169_v36, %s2487_s23  ;;  %v3047_v31 = vld [vmem:[%s3619_s1 + $0x10] sm:$0x3f]  }
  0x86   :  { %v430_v49 = vpop.permute.xlu1 %429  ;;  %v428_v50 = vpop.permute.xlu0 %427 }
  0x87   :  { %v470_v51 = vsel %vm242_vm2, %v450_v47, %v430_v49  ;;  %v468_v52 = vsel %vm242_vm2, %v447_v45, %v428_v50 }
  0x88   :  { %v2051_v53 = vcombine.low %v468_v52, %v470_v51  ;;  %1074 = vrot.lane.b32.xlu0 %v2479_v37, %s2486_s18  ;;  %1200 = vrot.lane.b32.xlu1 %v1183_v43, %s2487_s23 }
  0x8a   :  { %v77_v26 = vpop.permute.xlu1 %76  ;;  %2346 = vmatmul.mubr.msk.bf16.vlgmr.msra.gmra.mxu0 %vm509_vm3, %v2051_v53  ;;  %v75_v10 = vpop.permute.xlu0 %74 }
  0x8b   :  { %2364 = vmatpush3.bf16.msra.mxu0 %v723_v54  ;;  %v226_v3 = vsel %vm214_vm1, %v2590_v38, %v77_v26  ;;  %v223_v7 = vsel %vm214_vm1, %v2598_v40, %v75_v10 }
  0x8c   :  { %2407 = vmatprep.subr.msk.bf16.mxu0 %vm522_vm0, %v2484_v16 }
  0x8e   :  { %v199_v60 = vpop.permute.xlu1 %198  ;;  %v197_v63 = vpop.permute.xlu0 %196 }
  0x8f   :  { %v246_v58 = vsel %vm242_vm2, %v220_v44, %v199_v60  ;;  %v244_v1 = vsel %vm242_vm2, %v217_v55, %v197_v63 }
  0x90   :  { %v2059_v2 = vcombine.low %v244_v1, %v246_v58 }
  0x92   :  { %v203_v18 = vpop.permute.xlu1 %202  ;;  %2355 = vmatprep.mubr.msk.bf16.mxu1 %vm509_vm3, %v2059_v2  ;;  %v201_v23 = vpop.permute.xlu0 %200  ;;  %v1612_v2 = vsel %vm522_vm0, %v2484_v16, 0 }
  0x93   :  { %v250_v21 = vsel %vm242_vm2, %v226_v3, %v203_v18  ;;  %v248_v28 = vsel %vm242_vm2, %v223_v7, %v201_v23 }
  0x94   :  { %v2060_v22 = vcombine.low %v248_v28, %v250_v21  ;;  %v2070_v54 = vcombine.low %v246_v58, %v248_v28 }
  0x96   :  { %v322_v38 = vpop.permute.xlu1 %321  ;;  %2356 = vmatmul.mubr.msk.bf16.vlgmr.msra.gmra.mxu1 %vm509_vm3, %v2060_v22  ;;  %v320_v40 = vpop.permute.xlu0 %319 }
  0x97   :  { %2374 = vmatpush3.bf16.msra.mxu1 %v1507_v30  ;;  %v456_v41 = vsel %vm214_vm1, %v2620_v62, %v322_v38  ;;  %v453_v59 = vsel %vm214_vm1, %v2628_v0, %v320_v40 }
  0x98   :  { %2408 = vmatprep.subr.msk.bf16.mxu1 %vm522_vm0, %v3047_v31 }
  0x9a   :  { %v326_v35 = vpop.permute.xlu1 %325  ;;  %v324_v36 = vpop.permute.xlu0 %323 }
  0x9b   :  { %v462_v49 = vsel %vm214_vm1, %v2646_v11, %v326_v35  ;;  %v459_v62 = vsel %vm214_vm1, %v2656_v15, %v324_v36 }
  0x9e   :  { %v434_v42 = vpop.permute.xlu1 %433  ;;  %v432_v6 = vpop.permute.xlu0 %431 }
  0x9f   :  { %v474_v4 = vsel %vm242_vm2, %v456_v41, %v434_v42  ;;  %v472_v37 = vsel %vm242_vm2, %v453_v59, %v432_v6 }
  0xa0   :  { %v2052_v43 = vcombine.low %v472_v37, %v474_v4 }
  0xa2   :  { %v81_v45 = vpop.permute.xlu1 %80  ;;  %2349 = vmatprep.mubr.msk.bf16.mxu0 %vm509_vm3, %v2052_v43  ;;  %v79_v47 = vpop.permute.xlu0 %78 }
  0xa3   :  { %v232_v11 = vsel %vm214_vm1, %v2674_v29, %v81_v45  ;;  %v229_v15 = vsel %vm214_vm1, %v2684_v34, %v79_v47  ;;  %v1705_v45 = vsel %vm522_vm0, %v3047_v31, 0 }
  0xa6   :  { %v438_v50 = vpop.permute.xlu1 %437  ;;  %v436_v51 = vpop.permute.xlu0 %435 }
  0xa7   :  { %v478_v0 = vsel %vm242_vm2, %v462_v49, %v438_v50  ;;  %v476_v52 = vsel %vm242_vm2, %v459_v62, %v436_v51 }
  0xa8   :  { %v2053_v53 = vcombine.low %v476_v52, %v478_v0 }
  0xaa   :  { %v85_v26 = vpop.permute.xlu1 %84  ;;  %2350 = vmatmul.mubr.msk.bf16.gmra.mxu0 %vm509_vm3, %v2053_v53  ;;  %v83_v10 = vpop.permute.xlu0 %82 }
  0xab   :  { %2365 = vmatprep.mubr.msk.bf16.mxu0 %vm509_vm3, %v2070_v54  ;;  %v238_v3 = vsel %vm214_vm1, %v2702_v46, %v85_v26  ;;  %v235_v7 = vsel %vm214_vm1, %v2710_v48, %v83_v10 }
  0xae   :  { %v207_v44 = vpop.permute.xlu1 %206  ;;  %v205_v55 = vpop.permute.xlu0 %204 }
  0xaf   :  { %v254_v60 = vsel %vm242_vm2, %v232_v11, %v207_v44  ;;  %v252_v63 = vsel %vm242_vm2, %v229_v15, %v205_v55 }
  0xb0   :  { %v2061_v1 = vcombine.low %v252_v63, %v254_v60  ;;  %v2071_v58 = vcombine.low %v250_v21, %v252_v63 }
  0xb2   :  { %v211_v29 = vpop.permute.xlu1 %210  ;;  %2359 = vmatprep.mubr.msk.bf16.mxu1 %vm509_vm3, %v2061_v1  ;;  %2366 = vmatmul.mubr.msk.bf16.vlgmr.msra.gmra.mxu0 %vm509_vm3, %v2071_v58  ;;  %v209_v34 = vpop.permute.xlu0 %208 }
  0xb3   :  { %v258_v18 = vsel %vm242_vm2, %v238_v3, %v211_v29  ;;  %v256_v23 = vsel %vm242_vm2, %v235_v7, %v209_v34  ;;  %2384 = vmatpush3.bf16.msra.mxu0 %v1612_v2 }
  0xb4   :  { %v2062_v21 = vcombine.low %v256_v23, %v258_v18  ;;  %v2072_v28 = vcombine.low %v254_v60, %v256_v23 }
  0xb6   :  { %v1300_v16 = vpop.permute.xlu1 %1299  ;;  %2360 = vmatmul.mubr.msk.bf16.gmra.mxu1 %vm509_vm3, %v2062_v21  ;;  %2369 = vmatprep.mubr.msk.bf16.mxu0 %vm509_vm3, %v2072_v28  ;;  %v1298_v46 = vpop.permute.xlu0 %1297 }
  0xb7   :  { %v1430_v30 = vsel %vm214_vm1, %v2730_v5, %v1300_v16  ;;  %v1427_v38 = vsel %vm214_vm1, %v2740_v14, %v1298_v46 }
  0xba   :  { %v1304_v48 = vpop.permute.xlu1 %1303  ;;  %v1302_v22 = vpop.permute.xlu0 %1301 }
  0xbb   :  { %v1436_v42 = vsel %vm214_vm1, %v2749_v19, %v1304_v48  ;;  %v1433_v6 = vsel %vm214_vm1, %v2760_v25, %v1302_v22 }
  0xbe   :  { %v1412_v40 = vpop.permute.xlu1 %1411  ;;  %v1410_v35 = vpop.permute.xlu0 %1409 }
  0xbf   :  { %v1452_v36 = vsel %vm242_vm2, %v1430_v30, %v1412_v40  ;;  %v1450_v41 = vsel %vm242_vm2, %v1427_v38, %v1410_v35 }
  0xc0   :  { %v2207_v59 = vcombine.low %v1450_v41, %v1452_v36 }
  0xc2   :  { %v1416_v4 = vpop.permute.xlu1 %1415  ;;  %2375 = vmatprep.mubr.msk.bf16.mxu1 %vm509_vm3, %v2207_v59  ;;  %v1414_v5 = vpop.permute.xlu0 %1413 }
  0xc3   :  { %v1456_v37 = vsel %vm242_vm2, %v1436_v42, %v1416_v4  ;;  %v1454_v14 = vsel %vm242_vm2, %v1433_v6, %v1414_v5 }
  0xc4   :  { %v2208_v43 = vcombine.low %v1454_v14, %v1456_v37 }
  0xc6   :  { %v213_v47 = vpop.permute.xlu1 %212  ;;  %2376 = vmatmul.mubr.msk.bf16.vlgmr.msra.gmra.mxu1 %vm509_vm3, %v2208_v43  ;;  %v87_v49 = vpop.permute.xlu0 %86 }
  0xc7   :  { %v241_v19 = vsel %vm214_vm1, %v2775_v33, %v87_v49  ;;  %2394 = vmatpush3.bf16.msra.mxu1 %v1705_v45  ;;  %v2488_v49 = vmov 0  }
  0xc8   :  { %v260_v25 = vsel %vm242_vm2, %v241_v19, %v213_v47  ;;  %833 = vst.msk [vmem:[%s3620_s3 + $0x18] sm:$0xf] %vm825_vm4, %v2488_v49  ;;  %826 = vst.msk [vmem:[%s3620_s3] sm:$0xf] %vm825_vm4, %v2488_v49 }
  0xc9   :  { %v2073_v62 = vcombine.low %v258_v18, %v260_v25  ;;  %829 = vst.msk [vmem:[%s3620_s3 + $0x8] sm:$0xf] %vm825_vm4, %v2488_v49  ;;  %831 = vst.msk [vmem:[%s3620_s3 + $0x10] sm:$0xf] %vm825_vm4, %v2488_v49 }
  0xca   :  { %v1308_v50 = vpop.permute.xlu1 %1307  ;;  %v1306_v51 = vpop.permute.xlu0 %1305  ;;  %835 = vst.msk [vmem:[%s3620_s3 + $0x20] sm:$0xf] %vm825_vm4, %v2488_v49  ;;  %837 = vst.msk [vmem:[%s3620_s3 + $0x28] sm:$0xf] %vm825_vm4, %v2488_v49 }
  0xcb   :  { %2370 = vmatmul.mubr.msk.bf16.gmra.mxu0 %vm509_vm3, %v2073_v62  ;;  %v1442_v31 = vsel %vm214_vm1, %v2823_v9, %v1308_v50  ;;  %v1439_v53 = vsel %vm214_vm1, %v2831_v13, %v1306_v51  ;;  %839 = vst.msk [vmem:[%s3620_s3 + $0x30] sm:$0xf] %vm825_vm4, %v2488_v49  ;;  %841 = vst.msk [vmem:[%s3620_s3 + $0x38] sm:$0xf] %vm825_vm4, %v2488_v49 }
  0xcc   :  { %843 = vst.msk [vmem:[%s3620_s3 + $0x40] sm:$0xf] %vm825_vm4, %v2488_v49  ;;  %845 = vst.msk [vmem:[%s3620_s3 + $0x48] sm:$0xf] %vm825_vm4, %v2488_v49 }
  0xcd   :  { %2237 = vst.msk [vmem:[%s3620_s3 + $0x50] sm:$0xf] %vm825_vm4, %v2488_v49  ;;  %2239 = vst.msk [vmem:[%s3620_s3 + $0x58] sm:$0xf] %vm825_vm4, %v2488_v49 }
  0xce   :  { %v1312_v0 = vpop.permute.xlu1 %1311  ;;  %v1310_v52 = vpop.permute.xlu0 %1309  ;;  %2241 = vst.msk [vmem:[%s3620_s3 + $0x60] sm:$0xf] %vm825_vm4, %v2488_v49  ;;  %2243 = vst.msk [vmem:[%s3620_s3 + $0x68] sm:$0xf] %vm825_vm4, %v2488_v49 }
  0xcf   :  { %v1448_v15 = vsel %vm214_vm1, %v2846_v24, %v1312_v0  ;;  %v1445_v44 = vsel %vm214_vm1, %v2854_v27, %v1310_v52  ;;  %2245 = vst.msk [vmem:[%s3620_s3 + $0x70] sm:$0xf] %vm825_vm4, %v2488_v49  ;;  %2247 = vst.msk [vmem:[%s3620_s3 + $0x78] sm:$0xf] %vm825_vm4, %v2488_v49 }
  0xd0   :  { %2249 = vst.msk [vmem:[%s3620_s3 + $0x80] sm:$0xf] %vm825_vm4, %v2488_v49  ;;  %2251 = vst.msk [vmem:[%s3620_s3 + $0x88] sm:$0xf] %vm825_vm4, %v2488_v49 }
  0xd1   :  { %2253 = vst.msk [vmem:[%s3620_s3 + $0x90] sm:$0xf] %vm825_vm4, %v2488_v49  ;;  %2255 = vst.msk [vmem:[%s3620_s3 + $0x98] sm:$0xf] %vm825_vm4, %v2488_v49 }
  0xd2   :  { %v1420_v54 = vpop.permute.xlu1 %1419  ;;  %v1418_v26 = vpop.permute.xlu0 %1417  ;;  %834 = vst.msk [vmem:[%s3620_s3 + $0x1c] sm:$0x1] %vm827_vm5, %v2488_v49  ;;  %828 = vst.msk [vmem:[%s3620_s3 + $0x4] sm:$0x1] %vm827_vm5, %v2488_v49 }
  0xd3   :  { %v1460_v33 = vsel %vm242_vm2, %v1442_v31, %v1420_v54  ;;  %v1458_v10 = vsel %vm242_vm2, %v1439_v53, %v1418_v26  ;;  %830 = vst.msk [vmem:[%s3620_s3 + $0xc] sm:$0x1] %vm827_vm5, %v2488_v49  ;;  %832 = vst.msk [vmem:[%s3620_s3 + $0x14] sm:$0x1] %vm827_vm5, %v2488_v49 }
  0xd4   :  { %v2209_v11 = vcombine.low %v1458_v10, %v1460_v33  ;;  %836 = vst.msk [vmem:[%s3620_s3 + $0x24] sm:$0x1] %vm827_vm5, %v2488_v49  ;;  %838 = vst.msk [vmem:[%s3620_s3 + $0x2c] sm:$0x1] %vm827_vm5, %v2488_v49 }
  0xd5   :  { %840 = vst.msk [vmem:[%s3620_s3 + $0x34] sm:$0x1] %vm827_vm5, %v2488_v49  ;;  %842 = vst.msk [vmem:[%s3620_s3 + $0x3c] sm:$0x1] %vm827_vm5, %v2488_v49 }
  0xd6   :  { %v1424_v55 = vpop.permute.xlu1 %1423  ;;  %2379 = vmatprep.mubr.msk.bf16.mxu1 %vm509_vm3, %v2209_v11  ;;  %v1422_v9 = vpop.permute.xlu0 %1421  ;;  %844 = vst.msk [vmem:[%s3620_s3 + $0x44] sm:$0x1] %vm827_vm5, %v2488_v49  ;;  %846 = vst.msk [vmem:[%s3620_s3 + $0x4c] sm:$0x1] %vm827_vm5, %v2488_v49 }
  0xd7   :  { %v1464_v60 = vsel %vm242_vm2, %v1448_v15, %v1424_v55  ;;  %v1462_v13 = vsel %vm242_vm2, %v1445_v44, %v1422_v9  ;;  %2238 = vst.msk [vmem:[%s3620_s3 + $0x54] sm:$0x1] %vm827_vm5, %v2488_v49  ;;  %2240 = vst.msk [vmem:[%s3620_s3 + $0x5c] sm:$0x1] %vm827_vm5, %v2488_v49  ;;  %v3324_v44 = vld [vmem:[%s3621_s2] ss:$0 sm:$0xff] }
  0xd8   :  { %v2210_v63 = vcombine.low %v1462_v13, %v1464_v60  ;;  %2242 = vst.msk [vmem:[%s3620_s3 + $0x64] sm:$0x1] %vm827_vm5, %v2488_v49  ;;  %2244 = vst.msk [vmem:[%s3620_s3 + $0x6c] sm:$0x1] %vm827_vm5, %v2488_v49 }
  0xd9   :  { %2246 = vst.msk [vmem:[%s3620_s3 + $0x74] sm:$0x1] %vm827_vm5, %v2488_v49  ;;  %2248 = vst.msk [vmem:[%s3620_s3 + $0x7c] sm:$0x1] %vm827_vm5, %v2488_v49 }
  0xda   :  { %v1061_v1 = vpop.permute.xlu1 %1060  ;;  %2380 = vmatmul.mubr.msk.bf16.gmra.mxu1 %vm509_vm3, %v2210_v63  ;;  %v1059_v58 = vpop.permute.xlu0 %1058  ;;  %2250 = vst.msk [vmem:[%s3620_s3 + $0x84] sm:$0x1] %vm827_vm5, %v2488_v49  ;;  %2252 = vst.msk [vmem:[%s3620_s3 + $0x8c] sm:$0x1] %vm827_vm5, %v2488_v49 }
  0xdb   :  { %v1207_v24 = vsel %vm214_vm1, %v2882_v57, %v1061_v1  ;;  %v1204_v27 = vsel %vm214_vm1, %v2890_v61, %v1059_v58  ;;  %2254 = vst.msk [vmem:[%s3620_s3 + $0x94] sm:$0x1] %vm827_vm5, %v2488_v49  ;;  %2256 = vst.msk [vmem:[%s3620_s3 + $0x9c] sm:$0x1] %vm827_vm5, %v2488_v49 }
  0xde   :  { %v1065_v2 = vpop.permute.xlu1 %1064  ;;  %v1063_v3 = vpop.permute.xlu0 %1062 }
  0xdf   :  { %v1213_v21 = vsel %vm214_vm1, %v2902_v8, %v1065_v2  ;;  %v1210_v28 = vsel %vm214_vm1, %v2910_v17, %v1063_v3 }
  0xe2   :  { %v1187_v7 = vpop.permute.xlu1 %1186  ;;  %v1185_v29 = vpop.permute.xlu0 %1184 }
  0xe3   :  { %v1232_v34 = vsel %vm242_vm2, %v1207_v24, %v1187_v7  ;;  %v1230_v18 = vsel %vm242_vm2, %v1204_v27, %v1185_v29 }
  0xe4   :  { %v2216_v23 = vcombine.low %v1230_v18, %v1232_v34 }
  0xe6   :  { %v1191_v16 = vpop.permute.xlu1 %1190  ;;  %2385 = vmatprep.mubr.msk.bf16.mxu0 %vm509_vm3, %v2216_v23  ;;  %v1189_v57 = vpop.permute.xlu0 %1188 }
  0xe7   :  { %v1236_v46 = vsel %vm242_vm2, %v1213_v21, %v1191_v16  ;;  %v1234_v61 = vsel %vm242_vm2, %v1210_v28, %v1189_v57 }
  0xe8   :  { %v2217_v48 = vcombine.low %v1234_v61, %v1236_v46  ;;  %v2227_v22 = vcombine.low %v1232_v34, %v1234_v61 }
  0xea   :  { %v1193_v30 = vpop.permute.xlu1 %1192  ;;  %2386 = vmatmul.mubr.msk.bf16.vlgmr.msra.gmra.mxu0 %vm509_vm3, %v2217_v48  ;;  %2395 = vmatprep.mubr.msk.bf16.mxu1 %vm509_vm3, %v2227_v22  ;;  %v1067_v38 = vpop.permute.xlu0 %1066 }
  0xeb   :  { %v1216_v8 = vsel %vm214_vm1, %v2928_v32, %v1067_v38 }
  0xec   :  { %v1238_v17 = vsel %vm242_vm2, %v1216_v8, %v1193_v30 }
  0xed   :  { %v2228_v40 = vcombine.low %v1236_v46, %v1238_v17 }
  0xee   :  { %v1071_v35 = vpop.permute.xlu1 %1070  ;;  %v1069_v36 = vpop.permute.xlu0 %1068 }
  0xef   :  { %2396 = vmatmul.mubr.msk.bf16.vlgmr.msra.gmra.mxu1 %vm509_vm3, %v2228_v40  ;;  %v1219_v41 = vsel %vm214_vm1, %v2947_v56, %v1069_v36  ;;  %v1222_v5 = vsel %vm214_vm1, %v2966_v20, %v1071_v35  ;;  %v2098_v40 = vld [vmem:[%s3620_s3 + $0x1c] sm:$0x1] }
  0xf2   :  { %v1195_v59 = vpop.permute.xlu1 %1194  ;;  %v1073_v42 = vpop.permute.xlu0 %1072 }
  0xf3   :  { %v1240_v6 = vsel %vm242_vm2, %v1219_v41, %v1195_v59  ;;  %v1225_v32 = vsel %vm214_vm1, %v2958_v12, %v1073_v42 }
  0xf4   :  { %v2218_v4 = vcombine.low %v1238_v17, %v1240_v6  ;;  %v2096_v17 = vld [vmem:[%s3620_s3 + $0x18] sm:$0xf] }
  0xf6   :  { %v1199_v37 = vpop.permute.xlu1 %1198  ;;  %2389 = vmatprep.mubr.msk.bf16.mxu0 %vm509_vm3, %v2218_v4  ;;  %v1197_v14 = vpop.permute.xlu0 %1196  ;;  %v2088_v4 = vld [vmem:[%s3620_s3 + $0x8] sm:$0xf] }
  0xf7   :  { %v1244_v43 = vsel %vm242_vm2, %v1225_v32, %v1199_v37  ;;  %v1242_v45 = vsel %vm242_vm2, %v1222_v5, %v1197_v14  ;;  %v2090_v5 = vld [vmem:[%s3620_s3 + $0xc] sm:$0x1] }
  0xf8   :  { %v2219_v56 = vcombine.low %v1242_v45, %v1244_v43  ;;  %v2229_v47 = vcombine.low %v1240_v6, %v1242_v45 }
  0xfa   :  { %2390 = vmatmul.mubr.msk.bf16.gmra.mxu0 %vm509_vm3, %v2219_v56  ;;  %2399 = vmatprep.mubr.msk.bf16.mxu1 %vm509_vm3, %v2229_v47  ;;  %v1075_v12 = vpop.permute.xlu0 %1074  ;;  %v1201_v20 = vpop.permute.xlu1 %1200 }
  0xfb   :  { %v1228_v19 = vsel %vm214_vm1, %v2981_v39, %v1075_v12 }
  0xfc   :  { %v1246_v25 = vsel %vm242_vm2, %v1228_v19, %v1201_v20 }
  0xfd   :  { %v2230_v62 = vcombine.low %v1244_v43, %v1246_v25  ;;  %v2100_v25 = vld [vmem:[%s3620_s3 + $0x20] sm:$0xf] }
  0xff   :  { %2400 = vmatmul.mubr.msk.bf16.gmra.mxu1 %vm509_vm3, %v2230_v62  ;;  %v2102_v62 = vld [vmem:[%s3620_s3 + $0x24] sm:$0x1] }
 0x14a   :  { %v2347_v50 = vpop.f32.mrf.mxu0 }
 0x14c   :  { %v560_v51 = vpop.f32.mrf.mxu0 }
 0x14e   :  { %v2348_v0 = vpop.f32.mrf.mxu0 }
 0x150   :  { %v563_v52 = vpop.f32.mrf.mxu0 }
 0x156   :  { %v2357_v31 = vpop.f32.mrf.mxu1 }
 0x157   :  { %v674_v39 = vadd.f32 %v2357_v31, %v2347_v50 }
 0x158   :  { %v665_v26 = vpop.f32.mrf.mxu1 }
 0x159   :  { %v666_v55 = vadd.f32 %v665_v26, %v560_v51  ;;  %v2092_v26 = vld [vmem:[%s3620_s3 + $0x10] sm:$0xf] }
 0x15a   :  { %v2358_v11 = vpop.f32.mrf.mxu1 }
 0x15b   :  { %v677_v13 = vadd.f32 %v2358_v11, %v2348_v0 }
 0x15c   :  { %v668_v63 = vpop.f32.mrf.mxu1 }
 0x15d   :  { %v669_v7 = vadd.f32 %v668_v63, %v563_v52 }
 0x16a   :  { %v3313_v53 = vpop.f32.mrf.mxu0 }
 0x16c   :  { %v3315_v54 = vpop.f32.mrf.mxu0 }
 0x16e   :  { %v3317_v33 = vpop.f32.mrf.mxu0 }
 0x170   :  { %v3319_v10 = vpop.f32.mrf.mxu0 }
 0x172   :  { %v2367_v15 = vpop.f32.mrf.mxu0 }
 0x173   :  { %v792_v9 = vadd.f32 %v2367_v15, %v674_v39  ;;  %v2094_v39 = vld [vmem:[%s3620_s3 + $0x14] sm:$0x1] }
 0x174   :  { %v759_v60 = vpop.f32.mrf.mxu0 }
 0x175   :  { %v807_v1 = vadd.f32 %v3324_v44, %v792_v9  ;;  %v790_v58 = vadd.f32 %v759_v60, %v666_v55 }
 0x176   :  { %v2368_v2 = vpop.f32.mrf.mxu0  ;;  %v2361_v56 = vpop.f32.mrf.mxu1 }
 0x177   :  { %v815_v3 = vmax.f32 %v807_v1, 0.0  ;;  %v805_v24 = vadd.f32 %v3324_v44, %v790_v58  ;;  %v793_v27 = vadd.f32 %v2368_v2, %v677_v13  ;;  %v690_v1 = vadd.f32 %v2361_v56, %v3313_v53 }
 0x178   :  { %v762_v29 = vpop.f32.mrf.mxu0  ;;  %v681_v31 = vpop.f32.mrf.mxu1 }
 0x179   :  { %v2299_v34 = vpack.c.bf16 %v815_v3, %v815_v3  ;;  %v813_v18 = vmax.f32 %v805_v24, 0.0  ;;  %v808_v23 = vadd.f32 %v3324_v44, %v793_v27  ;;  %v791_v21 = vadd.f32 %v762_v29, %v669_v7 }
 0x17a   :  { %v2362_v63 = vpop.f32.mrf.mxu1  ;;  %v682_v2 = vadd.f32 %v681_v31, %v3315_v54  ;;  %v2118_v31 = vld [vmem:[%s3620_s3 + $0x44] sm:$0x1] }
 0x17b   :  { %v884_v28 = vshrl.u32 %v2299_v34, 16  ;;  %v2297_v16 = vpack.c.bf16 %v813_v18, %v813_v18  ;;  %v816_v57 = vmax.f32 %v808_v23, 0.0  ;;  %v806_v46 = vadd.f32 %v3324_v44, %v791_v21 }
 0x17c   :  { %v887_v48 = vshll.u32 %v2299_v34, 16  ;;  %v684_v24 = vpop.f32.mrf.mxu1  ;;  %v693_v7 = vadd.f32 %v2362_v63, %v3317_v33 }
 0x17d   :  { %v886_v61 = vrot.slane %v884_v28, 7  ;;  %v868_v30 = vshrl.u32 %v2297_v16, 16  ;;  %v2300_v38 = vpack.c.bf16 %v816_v57, %v816_v57  ;;  %v871_v35 = vshll.u32 %v2297_v16, 16 }
 0x17e   :  { %v814_v36 = vmax.f32 %v806_v46, 0.0  ;;  %v685_v23 = vadd.f32 %v684_v24, %v3319_v10 }
 0x17f   :  { %v889_v41 = vor.u32 %v887_v48, %v886_v61  ;;  %v890_v59 = vrot.slane %v886_v61, 4  ;;  %v870_v42 = vrot.slane %v868_v30, 7  ;;  %v892_v6 = vshrl.u32 %v2300_v38, 16 }
 0x180   :  { %v2298_v32 = vpack.c.bf16 %v814_v36, %v814_v36  ;;  %v895_v49 = vshll.u32 %v2300_v38, 16 }
 0x181   :  { %v967_v37 = vsel %vm3331_vm8, %v889_v41, %v2096_v17  ;;  %v970_v14 = vsel %vm3336_vm9, %v890_v59, %v2098_v40  ;;  %v873_v43 = vor.u32 %v871_v35, %v870_v42  ;;  %v874_v45 = vrot.slane %v870_v42, 4  ;;  %v2112_v59 = vld [vmem:[%s3620_s3 + $0x38] sm:$0xf]  ;;  %v2114_v42 = vld [vmem:[%s3620_s3 + $0x3c] sm:$0x1] }
 0x182   :  { %2097 = vst [vmem:[%s3620_s3 + $0x18] sm:$0xf] %v967_v37  ;;  %2099 = vst [vmem:[%s3620_s3 + $0x1c] sm:$0x1] %v970_v14  ;;  %v894_v47 = vrot.slane %v892_v6, 7  ;;  %v876_v12 = vshrl.u32 %v2298_v32, 16 }
 0x183   :  { %v952_v20 = vsel %vm3331_vm8, %v873_v43, %v2088_v4  ;;  %v958_v19 = vsel %vm3336_vm9, %v874_v45, %v2090_v5  ;;  %v879_v52 = vshll.u32 %v2298_v32, 16  ;;  %v2104_v43 = vld [vmem:[%s3620_s3 + $0x28] sm:$0xf]  ;;  %v2106_v45 = vld [vmem:[%s3620_s3 + $0x2c] sm:$0x1] }
 0x184   :  { %2089 = vst [vmem:[%s3620_s3 + $0x8] sm:$0xf] %v952_v20  ;;  %2091 = vst [vmem:[%s3620_s3 + $0xc] sm:$0x1] %v958_v19  ;;  %v897_v50 = vor.u32 %v895_v49, %v894_v47  ;;  %v898_v51 = vrot.slane %v894_v47, 4  ;;  %v878_v0 = vrot.slane %v876_v12, 7 }
 0x186   :  { %v973_v11 = vsel %vm3331_vm8, %v897_v50, %v2100_v25  ;;  %v976_v15 = vsel %vm3336_vm9, %v898_v51, %v2102_v62  ;;  %v881_v55 = vor.u32 %v879_v52, %v878_v0  ;;  %v882_v9 = vrot.slane %v878_v0, 4  ;;  %v2377_v48 = vpop.f32.mrf.mxu1  ;;  %v2116_v52 = vld [vmem:[%s3620_s3 + $0x40] sm:$0xf] }
 0x187   :  { %2101 = vst [vmem:[%s3620_s3 + $0x20] sm:$0xf] %v973_v11  ;;  %2103 = vst [vmem:[%s3620_s3 + $0x24] sm:$0x1] %v976_v15 }
 0x188   :  { %v961_v60 = vsel %vm3331_vm8, %v881_v55, %v2092_v26  ;;  %v964_v13 = vsel %vm3336_vm9, %v882_v9, %v2094_v39  ;;  %v1543_v41 = vpop.f32.mrf.mxu1  ;;  %v2108_v55 = vld [vmem:[%s3620_s3 + $0x30] sm:$0xf]  ;;  %v2110_v9 = vld [vmem:[%s3620_s3 + $0x34] sm:$0x1] }
 0x189   :  { %2093 = vst [vmem:[%s3620_s3 + $0x10] sm:$0xf] %v961_v60  ;;  %2095 = vst [vmem:[%s3620_s3 + $0x14] sm:$0x1] %v964_v13 }
 0x18a   :  { %v2378_v19 = vpop.f32.mrf.mxu1 }
 0x18b   :  { %v2371_v58 = vpop.f32.mrf.mxu0 }
 0x18c   :  { %v796_v3 = vadd.f32 %v2371_v58, %v690_v1  ;;  %v1546_v60 = vpop.f32.mrf.mxu1 }
 0x18d   :  { %v775_v27 = vpop.f32.mrf.mxu0 }
 0x18e   :  { %v811_v29 = vadd.f32 %v3324_v44, %v796_v3  ;;  %v794_v34 = vadd.f32 %v775_v27, %v682_v2 }
 0x18f   :  { %v2372_v18 = vpop.f32.mrf.mxu0 }
 0x190   :  { %v819_v21 = vmax.f32 %v811_v29, 0.0  ;;  %v809_v28 = vadd.f32 %v3324_v44, %v794_v34  ;;  %v797_v16 = vadd.f32 %v2372_v18, %v693_v7 }
 0x191   :  { %v778_v57 = vpop.f32.mrf.mxu0 }
 0x192   :  { %v2303_v53 = vpack.c.bf16 %v819_v21, %v819_v21  ;;  %v817_v46 = vmax.f32 %v809_v28, 0.0  ;;  %v812_v54 = vadd.f32 %v3324_v44, %v797_v16  ;;  %v795_v61 = vadd.f32 %v778_v57, %v685_v23 }
 0x194   :  { %v916_v30 = vshrl.u32 %v2303_v53, 16  ;;  %v2301_v38 = vpack.c.bf16 %v817_v46, %v817_v46  ;;  %v820_v33 = vmax.f32 %v812_v54, 0.0  ;;  %v810_v17 = vadd.f32 %v3324_v44, %v795_v61 }
 0x195   :  { %v919_v35 = vshll.u32 %v2303_v53, 16 }
 0x196   :  { %v918_v40 = vrot.slane %v916_v30, 7  ;;  %v900_v36 = vshrl.u32 %v2301_v38, 16  ;;  %v2304_v10 = vpack.c.bf16 %v820_v33, %v820_v33  ;;  %v903_v6 = vshll.u32 %v2301_v38, 16 }
 0x197   :  { %v818_v4 = vmax.f32 %v810_v17, 0.0 }
 0x198   :  { %v921_v5 = vor.u32 %v919_v35, %v918_v40  ;;  %v922_v32 = vrot.slane %v918_v40, 4  ;;  %v902_v37 = vrot.slane %v900_v36, 7  ;;  %v924_v14 = vshrl.u32 %v2304_v10, 16 }
 0x199   :  { %v2302_v56 = vpack.c.bf16 %v818_v4, %v818_v4  ;;  %v927_v62 = vshll.u32 %v2304_v10, 16 }
 0x19a   :  { %v991_v47 = vsel %vm3331_vm8, %v921_v5, %v2112_v59  ;;  %v994_v49 = vsel %vm3336_vm9, %v922_v32, %v2114_v42  ;;  %v905_v12 = vor.u32 %v903_v6, %v902_v37  ;;  %v906_v20 = vrot.slane %v902_v37, 4  ;;  %v2381_v24 = vpop.f32.mrf.mxu1 }
 0x19b   :  { %2113 = vst [vmem:[%s3620_s3 + $0x38] sm:$0xf] %v991_v47  ;;  %2115 = vst [vmem:[%s3620_s3 + $0x3c] sm:$0x1] %v994_v49  ;;  %v926_v25 = vrot.slane %v924_v14, 7  ;;  %v908_v50 = vshrl.u32 %v2302_v56, 16 }
 0x19c   :  { %v979_v51 = vsel %vm3331_vm8, %v905_v12, %v2104_v43  ;;  %v982_v0 = vsel %vm3336_vm9, %v906_v20, %v2106_v45  ;;  %v911_v15 = vshll.u32 %v2302_v56, 16  ;;  %v1559_v27 = vpop.f32.mrf.mxu1  ;;  %v2273_v56 = vld [vmem:[%s3620_s3 + $0x68] sm:$0xf]  ;;  %v2275_v47 = vld [vmem:[%s3620_s3 + $0x6c] sm:$0x1] }
 0x19d   :  { %2105 = vst [vmem:[%s3620_s3 + $0x28] sm:$0xf] %v979_v51  ;;  %2107 = vst [vmem:[%s3620_s3 + $0x2c] sm:$0x1] %v982_v0  ;;  %v929_v26 = vor.u32 %v927_v62, %v926_v25  ;;  %v930_v39 = vrot.slane %v926_v25, 4  ;;  %v910_v11 = vrot.slane %v908_v50, 7 }
 0x19e   :  { %v3476_v7 = vpop.f32.mrf.mxu1  ;;  %v2265_v51 = vld [vmem:[%s3620_s3 + $0x58] sm:$0xf]  ;;  %v2267_v0 = vld [vmem:[%s3620_s3 + $0x5c] sm:$0x1] }
 0x19f   :  { %v997_v13 = vsel %vm3331_vm8, %v929_v26, %v2116_v52  ;;  %v1000_v63 = vsel %vm3336_vm9, %v930_v39, %v2118_v31  ;;  %v913_v1 = vor.u32 %v911_v15, %v910_v11  ;;  %v914_v58 = vrot.slane %v910_v11, 4 }
 0x1a0   :  { %2117 = vst [vmem:[%s3620_s3 + $0x40] sm:$0xf] %v997_v13  ;;  %2119 = vst [vmem:[%s3620_s3 + $0x44] sm:$0x1] %v1000_v63  ;;  %v3478_v18 = vpop.f32.mrf.mxu1 }
 0x1a1   :  { %v985_v2 = vsel %vm3331_vm8, %v913_v1, %v2108_v55  ;;  %v988_v3 = vsel %vm3336_vm9, %v914_v58, %v2110_v9 }
 0x1a2   :  { %2109 = vst [vmem:[%s3620_s3 + $0x30] sm:$0xf] %v985_v2  ;;  %2111 = vst [vmem:[%s3620_s3 + $0x34] sm:$0x1] %v988_v3  ;;  %v2277_v2 = vld [vmem:[%s3620_s3 + $0x70] sm:$0xf] }
 0x1a3   :  { %v2279_v3 = vld [vmem:[%s3620_s3 + $0x74] sm:$0x1] }
 0x1aa   :  { %v2387_v29 = vpop.f32.mrf.mxu0 }
 0x1ab   :  { %v1657_v23 = vadd.f32 %v2387_v29, %v2377_v48 }
 0x1ac   :  { %v1648_v34 = vpop.f32.mrf.mxu0 }
 0x1ad   :  { %v1649_v16 = vadd.f32 %v1648_v34, %v1543_v41 }
 0x1ae   :  { %v2388_v21 = vpop.f32.mrf.mxu0 }
 0x1af   :  { %v2397_v28 = vpop.f32.mrf.mxu1  ;;  %v1660_v54 = vadd.f32 %v2388_v21, %v2378_v19 }
 0x1b0   :  { %v1774_v57 = vadd.f32 %v2397_v28, %v1657_v23  ;;  %v1651_v53 = vpop.f32.mrf.mxu0 }
 0x1b1   :  { %v1741_v46 = vpop.f32.mrf.mxu1  ;;  %v1652_v17 = vadd.f32 %v1651_v53, %v1546_v60  ;;  %v2269_v53 = vld [vmem:[%s3620_s3 + $0x60] sm:$0xf] }
 0x1b2   :  { %v1789_v61 = vadd.f32 %v3324_v44, %v1774_v57  ;;  %v1772_v30 = vadd.f32 %v1741_v46, %v1649_v16 }
 0x1b3   :  { %v2398_v38 = vpop.f32.mrf.mxu1 }
 0x1b4   :  { %v1797_v33 = vmax.f32 %v1789_v61, 0.0  ;;  %v1787_v40 = vadd.f32 %v3324_v44, %v1772_v30  ;;  %v1775_v35 = vadd.f32 %v2398_v38, %v1660_v54 }
 0x1b5   :  { %v1744_v36 = vpop.f32.mrf.mxu1 }
 0x1b6   :  { %v2307_v10 = vpack.c.bf16 %v1797_v33, %v1797_v33  ;;  %v1795_v59 = vmax.f32 %v1787_v40, 0.0  ;;  %v1790_v48 = vadd.f32 %v3324_v44, %v1775_v35  ;;  %v1773_v42 = vadd.f32 %v1744_v36, %v1652_v17 }
 0x1b8   :  { %v1865_v41 = vshrl.u32 %v2307_v10, 16  ;;  %v2305_v6 = vpack.c.bf16 %v1795_v59, %v1795_v59  ;;  %v1798_v4 = vmax.f32 %v1790_v48, 0.0  ;;  %v1788_v5 = vadd.f32 %v3324_v44, %v1773_v42 }
 0x1b9   :  { %v1868_v37 = vshll.u32 %v2307_v10, 16 }
 0x1ba   :  { %v1867_v32 = vrot.slane %v1865_v41, 7  ;;  %v1849_v14 = vshrl.u32 %v2305_v6, 16  ;;  %v2308_v43 = vpack.c.bf16 %v1798_v4, %v1798_v4  ;;  %v2391_v45 = vpop.f32.mrf.mxu0  ;;  %v1852_v49 = vshll.u32 %v2305_v6, 16 }
 0x1bb   :  { %v1796_v12 = vmax.f32 %v1788_v5, 0.0  ;;  %v1673_v31 = vadd.f32 %v2391_v45, %v2381_v24 }
 0x1bc   :  { %v1870_v20 = vor.u32 %v1868_v37, %v1867_v32  ;;  %v1871_v19 = vrot.slane %v1867_v32, 4  ;;  %v1851_v25 = vrot.slane %v1849_v14, 7  ;;  %v1873_v62 = vshrl.u32 %v2308_v43, 16  ;;  %v1664_v50 = vpop.f32.mrf.mxu0 }
 0x1bd   :  { %v2306_v52 = vpack.c.bf16 %v1796_v12, %v1796_v12  ;;  %v1876_v60 = vshll.u32 %v2308_v43, 16  ;;  %v1665_v24 = vadd.f32 %v1664_v50, %v1559_v27  ;;  %v2271_v27 = vld [vmem:[%s3620_s3 + $0x64] sm:$0x1]  ;;  %v2291_v12 = vld [vmem:[%s3620_s3 + $0x8c] sm:$0x1] }
 0x1be   :  { %v1942_v26 = vsel %vm3331_vm8, %v1870_v20, %v2273_v56  ;;  %v1945_v39 = vsel %vm3336_vm9, %v1871_v19, %v2275_v47  ;;  %v1854_v11 = vor.u32 %v1852_v49, %v1851_v25  ;;  %v1855_v15 = vrot.slane %v1851_v25, 4  ;;  %v2392_v55 = vpop.f32.mrf.mxu0  ;;  %v2289_v49 = vld [vmem:[%s3620_s3 + $0x88] sm:$0xf] }
 0x1bf   :  { %2274 = vst [vmem:[%s3620_s3 + $0x68] sm:$0xf] %v1942_v26  ;;  %2276 = vst [vmem:[%s3620_s3 + $0x6c] sm:$0x1] %v1945_v39  ;;  %v1875_v9 = vrot.slane %v1873_v62, 7  ;;  %v1857_v13 = vshrl.u32 %v2306_v52, 16  ;;  %v2401_v63 = vpop.f32.mrf.mxu1  ;;  %v1676_v46 = vadd.f32 %v2392_v55, %v3476_v7 }
 0x1c0   :  { %v1930_v1 = vsel %vm3331_vm8, %v1854_v11, %v2265_v51  ;;  %v1933_v58 = vsel %vm3336_vm9, %v1855_v15, %v2267_v0  ;;  %v1778_v29 = vadd.f32 %v2401_v63, %v1673_v31  ;;  %v1860_v28 = vshll.u32 %v2306_v52, 16  ;;  %v1667_v16 = vpop.f32.mrf.mxu0  ;;  %v2283_v0 = vld [vmem:[%s3620_s3 + $0x7c] sm:$0x1]  ;;  %v2293_v63 = vld [vmem:[%s3620_s3 + $0x90] sm:$0xf] }
 0x1c1   :  { %2266 = vst [vmem:[%s3620_s3 + $0x58] sm:$0xf] %v1930_v1  ;;  %2268 = vst [vmem:[%s3620_s3 + $0x5c] sm:$0x1] %v1933_v58  ;;  %v1878_v34 = vor.u32 %v1876_v60, %v1875_v9  ;;  %v1879_v23 = vrot.slane %v1875_v9, 4  ;;  %v1859_v21 = vrot.slane %v1857_v13, 7  ;;  %v1757_v57 = vpop.f32.mrf.mxu1  ;;  %v1668_v35 = vadd.f32 %v1667_v16, %v3478_v18 }
 0x1c2   :  { %v1793_v54 = vadd.f32 %v3324_v44, %v1778_v29  ;;  %v1776_v61 = vadd.f32 %v1757_v57, %v1665_v24  ;;  %v2295_v1 = vld [vmem:[%s3620_s3 + $0x94] sm:$0x1]  ;;  %v2285_v29 = vld [vmem:[%s3620_s3 + $0x80] sm:$0xf] }
 0x1c3   :  { %v1948_v30 = vsel %vm3331_vm8, %v1878_v34, %v2277_v2  ;;  %v1951_v38 = vsel %vm3336_vm9, %v1879_v23, %v2279_v3  ;;  %v1862_v33 = vor.u32 %v1860_v28, %v1859_v21  ;;  %v1863_v17 = vrot.slane %v1859_v21, 4  ;;  %v2402_v40 = vpop.f32.mrf.mxu1  ;;  %v2287_v34 = vld [vmem:[%s3620_s3 + $0x84] sm:$0x1] }
 0x1c4   :  { %2278 = vst [vmem:[%s3620_s3 + $0x70] sm:$0xf] %v1948_v30  ;;  %2280 = vst [vmem:[%s3620_s3 + $0x74] sm:$0x1] %v1951_v38  ;;  %v1801_v7 = vmax.f32 %v1793_v54, 0.0  ;;  %v1791_v36 = vadd.f32 %v3324_v44, %v1776_v61  ;;  %v1779_v10 = vadd.f32 %v2402_v40, %v1676_v46 }
 0x1c5   :  { %v1936_v59 = vsel %vm3331_vm8, %v1862_v33, %v2269_v53  ;;  %v1939_v48 = vsel %vm3336_vm9, %v1863_v17, %v2271_v27  ;;  %v1760_v42 = vpop.f32.mrf.mxu1 }
 0x1c6   :  { %2270 = vst [vmem:[%s3620_s3 + $0x60] sm:$0xf] %v1936_v59  ;;  %2272 = vst [vmem:[%s3620_s3 + $0x64] sm:$0x1] %v1939_v48  ;;  %v2311_v41 = vpack.c.bf16 %v1801_v7, %v1801_v7  ;;  %v1799_v18 = vmax.f32 %v1791_v36, 0.0  ;;  %v1794_v6 = vadd.f32 %v3324_v44, %v1779_v10  ;;  %v1777_v4 = vadd.f32 %v1760_v42, %v1668_v35 }
 0x1c8   :  { %v1897_v5 = vshrl.u32 %v2311_v41, 16  ;;  %v2309_v32 = vpack.c.bf16 %v1799_v18, %v1799_v18  ;;  %v1802_v37 = vmax.f32 %v1794_v6, 0.0  ;;  %v1792_v14 = vadd.f32 %v3324_v44, %v1777_v4  ;;  %v2281_v44 = vld [vmem:[%s3620_s3 + $0x78] sm:$0xf] }
 0x1c9   :  { %v1900_v45 = vshll.u32 %v2311_v41, 16 }
 0x1ca   :  { %v1899_v43 = vrot.slane %v1897_v5, 7  ;;  %v1881_v56 = vshrl.u32 %v2309_v32, 16  ;;  %v2312_v47 = vpack.c.bf16 %v1802_v37, %v1802_v37  ;;  %v1884_v20 = vshll.u32 %v2309_v32, 16 }
 0x1cb   :  { %v1800_v19 = vmax.f32 %v1792_v14, 0.0 }
 0x1cc   :  { %v1902_v25 = vor.u32 %v1900_v45, %v1899_v43  ;;  %v1903_v62 = vrot.slane %v1899_v43, 4  ;;  %v1883_v50 = vrot.slane %v1881_v56, 7  ;;  %v1905_v51 = vshrl.u32 %v2312_v47, 16 }
 0x1cd   :  { %v2310_v52 = vpack.c.bf16 %v1800_v19, %v1800_v19  ;;  %v1908_v55 = vshll.u32 %v2312_v47, 16 }
 0x1ce   :  { %v1966_v31 = vsel %vm3331_vm8, %v1902_v25, %v2289_v49  ;;  %v1969_v26 = vsel %vm3336_vm9, %v1903_v62, %v2291_v12  ;;  %v1886_v39 = vor.u32 %v1884_v20, %v1883_v50  ;;  %v1887_v11 = vrot.slane %v1883_v50, 4 }
 0x1cf   :  { %2290 = vst [vmem:[%s3620_s3 + $0x88] sm:$0xf] %v1966_v31  ;;  %2292 = vst [vmem:[%s3620_s3 + $0x8c] sm:$0x1] %v1969_v26  ;;  %v1907_v15 = vrot.slane %v1905_v51, 7  ;;  %v1889_v9 = vshrl.u32 %v2310_v52, 16 }
 0x1d0   :  { %v1954_v60 = vsel %vm3331_vm8, %v1886_v39, %v2281_v44  ;;  %v1957_v13 = vsel %vm3336_vm9, %v1887_v11, %v2283_v0  ;;  %v1892_v24 = vshll.u32 %v2310_v52, 16 }
 0x1d1   :  { %2282 = vst [vmem:[%s3620_s3 + $0x78] sm:$0xf] %v1954_v60  ;;  %2284 = vst [vmem:[%s3620_s3 + $0x7c] sm:$0x1] %v1957_v13  ;;  %v1910_v58 = vor.u32 %v1908_v55, %v1907_v15  ;;  %v1911_v2 = vrot.slane %v1907_v15, 4  ;;  %v1891_v3 = vrot.slane %v1889_v9, 7 }
 0x1d3   :  { %v1972_v23 = vsel %vm3331_vm8, %v1910_v58, %v2293_v63  ;;  %v1975_v21 = vsel %vm3336_vm9, %v1911_v2, %v2295_v1  ;;  %v1894_v28 = vor.u32 %v1892_v24, %v1891_v3  ;;  %v1895_v16 = vrot.slane %v1891_v3, 4 }
 0x1d4   :  { %2294 = vst [vmem:[%s3620_s3 + $0x90] sm:$0xf] %v1972_v23  ;;  %2296 = vst [vmem:[%s3620_s3 + $0x94] sm:$0x1] %v1975_v21 }
 0x1d5   :  { %v1960_v57 = vsel %vm3331_vm8, %v1894_v28, %v2285_v29  ;;  %v1963_v53 = vsel %vm3336_vm9, %v1895_v16, %v2287_v34 }
 0x1d6   :  { %2286 = vst [vmem:[%s3620_s3 + $0x80] sm:$0xf] %v1960_v57  ;;  %2288 = vst [vmem:[%s3620_s3 + $0x84] sm:$0x1] %v1963_v53 }

</bundles_post_ra>
